<compile_context>
chip_gen: v6e
topology: v6e:2x2x1
jax: 0.10.0
libtpu: 0.0.40
codegen_flags: <defaults>
</compile_context>

<pallas_src>
import functools

import jax
import jax.numpy as jnp
from jax.experimental import pallas as pl
from jax.experimental.pallas import tpu as pltpu

LN_EPS = 1e-5
WEIGHTS_FINAL_INIT = 0.003
BIAS_FINAL_INIT = 0.0003
V_HEAD_ROWS = 16  # replicate V weight to one full bf16 sublane tile (16, H)


# ----------------------------- fused kernel ---------------------------------


def _ln_relu(y, gamma, beta, out_dtype):
    """Single-pass LayerNorm over the lane (feature) axis + ReLU.

    Statistics are computed in one pass (E[y] and E[y^2] reduced independently,
    so the two cross-lane XLU reductions are not serialized); all arithmetic in
    f32, result cast once to the bf16 inter-layer activation dtype.
    """
    mean = jnp.mean(y, axis=-1, keepdims=True)
    mean_sq = jnp.mean(y * y, axis=-1, keepdims=True)
    var = jnp.maximum(mean_sq - mean * mean, 0.0)  # guard f32 cancellation
    y_norm = (y - mean) * jax.lax.rsqrt(var + LN_EPS)
    # The module applies relu twice (inside LinearLN and in forward); relu is
    # idempotent, so a single relu is semantically identical.
    return jnp.maximum(y_norm * gamma + beta, 0.0).astype(out_dtype)


def _make_ddpg_critic_kernel(n_layers, compute_dtype):
    """Fused (n_layers x LinearLN) + V-head kernel for one batch tile.

    Ref order: x, actions,
               [w, b, gamma, beta] per non-final layer,
               [w_x, w_a, b, gamma, beta] for the final LinearLN layer,
               wv, bv, out.
    Output block is (1, tile_b): batch on lanes (unmasked, lane-dense stores).
    """

    def kernel(*refs):
        x_ref, a_ref = refs[0], refs[1]
        o_ref = refs[-1]
        idx = 2

        # Cast activations to bf16 once; matmuls accumulate in f32.
        h = x_ref[...].astype(compute_dtype)
        a_bf = a_ref[...].astype(compute_dtype)

        for i in range(n_layers):
            last = i == n_layers - 1
            if last:
                w_x_ref, w_a_ref, b_ref, g_ref, bt_ref = refs[idx:idx + 5]
                idx += 5
                # concat(x, actions) @ W  ==  x @ W_x + a @ W_a  (split weights)
                y = (
                    jnp.dot(h, w_x_ref[...], preferred_element_type=jnp.float32)
                    + jnp.dot(a_bf, w_a_ref[...],
                              preferred_element_type=jnp.float32)
                )
            else:
                w_ref, b_ref, g_ref, bt_ref = refs[idx:idx + 4]
                idx += 4
                y = jnp.dot(h, w_ref[...], preferred_element_type=jnp.float32)
            h = _ln_relu(y + b_ref[...], g_ref[...], bt_ref[...], compute_dtype)

        # V head: (V_ROWS, H) x (tile_b, H)^T -> (V_ROWS, tile_b) on the MXU.
        # All rows of wv are identical (replicated at init), so row 0 is the
        # result, already lane-dense (batch on lanes) -> clean unmasked store.
        wv_ref, bv_ref = refs[idx], refs[idx + 1]
        v_rows = jax.lax.dot_general(
            wv_ref[...], h,
            dimension_numbers=(((1,), (1,)), ((), ())),
            preferred_element_type=jnp.float32)
        o_ref[...] = v_rows[0:1, :] + bv_ref[...]

    return kernel


# ------------------------------ wrapper --------------------------------------


def _resident_spec(shape):
    """Full-array block, same block every grid step (weights stay VMEM-resident).

    Buffered(1): double-buffering a grid-invariant block is pure VMEM waste.
    """
    ndim = len(shape)
    index_map = lambda i: (0,) * ndim
    try:
        return pl.BlockSpec(shape, index_map, pipeline_mode=pl.Buffered(1))
    except (TypeError, ValueError):  # fallback for older Pallas versions
        return pl.BlockSpec(shape, index_map)


def _vmem_limit_bytes():
    """Generation-aware VMEM budget: ~75% of physical capacity."""
    try:
        cap = int(pltpu.get_tpu_info().vmem_capacity_bytes)
    except Exception:
        cap = 64 * 1024 * 1024  # conservative (v7x-sized) fallback
    return max(32 * 1024 * 1024, (cap * 3) // 4)


def _pick_tile_b(B, requested):
    """Pick a batch tile: divides B, lane-dense (multiple of 128) unless full-B,
    and preferably yielding >=2 grid steps so v7x's 2 TensorCores both work."""
    def valid(t):
        return t > 0 and B % t == 0 and (t == B or t % 128 == 0)

    if requested is not None and valid(requested):
        return requested
    for t in (256, 128):
        if valid(t) and B // t >= 2:
            return t
    for t in (256, 128):
        if valid(t):
            return t
    return B  # single full-batch block (block == full array dims, always legal)


@functools.partial(jax.jit, static_argnames=("tile_b",))
def ddpg_critic_forward(params, x, actions, tile_b=None):
    layers, v = params
    n_layers = len(layers)
    B, in_dim = x.shape
    a_dim = actions.shape[1]

    tile_b = _pick_tile_b(B, tile_b)
    grid = (B // tile_b,)

    # Flatten parameters in the order the kernel expects.
    weight_args = []
    for i, layer in enumerate(layers):
        if i == n_layers - 1:
            weight_args += [layer["w_x"], layer["w_a"], layer["b"],
                            layer["gamma"], layer["beta"]]
        else:
            weight_args += [layer["w"], layer["b"], layer["gamma"], layer["beta"]]
    weight_args += [v["w"], v["b"]]

    in_specs = [
        pl.BlockSpec((tile_b, in_dim), lambda i: (i, 0)),   # x tile
        pl.BlockSpec((tile_b, a_dim), lambda i: (i, 0)),    # actions tile
    ] + [_resident_spec(w.shape) for w in weight_args]       # resident weights

    first = layers[0]
    compute_dtype = (first["w"] if "w" in first else first["w_x"]).dtype
    kernel = _make_ddpg_critic_kernel(n_layers, compute_dtype)

    # Lane-dense output slab: (1, B), batch on lanes; reshape to (B, 1) outside.
    out_row = pl.pallas_call(
        kernel,
        out_shape=jax.ShapeDtypeStruct((1, B), jnp.float32),
        grid=grid,
        in_specs=in_specs,
        out_specs=pl.BlockSpec((1, tile_b), lambda i: (0, i)),
        compiler_params=pltpu.CompilerParams(
            dimension_semantics=("parallel",),     # shards across TCs on v7x
            vmem_limit_bytes=_vmem_limit_bytes(),
        ),
    )(x, actions, *weight_args)
    return out_row.reshape(B, 1)


# ------------------------- parameter construction ---------------------------


def _fan_in_uniform(key, shape, fan_in):
    w = 1.0 / (fan_in ** 0.5)
    return jax.random.uniform(key, shape, jnp.float32, minval=-w, maxval=w)


def init_ddpg_critic_params(key, input_dim, action_dim, fc_dims,
                            compute_dtype=jnp.bfloat16):
    """Init matching the PyTorch module (fan_in_uniform_init uses size(-1) for
    both weight and bias, i.e. fan_in=in_dim for W and fan_in=out_dim for b).
    Weights stored (in, out) in bf16; biases / LN params stored (1, Dout) f32."""
    sizes = [(input_dim, fc_dims[0][0])] + list(fc_dims)
    n = len(sizes)
    layers = []
    for i, (din, dout) in enumerate(sizes):
        last = i == n - 1
        full_in = din + action_dim if last else din
        key, kw, kb = jax.random.split(key, 3)
        w = _fan_in_uniform(kw, (full_in, dout), fan_in=full_in)
        b = _fan_in_uniform(kb, (dout,), fan_in=dout)
        layer = dict(
            b=b.reshape(1, dout).astype(jnp.float32),
            gamma=jnp.ones((1, dout), jnp.float32),
            beta=jnp.zeros((1, dout), jnp.float32),
        )
        if last:
            layer["w_x"] = w[:din].astype(compute_dtype)
            layer["w_a"] = w[din:].astype(compute_dtype)
        else:
            layer["w"] = w.astype(compute_dtype)
        layers.append(layer)

    key, kw, kb = jax.random.split(key, 3)
    v_in = fc_dims[-1][1]
    wv_row = jax.random.uniform(kw, (1, v_in), jnp.float32,
                                -WEIGHTS_FINAL_INIT, WEIGHTS_FINAL_INIT)
    v = dict(
        # Replicated to V_HEAD_ROWS sublane rows so the V head is a clean,
        # tile-aligned (16, H) x (tile_b, H)^T MXU matmul with lane-dense output.
        w=(jnp.broadcast_to(wv_row, (V_HEAD_ROWS, v_in)) + 0.0).astype(compute_dtype),
        b=jax.random.uniform(kb, (1, 1), jnp.float32,
                             -BIAS_FINAL_INIT, BIAS_FINAL_INIT),
    )
    return layers, v


# ------------------------------ reference ------------------------------------


def ddpg_critic_forward_ref(params, x, actions):
    """Pure-JAX reference with the same bf16-operand / f32-accumulation recipe."""
    layers, v = params
    n = len(layers)
    first = layers[0]
    cdt = (first["w"] if "w" in first else first["w_x"]).dtype
    h = x.astype(cdt)
    a = actions.astype(cdt)
    for i, layer in enumerate(layers):
        if i == n - 1:
            # concat(x, actions) @ W == x @ W_x + a @ W_a
            y = (jnp.dot(h, layer["w_x"], preferred_element_type=jnp.float32)
                 + jnp.dot(a, layer["w_a"], preferred_element_type=jnp.float32))
        else:
            y = jnp.dot(h, layer["w"], preferred_element_type=jnp.float32)
        h = _ln_relu(y + layer["b"], layer["gamma"], layer["beta"], cdt)
    scores = jax.lax.dot_general(
        v["w"][0:1], h, dimension_numbers=(((1,), (1,)), ((), ())),
        preferred_element_type=jnp.float32)            # (1, B)
    return (scores + v["b"]).reshape(-1, 1)            # (B, 1)


# -------------------------------- main ---------------------------------------

if __name__ == "__main__":
    # Demo shapes sized for the review's recommendations while staying small:
    # hidden dims are multiples of 256 (full MXU width on v6e/v7x), batch tile
    # of 128 lanes for dense output stores, and 2 grid steps (v7x megacore).
    B, INPUT_DIM, ACTION_DIM = 256, 32, 8
    FC_DIMS = [(256, 256), (256, 256)]
    TILE_B = 128

    key = jax.random.PRNGKey(0)
    key, kx, ka, kp = jax.random.split(key, 4)
    x = jax.random.normal(kx, (B, INPUT_DIM), jnp.float32)
    actions = jax.random.normal(ka, (B, ACTION_DIM), jnp.float32)

    params = init_ddpg_critic_params(kp, INPUT_DIM, ACTION_DIM, FC_DIMS)

    out = jax.block_until_ready(ddpg_critic_forward(params, x, actions, tile_b=TILE_B))
    ref = jax.block_until_ready(ddpg_critic_forward_ref(params, x, actions))

    assert out.shape == (B, 1), out.shape
    assert jnp.allclose(out, ref, atol=1e-3, rtol=1e-3), (out, ref)

    print("KERNEL_OK")
</pallas_src>

<mosaic_0001>
module attributes {stable_mosaic.version = 11 : i64} {
  func.func @kernel(%arg0: i32, %arg1: memref<128x32xf32, #tpu.memory_space<vmem>>, %arg2: memref<128x8xf32, #tpu.memory_space<vmem>>, %arg3: memref<32x256xbf16, #tpu.memory_space<vmem>>, %arg4: memref<1x256xf32, #tpu.memory_space<vmem>>, %arg5: memref<1x256xf32, #tpu.memory_space<vmem>>, %arg6: memref<1x256xf32, #tpu.memory_space<vmem>>, %arg7: memref<256x256xbf16, #tpu.memory_space<vmem>>, %arg8: memref<1x256xf32, #tpu.memory_space<vmem>>, %arg9: memref<1x256xf32, #tpu.memory_space<vmem>>, %arg10: memref<1x256xf32, #tpu.memory_space<vmem>>, %arg11: memref<256x256xbf16, #tpu.memory_space<vmem>>, %arg12: memref<8x256xbf16, #tpu.memory_space<vmem>>, %arg13: memref<1x256xf32, #tpu.memory_space<vmem>>, %arg14: memref<1x256xf32, #tpu.memory_space<vmem>>, %arg15: memref<1x256xf32, #tpu.memory_space<vmem>>, %arg16: memref<16x256xbf16, #tpu.memory_space<vmem>>, %arg17: memref<1x1xf32, #tpu.memory_space<vmem>>, %arg18: memref<1x128xf32, #tpu.memory_space<vmem>>) attributes {dimension_semantics = [#tpu.dimension_semantics<parallel>], iteration_bounds = array<i64: 2>, scalar_prefetch = 0 : i64, scratch_operands = 0 : i64, tpu.core_type = #tpu.core_type<tc>, window_params = [{transform_indices = @transform_0, window_bounds = array<i64: 128, 32>}, {transform_indices = @transform_1, window_bounds = array<i64: 128, 8>}, {pipeline_mode = #tpu.pipeline_mode<synchronous>, transform_indices = @transform_2, window_bounds = array<i64: 32, 256>}, {pipeline_mode = #tpu.pipeline_mode<synchronous>, transform_indices = @transform_3, window_bounds = array<i64: 1, 256>}, {pipeline_mode = #tpu.pipeline_mode<synchronous>, transform_indices = @transform_4, window_bounds = array<i64: 1, 256>}, {pipeline_mode = #tpu.pipeline_mode<synchronous>, transform_indices = @transform_5, window_bounds = array<i64: 1, 256>}, {pipeline_mode = #tpu.pipeline_mode<synchronous>, transform_indices = @transform_6, window_bounds = array<i64: 256, 256>}, {pipeline_mode = #tpu.pipeline_mode<synchronous>, transform_indices = @transform_7, window_bounds = array<i64: 1, 256>}, {pipeline_mode = #tpu.pipeline_mode<synchronous>, transform_indices = @transform_8, window_bounds = array<i64: 1, 256>}, {pipeline_mode = #tpu.pipeline_mode<synchronous>, transform_indices = @transform_9, window_bounds = array<i64: 1, 256>}, {pipeline_mode = #tpu.pipeline_mode<synchronous>, transform_indices = @transform_10, window_bounds = array<i64: 256, 256>}, {pipeline_mode = #tpu.pipeline_mode<synchronous>, transform_indices = @transform_11, window_bounds = array<i64: 8, 256>}, {pipeline_mode = #tpu.pipeline_mode<synchronous>, transform_indices = @transform_12, window_bounds = array<i64: 1, 256>}, {pipeline_mode = #tpu.pipeline_mode<synchronous>, transform_indices = @transform_13, window_bounds = array<i64: 1, 256>}, {pipeline_mode = #tpu.pipeline_mode<synchronous>, transform_indices = @transform_14, window_bounds = array<i64: 1, 256>}, {pipeline_mode = #tpu.pipeline_mode<synchronous>, transform_indices = @transform_15, window_bounds = array<i64: 16, 256>}, {pipeline_mode = #tpu.pipeline_mode<synchronous>, transform_indices = @transform_16, window_bounds = array<i64: 1, 1>}, {transform_indices = @transform_17, window_bounds = array<i64: 1, 128>}]} {
    %c0 = arith.constant 0 : index
    %c0_0 = arith.constant 0 : index
    %0 = vector.load %arg1[%c0, %c0_0] : memref<128x32xf32, #tpu.memory_space<vmem>>, vector<128x32xf32>
    %1 = arith.truncf %0 : vector<128x32xf32> to vector<128x32xbf16>
    %c0_1 = arith.constant 0 : index
    %c0_2 = arith.constant 0 : index
    %2 = vector.load %arg2[%c0_1, %c0_2] : memref<128x8xf32, #tpu.memory_space<vmem>>, vector<128x8xf32>
    %3 = arith.truncf %2 : vector<128x8xf32> to vector<128x8xbf16>
    %c0_3 = arith.constant 0 : index
    %c0_4 = arith.constant 0 : index
    %4 = vector.load %arg3[%c0_3, %c0_4] : memref<32x256xbf16, #tpu.memory_space<vmem>>, vector<32x256xbf16>
    %cst = arith.constant dense<0.000000e+00> : vector<128x256xf32>
    %5 = tpu.matmul %1, %4, %cst {dimension_numbers = #tpu.dot_dimension_numbers<[1], [0], [0], [1], [0, 0, 1, 1], [], []>} : vector<128x32xbf16>, vector<32x256xbf16>, vector<128x256xf32> -> vector<128x256xf32>
    %c0_5 = arith.constant 0 : index
    %c0_6 = arith.constant 0 : index
    %6 = vector.load %arg4[%c0_5, %c0_6] : memref<1x256xf32, #tpu.memory_space<vmem>>, vector<1x256xf32>
    %7 = vector.broadcast %6 : vector<1x256xf32> to vector<128x256xf32>
    %8 = arith.addf %5, %7 : vector<128x256xf32>
    %c0_7 = arith.constant 0 : index
    %c0_8 = arith.constant 0 : index
    %9 = vector.load %arg5[%c0_7, %c0_8] : memref<1x256xf32, #tpu.memory_space<vmem>>, vector<1x256xf32>
    %c0_9 = arith.constant 0 : index
    %c0_10 = arith.constant 0 : index
    %10 = vector.load %arg6[%c0_9, %c0_10] : memref<1x256xf32, #tpu.memory_space<vmem>>, vector<1x256xf32>
    %cst_11 = arith.constant dense<0.000000e+00> : vector<128xf32>
    %11 = vector.multi_reduction <add>, %8, %cst_11 [1] : vector<128x256xf32> to vector<128xf32>
    %12 = vector.shape_cast %11 : vector<128xf32> to vector<128x1xf32>
    %cst_12 = arith.constant 2.560000e+02 : f32
    %13 = vector.broadcast %cst_12 : f32 to vector<128x1xf32>
    %14 = arith.divf %12, %13 : vector<128x1xf32>
    %15 = arith.mulf %8, %8 : vector<128x256xf32>
    %cst_13 = arith.constant dense<0.000000e+00> : vector<128xf32>
    %16 = vector.multi_reduction <add>, %15, %cst_13 [1] : vector<128x256xf32> to vector<128xf32>
    %17 = vector.shape_cast %16 : vector<128xf32> to vector<128x1xf32>
    %cst_14 = arith.constant 2.560000e+02 : f32
    %18 = vector.broadcast %cst_14 : f32 to vector<128x1xf32>
    %19 = arith.divf %17, %18 : vector<128x1xf32>
    %20 = arith.mulf %14, %14 : vector<128x1xf32>
    %21 = arith.subf %19, %20 : vector<128x1xf32>
    %cst_15 = arith.constant 0.000000e+00 : f32
    %22 = vector.broadcast %cst_15 : f32 to vector<128x1xf32>
    %23 = arith.maximumf %21, %22 : vector<128x1xf32>
    %24 = vector.broadcast %14 : vector<128x1xf32> to vector<128x256xf32>
    %25 = arith.subf %8, %24 : vector<128x256xf32>
    %cst_16 = arith.constant 9.99999974E-6 : f32
    %26 = vector.broadcast %cst_16 : f32 to vector<128x1xf32>
    %27 = arith.addf %23, %26 : vector<128x1xf32>
    %28 = math.rsqrt %27 : vector<128x1xf32>
    %29 = vector.broadcast %28 : vector<128x1xf32> to vector<128x256xf32>
    %30 = arith.mulf %25, %29 : vector<128x256xf32>
    %31 = vector.broadcast %9 : vector<1x256xf32> to vector<128x256xf32>
    %32 = arith.mulf %30, %31 : vector<128x256xf32>
    %33 = vector.broadcast %10 : vector<1x256xf32> to vector<128x256xf32>
    %34 = arith.addf %32, %33 : vector<128x256xf32>
    %cst_17 = arith.constant 0.000000e+00 : f32
    %35 = vector.broadcast %cst_17 : f32 to vector<128x256xf32>
    %36 = arith.maximumf %34, %35 : vector<128x256xf32>
    %37 = arith.truncf %36 : vector<128x256xf32> to vector<128x256xbf16>
    %c0_18 = arith.constant 0 : index
    %c0_19 = arith.constant 0 : index
    %38 = vector.load %arg7[%c0_18, %c0_19] : memref<256x256xbf16, #tpu.memory_space<vmem>>, vector<256x256xbf16>
    %cst_20 = arith.constant dense<0.000000e+00> : vector<128x256xf32>
    %39 = tpu.matmul %37, %38, %cst_20 {dimension_numbers = #tpu.dot_dimension_numbers<[1], [0], [0], [1], [0, 0, 1, 1], [], []>} : vector<128x256xbf16>, vector<256x256xbf16>, vector<128x256xf32> -> vector<128x256xf32>
    %c0_21 = arith.constant 0 : index
    %c0_22 = arith.constant 0 : index
    %40 = vector.load %arg8[%c0_21, %c0_22] : memref<1x256xf32, #tpu.memory_space<vmem>>, vector<1x256xf32>
    %41 = vector.broadcast %40 : vector<1x256xf32> to vector<128x256xf32>
    %42 = arith.addf %39, %41 : vector<128x256xf32>
    %c0_23 = arith.constant 0 : index
    %c0_24 = arith.constant 0 : index
    %43 = vector.load %arg9[%c0_23, %c0_24] : memref<1x256xf32, #tpu.memory_space<vmem>>, vector<1x256xf32>
    %c0_25 = arith.constant 0 : index
    %c0_26 = arith.constant 0 : index
    %44 = vector.load %arg10[%c0_25, %c0_26] : memref<1x256xf32, #tpu.memory_space<vmem>>, vector<1x256xf32>
    %cst_27 = arith.constant dense<0.000000e+00> : vector<128xf32>
    %45 = vector.multi_reduction <add>, %42, %cst_27 [1] : vector<128x256xf32> to vector<128xf32>
    %46 = vector.shape_cast %45 : vector<128xf32> to vector<128x1xf32>
    %cst_28 = arith.constant 2.560000e+02 : f32
    %47 = vector.broadcast %cst_28 : f32 to vector<128x1xf32>
    %48 = arith.divf %46, %47 : vector<128x1xf32>
    %49 = arith.mulf %42, %42 : vector<128x256xf32>
    %cst_29 = arith.constant dense<0.000000e+00> : vector<128xf32>
    %50 = vector.multi_reduction <add>, %49, %cst_29 [1] : vector<128x256xf32> to vector<128xf32>
    %51 = vector.shape_cast %50 : vector<128xf32> to vector<128x1xf32>
    %cst_30 = arith.constant 2.560000e+02 : f32
    %52 = vector.broadcast %cst_30 : f32 to vector<128x1xf32>
    %53 = arith.divf %51, %52 : vector<128x1xf32>
    %54 = arith.mulf %48, %48 : vector<128x1xf32>
    %55 = arith.subf %53, %54 : vector<128x1xf32>
    %cst_31 = arith.constant 0.000000e+00 : f32
    %56 = vector.broadcast %cst_31 : f32 to vector<128x1xf32>
    %57 = arith.maximumf %55, %56 : vector<128x1xf32>
    %58 = vector.broadcast %48 : vector<128x1xf32> to vector<128x256xf32>
    %59 = arith.subf %42, %58 : vector<128x256xf32>
    %cst_32 = arith.constant 9.99999974E-6 : f32
    %60 = vector.broadcast %cst_32 : f32 to vector<128x1xf32>
    %61 = arith.addf %57, %60 : vector<128x1xf32>
    %62 = math.rsqrt %61 : vector<128x1xf32>
    %63 = vector.broadcast %62 : vector<128x1xf32> to vector<128x256xf32>
    %64 = arith.mulf %59, %63 : vector<128x256xf32>
    %65 = vector.broadcast %43 : vector<1x256xf32> to vector<128x256xf32>
    %66 = arith.mulf %64, %65 : vector<128x256xf32>
    %67 = vector.broadcast %44 : vector<1x256xf32> to vector<128x256xf32>
    %68 = arith.addf %66, %67 : vector<128x256xf32>
    %cst_33 = arith.constant 0.000000e+00 : f32
    %69 = vector.broadcast %cst_33 : f32 to vector<128x256xf32>
    %70 = arith.maximumf %68, %69 : vector<128x256xf32>
    %71 = arith.truncf %70 : vector<128x256xf32> to vector<128x256xbf16>
    %c0_34 = arith.constant 0 : index
    %c0_35 = arith.constant 0 : index
    %72 = vector.load %arg11[%c0_34, %c0_35] : memref<256x256xbf16, #tpu.memory_space<vmem>>, vector<256x256xbf16>
    %cst_36 = arith.constant dense<0.000000e+00> : vector<128x256xf32>
    %73 = tpu.matmul %71, %72, %cst_36 {dimension_numbers = #tpu.dot_dimension_numbers<[1], [0], [0], [1], [0, 0, 1, 1], [], []>} : vector<128x256xbf16>, vector<256x256xbf16>, vector<128x256xf32> -> vector<128x256xf32>
    %c0_37 = arith.constant 0 : index
    %c0_38 = arith.constant 0 : index
    %74 = vector.load %arg12[%c0_37, %c0_38] : memref<8x256xbf16, #tpu.memory_space<vmem>>, vector<8x256xbf16>
    %cst_39 = arith.constant dense<0.000000e+00> : vector<128x256xf32>
    %75 = tpu.matmul %3, %74, %cst_39 {dimension_numbers = #tpu.dot_dimension_numbers<[1], [0], [0], [1], [0, 0, 1, 1], [], []>} : vector<128x8xbf16>, vector<8x256xbf16>, vector<128x256xf32> -> vector<128x256xf32>
    %76 = arith.addf %73, %75 : vector<128x256xf32>
    %c0_40 = arith.constant 0 : index
    %c0_41 = arith.constant 0 : index
    %77 = vector.load %arg13[%c0_40, %c0_41] : memref<1x256xf32, #tpu.memory_space<vmem>>, vector<1x256xf32>
    %78 = vector.broadcast %77 : vector<1x256xf32> to vector<128x256xf32>
    %79 = arith.addf %76, %78 : vector<128x256xf32>
    %c0_42 = arith.constant 0 : index
    %c0_43 = arith.constant 0 : index
    %80 = vector.load %arg14[%c0_42, %c0_43] : memref<1x256xf32, #tpu.memory_space<vmem>>, vector<1x256xf32>
    %c0_44 = arith.constant 0 : index
    %c0_45 = arith.constant 0 : index
    %81 = vector.load %arg15[%c0_44, %c0_45] : memref<1x256xf32, #tpu.memory_space<vmem>>, vector<1x256xf32>
    %cst_46 = arith.constant dense<0.000000e+00> : vector<128xf32>
    %82 = vector.multi_reduction <add>, %79, %cst_46 [1] : vector<128x256xf32> to vector<128xf32>
    %83 = vector.shape_cast %82 : vector<128xf32> to vector<128x1xf32>
    %cst_47 = arith.constant 2.560000e+02 : f32
    %84 = vector.broadcast %cst_47 : f32 to vector<128x1xf32>
    %85 = arith.divf %83, %84 : vector<128x1xf32>
    %86 = arith.mulf %79, %79 : vector<128x256xf32>
    %cst_48 = arith.constant dense<0.000000e+00> : vector<128xf32>
    %87 = vector.multi_reduction <add>, %86, %cst_48 [1] : vector<128x256xf32> to vector<128xf32>
    %88 = vector.shape_cast %87 : vector<128xf32> to vector<128x1xf32>
    %cst_49 = arith.constant 2.560000e+02 : f32
    %89 = vector.broadcast %cst_49 : f32 to vector<128x1xf32>
    %90 = arith.divf %88, %89 : vector<128x1xf32>
    %91 = arith.mulf %85, %85 : vector<128x1xf32>
    %92 = arith.subf %90, %91 : vector<128x1xf32>
    %cst_50 = arith.constant 0.000000e+00 : f32
    %93 = vector.broadcast %cst_50 : f32 to vector<128x1xf32>
    %94 = arith.maximumf %92, %93 : vector<128x1xf32>
    %95 = vector.broadcast %85 : vector<128x1xf32> to vector<128x256xf32>
    %96 = arith.subf %79, %95 : vector<128x256xf32>
    %cst_51 = arith.constant 9.99999974E-6 : f32
    %97 = vector.broadcast %cst_51 : f32 to vector<128x1xf32>
    %98 = arith.addf %94, %97 : vector<128x1xf32>
    %99 = math.rsqrt %98 : vector<128x1xf32>
    %100 = vector.broadcast %99 : vector<128x1xf32> to vector<128x256xf32>
    %101 = arith.mulf %96, %100 : vector<128x256xf32>
    %102 = vector.broadcast %80 : vector<1x256xf32> to vector<128x256xf32>
    %103 = arith.mulf %101, %102 : vector<128x256xf32>
    %104 = vector.broadcast %81 : vector<1x256xf32> to vector<128x256xf32>
    %105 = arith.addf %103, %104 : vector<128x256xf32>
    %cst_52 = arith.constant 0.000000e+00 : f32
    %106 = vector.broadcast %cst_52 : f32 to vector<128x256xf32>
    %107 = arith.maximumf %105, %106 : vector<128x256xf32>
    %108 = arith.truncf %107 : vector<128x256xf32> to vector<128x256xbf16>
    %c0_53 = arith.constant 0 : index
    %c0_54 = arith.constant 0 : index
    %109 = vector.load %arg16[%c0_53, %c0_54] : memref<16x256xbf16, #tpu.memory_space<vmem>>, vector<16x256xbf16>
    %cst_55 = arith.constant dense<0.000000e+00> : vector<16x128xf32>
    %110 = tpu.matmul %109, %108, %cst_55 {dimension_numbers = #tpu.dot_dimension_numbers<[1], [1], [0], [0], [0, 0, 1, 0], [], []>} : vector<16x256xbf16>, vector<128x256xbf16>, vector<16x128xf32> -> vector<16x128xf32>
    %111 = vector.extract_strided_slice %110 {offsets = [0, 0], sizes = [1, 128], strides = [1, 1]} : vector<16x128xf32> to vector<1x128xf32>
    %c0_56 = arith.constant 0 : index
    %c0_57 = arith.constant 0 : index
    %112 = vector.load %arg17[%c0_56, %c0_57] : memref<1x1xf32, #tpu.memory_space<vmem>>, vector<1x1xf32>
    %113 = vector.broadcast %112 : vector<1x1xf32> to vector<1x128xf32>
    %114 = arith.addf %111, %113 : vector<1x128xf32>
    %c0_58 = arith.constant 0 : index
    %c0_59 = arith.constant 0 : index
    %115 = vector.load %arg18[%c0_58, %c0_59] : memref<1x128xf32, #tpu.memory_space<vmem>>, vector<1x128xf32>
    tpu.vector_store %arg18[%c0_58, %c0_59], %114 {strides = array<i32>} : memref<1x128xf32, #tpu.memory_space<vmem>>, vector<1x128xf32>,
    return
  }
  func.func @transform_0(%arg0: i32) -> (i32, i32) {
    %c0_i32 = arith.constant 0 : i32
    %c0_i32_0 = arith.constant 0 : i32
    return %arg0, %c0_i32 : i32, i32
  }
  func.func @transform_1(%arg0: i32) -> (i32, i32) {
    %c0_i32 = arith.constant 0 : i32
    %c0_i32_0 = arith.constant 0 : i32
    return %arg0, %c0_i32 : i32, i32
  }
  func.func @transform_2(%arg0: i32) -> (i32, i32) {
    %c0_i32 = arith.constant 0 : i32
    %c0_i32_0 = arith.constant 0 : i32
    %c0_i32_1 = arith.constant 0 : i32
    return %c0_i32, %c0_i32_0 : i32, i32
  }
  func.func @transform_3(%arg0: i32) -> (i32, i32) {
    %c0_i32 = arith.constant 0 : i32
    %c0_i32_0 = arith.constant 0 : i32
    %c0_i32_1 = arith.constant 0 : i32
    return %c0_i32, %c0_i32_0 : i32, i32
  }
  func.func @transform_4(%arg0: i32) -> (i32, i32) {
    %c0_i32 = arith.constant 0 : i32
    %c0_i32_0 = arith.constant 0 : i32
    %c0_i32_1 = arith.constant 0 : i32
    return %c0_i32, %c0_i32_0 : i32, i32
  }
  func.func @transform_5(%arg0: i32) -> (i32, i32) {
    %c0_i32 = arith.constant 0 : i32
    %c0_i32_0 = arith.constant 0 : i32
    %c0_i32_1 = arith.constant 0 : i32
    return %c0_i32, %c0_i32_0 : i32, i32
  }
  func.func @transform_6(%arg0: i32) -> (i32, i32) {
    %c0_i32 = arith.constant 0 : i32
    %c0_i32_0 = arith.constant 0 : i32
    %c0_i32_1 = arith.constant 0 : i32
    return %c0_i32, %c0_i32_0 : i32, i32
  }
  func.func @transform_7(%arg0: i32) -> (i32, i32) {
    %c0_i32 = arith.constant 0 : i32
    %c0_i32_0 = arith.constant 0 : i32
    %c0_i32_1 = arith.constant 0 : i32
    return %c0_i32, %c0_i32_0 : i32, i32
  }
  func.func @transform_8(%arg0: i32) -> (i32, i32) {
    %c0_i32 = arith.constant 0 : i32
    %c0_i32_0 = arith.constant 0 : i32
    %c0_i32_1 = arith.constant 0 : i32
    return %c0_i32, %c0_i32_0 : i32, i32
  }
  func.func @transform_9(%arg0: i32) -> (i32, i32) {
    %c0_i32 = arith.constant 0 : i32
    %c0_i32_0 = arith.constant 0 : i32
    %c0_i32_1 = arith.constant 0 : i32
    return %c0_i32, %c0_i32_0 : i32, i32
  }
  func.func @transform_10(%arg0: i32) -> (i32, i32) {
    %c0_i32 = arith.constant 0 : i32
    %c0_i32_0 = arith.constant 0 : i32
    %c0_i32_1 = arith.constant 0 : i32
    return %c0_i32, %c0_i32_0 : i32, i32
  }
  func.func @transform_11(%arg0: i32) -> (i32, i32) {
    %c0_i32 = arith.constant 0 : i32
    %c0_i32_0 = arith.constant 0 : i32
    %c0_i32_1 = arith.constant 0 : i32
    return %c0_i32, %c0_i32_0 : i32, i32
  }
  func.func @transform_12(%arg0: i32) -> (i32, i32) {
    %c0_i32 = arith.constant 0 : i32
    %c0_i32_0 = arith.constant 0 : i32
    %c0_i32_1 = arith.constant 0 : i32
    return %c0_i32, %c0_i32_0 : i32, i32
  }
  func.func @transform_13(%arg0: i32) -> (i32, i32) {
    %c0_i32 = arith.constant 0 : i32
    %c0_i32_0 = arith.constant 0 : i32
    %c0_i32_1 = arith.constant 0 : i32
    return %c0_i32, %c0_i32_0 : i32, i32
  }
  func.func @transform_14(%arg0: i32) -> (i32, i32) {
    %c0_i32 = arith.constant 0 : i32
    %c0_i32_0 = arith.constant 0 : i32
    %c0_i32_1 = arith.constant 0 : i32
    return %c0_i32, %c0_i32_0 : i32, i32
  }
  func.func @transform_15(%arg0: i32) -> (i32, i32) {
    %c0_i32 = arith.constant 0 : i32
    %c0_i32_0 = arith.constant 0 : i32
    %c0_i32_1 = arith.constant 0 : i32
    return %c0_i32, %c0_i32_0 : i32, i32
  }
  func.func @transform_16(%arg0: i32) -> (i32, i32) {
    %c0_i32 = arith.constant 0 : i32
    %c0_i32_0 = arith.constant 0 : i32
    %c0_i32_1 = arith.constant 0 : i32
    return %c0_i32, %c0_i32_0 : i32, i32
  }
  func.func @transform_17(%arg0: i32) -> (i32, i32) {
    %c0_i32 = arith.constant 0 : i32
    %c0_i32_0 = arith.constant 0 : i32
    return %c0_i32, %arg0 : i32, i32
  }
}

</mosaic_0001>

<bundles_post_ra>
// kernel: ddpg_critic_forward.1
= control target key start
LH: loop header
LB: loop body
LE: loop exit
PB: predicated region body
PF: predicated region fallthrough
CT: control target
= control target key end

     0   :  { %s5401_s0 = inlined_call_operand.vmem [shape: f32[256,32], index: 0, kind: input, shape index: {}]   ;;  %s5402_s1 = inlined_call_operand.vmem [shape: f32[256,8], index: 1, kind: input, shape index: {}]   ;;  %s5403_s2 = inlined_call_operand.vmem [shape: bf16[32,256], index: 2, kind: input, shape index: {}]   ;;  %s5404_s3 = inlined_call_operand.vmem [shape: f32[1,256], index: 3, kind: input, shape index: {}]   ;;  %s5405_s4 = inlined_call_operand.vmem [shape: f32[1,256], index: 4, kind: input, shape index: {}]   ;;  %s5406_s5 = inlined_call_operand.vmem [shape: f32[1,256], index: 5, kind: input, shape index: {}]   ;;  %s5407_s6 = inlined_call_operand.vmem [shape: bf16[256,256], index: 6, kind: input, shape index: {}]   ;;  %s5408_s7 = inlined_call_operand.vmem [shape: f32[1,256], index: 7, kind: input, shape index: {}]   ;;  %s5409_s8 = inlined_call_operand.vmem [shape: f32[1,256], index: 8, kind: input, shape index: {}]   ;;  %s5410_s9 = inlined_call_operand.vmem [shape: f32[1,256], index: 9, kind: input, shape index: {}]   ;;  %s5411_s10 = inlined_call_operand.vmem [shape: bf16[256,256], index: 10, kind: input, shape index: {}]   ;;  %s5412_s11 = inlined_call_operand.vmem [shape: bf16[8,256], index: 11, kind: input, shape index: {}]   ;;  %s5413_s12 = inlined_call_operand.vmem [shape: f32[1,256], index: 12, kind: input, shape index: {}]   ;;  %s5414_s13 = inlined_call_operand.vmem [shape: f32[1,256], index: 13, kind: input, shape index: {}]   ;;  %s5415_s14 = inlined_call_operand.vmem [shape: f32[1,256], index: 14, kind: input, shape index: {}]   ;;  %s5416_s15 = inlined_call_operand.vmem [shape: bf16[16,256], index: 15, kind: input, shape index: {}]   ;;  %s5417_s16 = inlined_call_operand.<no memory space> [shape: f32[1,1], index: 16, kind: input, shape index: {}]   ;;  %s5418_s17 = inlined_call_operand.hbm [shape: f32[1,256], index: 17, kind: output, shape index: {}]  }
   0x1   :  { %5429 = sst [smem:[#allocation19_spill]] %s5401_s0  ;;  %v22_v0 = vstv %s5417_s16 }
   0x2   :  { %5430 = sst [smem:[#allocation20_spill]] %s5402_s1  ;;  %23 = vst [vmem:[#allocation2] sm:$0x1] %v22_v0 }
   0x3   :  { %5431 = sst [smem:[#allocation21_spill]] %s5403_s2 }
   0x4   :  { %24 = vsyncpa [#allocation4], 0 }
   0x5   :  { %26 = vsyncpa [#allocation4 + $0x1], 0  ;;  %s3578_s26 = smov 0   ;;  %s3580_s27 = smov 0  }
   0x6   :  { %s3582_s28 = smov 0   ;;  %s3584_s29 = smov 0  }
   0x7 LB: > { %5432 = sst [smem:[#allocation6_spill]] %s3477_s28  ;;  %s3076_s16 = sadd.s32 4294967295, %s3481_s29   ;;  %s3481_s29 = sphi %s3584_s29, %s5470_s29   ;;  %s3477_s28 = sphi %s3582_s28, %s5472_s28   ;;  %s3473_s27 = sphi %s3580_s27, %s5474_s27   ;;  %s3469_s26 = sphi %s3578_s26, %s5473_s26  }
   0x8   : > { %s3077_s0 = sadd.s32 4294967294, %s3481_s29   ;;  %s3601_s30 = sadd.s32 1, %s3481_s29  }
   0x9   : > { %5433 = sst [smem:[#allocation7_spill]] %s3601_s30  ;;  %s406_s18 = sadd.s32 1, %s3477_s28 }
   0xa   : > { %s403_s19 = ssub.s32 %s3481_s29, %s3601_s30  ;;  %p416_p0 = scmp.ne.s32.totalorder %s3477_s28, %s3473_s27 }
   0xb   : > { %p404_p1 = scmp.eq.s32.totalorder %s403_s19, 0  ;;  %p417_p2 = scmp.eq.s32.totalorder %s3076_s16, 1 }
   0xc   : > { %p422_p3 = scmp.ne.s32.totalorder %s3473_s27, %s3469_s26  ;;  %p423_p4 = scmp.eq.s32.totalorder %s3077_s0, 1 }
   0xd   : > { %s3611_s1 = scalar_select %p404_p1, %s3477_s28, %s406_s18  }
   0xe   : > { %p3613_p5 = por %p417_p2, %p416_p0  ;;  %p3617_p6 = por %p423_p4, %p422_p3 }
   0xf   : > { %5434 = sst [smem:[#allocation8_spill]] %s3611_s1  ;;  %p3080_p7 = scmp.ge.s32.totalorder %s3481_s29, 1 }
  0x10   : > { %p504_p8 = scmp.lt.s32.totalorder %s3481_s29, 3 }
  0x12   : > { %p505_p9 = pnand %p3080_p7, %p504_p8 }
  0x14   : > { %508 = sbr.rel (%p505_p9) target bundleno = 1518 (0x5ee), region = 88 }
  0x19   : > { %s5437_s2 = sld [smem:[#allocation21_spill]]  ;;  %s3626_s24 = sshll.u32 %s3076_s16, 4  ;;  %v5423_v3 = vmov 0   ;;  %vm657_vm0 = vcmask 261120   ;;  %v3224_v30 = vld [vmem:[%s5407_s6 + $0x74] ss:$8 sps:$4 sm:$0xff]   ;;  %v627_v43 = vlaneseq }
  0x1a   : > { %714 = vmatprep.mubr.bf16.mxu0 %v5423_v3  ;;  %p561_p10 = scmp.lt.s32.totalorder %s3626_s24, 31  ;;  %3217 = vset.pattern.permute.xlu0 %v5423_v3  ;;  %s5438_s28 = sld [smem:[#allocation19_spill]]  ;;  %v3226_v31 = vld [vmem:[%s5407_s6 + $0x70] ss:$8 sps:$4 sm:$0xff]   ;;  %v3227_v32 = vld [vmem:[%s5407_s6 + $0x64] ss:$8 sps:$4 sm:$0xff]  }
  0x1b   : > { %1440 = vmatprep.subr.bf16.mxu1 %v3224_v30  ;;  %v3229_v33 = vld [vmem:[%s5407_s6 + $0x60] ss:$8 sps:$4 sm:$0xff]   ;;  %v3230_v34 = vld [vmem:[%s5407_s6 + $0x54] ss:$8 sps:$4 sm:$0xff]   ;;  %v3232_v35 = vld [vmem:[%s5407_s6 + $0x50] ss:$8 sps:$4 sm:$0xff]  }
  0x1c   : > { %s3641_s23 = scalar_select %p561_p10, %s3626_s24, 31  ;;  %1441 = vmatpush1.bf16.msra.mxu1 %v3226_v31  ;;  %v3233_v36 = vld [vmem:[%s5407_s6 + $0x44] ss:$8 sps:$4 sm:$0xff]   ;;  %v3235_v37 = vld [vmem:[%s5407_s6 + $0x40] ss:$8 sps:$4 sm:$0xff]   ;;  %v628_v44 = vshrl.u32 %v627_v43, 7 }
  0x1d   : > { %1442 = vmatprep.subr.bf16.mxu1 %v3227_v32  ;;  %v3236_v38 = vld [vmem:[%s5407_s6 + $0x34] ss:$8 sps:$4 sm:$0xff]   ;;  %v3238_v39 = vld [vmem:[%s5407_s6 + $0x30] ss:$8 sps:$4 sm:$0xff]   ;;  %v3239_v40 = vld [vmem:[%s5407_s6 + $0x24] ss:$8 sps:$4 sm:$0xff]  }
  0x1e   : > { %s5422_s25 = sshll.u32 %s3641_s23, 3  ;;  %v3241_v41 = vld [vmem:[%s5407_s6 + $0x20] ss:$8 sps:$4 sm:$0xff]   ;;  %v3242_v42 = vld [vmem:[%s5407_s6 + $0x14] ss:$8 sps:$4 sm:$0xff]   ;;  %v3722_v45 = vsub.s32 0, %v628_v44 }
  0x1f   : > { %v3218_v1 = vld [vmem:[%s5437_s2 + $0x14] ss:$8 sps:$4 sm:$0xff]   ;;  %v3220_v2 = vld [vmem:[%s5437_s2 + $0x10] ss:$8 sps:$4 sm:$0xff]   ;;  %v3221_v4 = vld [vmem:[%s5437_s2 + $0x4] ss:$8 sps:$4 sm:$0xff]  }
  0x20   : > { %694 = vmatprep.subr.bf16.mxu0 %v3218_v1  ;;  %v3223_v5 = vld [vmem:[%s5437_s2] ss:$8 sps:$4 sm:$0xff]   ;;  %s3649_s30 = scalar_lea.vmem %s5438_s28, %s5422_s25  ;;  %1443 = vmatpush1.bf16.msra.mxu1 %v3229_v33  ;;  %5439 = vst [vmem:[#allocation9_spill] sm:$0xff] %v3722_v45  ;;  %v3727_v47 = vsub.s32 1, %v628_v44  ;;  %v3248_v33 = vld [vmem:[%s5407_s6 + $0xf4] ss:$8 sps:$4 sm:$0xff]   ;;  %s5360_s25 = scalar_lea.hbm %s5418_s17, %s3626_s24 }
  0x21   : > { %695 = vmatpush1.bf16.msra.mxu0 %v3220_v2  ;;  %v573_v6 = vld [vmem:[%s3649_s30] sm:$0xff]  ;;  %v574_v7 = vld [vmem:[%s3649_s30 + $0x8] sm:$0xff]  ;;  %v575_v9 = vld [vmem:[%s3649_s30 + $0x10] sm:$0xff]  ;;  %1444 = vmatprep.subr.bf16.mxu1 %v3230_v34  ;;  %vm2056_vm1 = vcmask 1043456   ;;  %s5445_s28 = sshll.u32 %s3641_s23, 3  ;;  %s5446_s19 = sld [smem:[#allocation20_spill]] }
  0x22   : > { %696 = vmatprep.subr.bf16.mxu0 %v3221_v4  ;;  %v589_v8 = vpack.c.bf16 %v574_v7, %v573_v6  ;;  %v576_v10 = vld [vmem:[%s3649_s30 + $0x18] sm:$0xff]  ;;  %v577_v12 = vld [vmem:[%s3649_s30 + $0x20] sm:$0xff]  ;;  %v578_v13 = vld [vmem:[%s3649_s30 + $0x28] sm:$0xff]  ;;  %5440 = vst [vmem:[#allocation10_spill] sm:$0xff] %v3727_v47  ;;  %vm2031_vm2 = vcmask 64512   ;;  %s558_s16 = sand.u32 1, %s3473_s27  }
  0x23   : > { %v590_v11 = vpack.c.bf16 %v576_v10, %v575_v9  ;;  %v591_v14 = vpack.c.bf16 %v578_v13, %v577_v12  ;;  %v579_v15 = vld [vmem:[%s3649_s30 + $0x30] sm:$0xff]  ;;  %v580_v16 = vld [vmem:[%s3649_s30 + $0x38] sm:$0xff]  ;;  %v581_v18 = vld [vmem:[%s3649_s30 + $0x40] sm:$0xff]  ;;  %s3484_s18 = smov [#allocation3]  }
  0x24   : > { %v592_v17 = vpack.c.bf16 %v580_v16, %v579_v15  ;;  %v582_v19 = vld [vmem:[%s3649_s30 + $0x48] sm:$0xff]  ;;  %v583_v21 = vld [vmem:[%s3649_s30 + $0x50] sm:$0xff]  ;;  %v584_v22 = vld [vmem:[%s3649_s30 + $0x58] sm:$0xff]  ;;  %1445 = vmatpush1.bf16.msra.mxu1 %v3232_v35 }
  0x25   : > { %697 = vmatpush1.bf16.msra.mxu0 %v3223_v5  ;;  %v593_v20 = vpack.c.bf16 %v582_v19, %v581_v18  ;;  %v594_v23 = vpack.c.bf16 %v584_v22, %v583_v21  ;;  %v585_v24 = vld [vmem:[%s3649_s30 + $0x60] sm:$0xff]  ;;  %v586_v25 = vld [vmem:[%s3649_s30 + $0x68] sm:$0xff]  ;;  %v587_v27 = vld [vmem:[%s3649_s30 + $0x70] sm:$0xff]  ;;  %1446 = vmatprep.subr.bf16.mxu1 %v3233_v36 }
  0x26   : > { %v595_v26 = vpack.c.bf16 %v586_v25, %v585_v24  ;;  %v588_v28 = vld [vmem:[%s3649_s30 + $0x78] sm:$0xff]  ;;  %v625_v46 = vld [vmem:[%s5404_s3] sm:$0x3]  ;;  %v3251_v43 = vld [vmem:[%s5407_s6 + $0xe4] ss:$8 sps:$4 sm:$0xff]   ;;  %s559_s30 = scalar_lea.vmem [#allocation3], %s558_s16 }
  0x27   : > { %v596_v29 = vpack.c.bf16 %v588_v28, %v587_v27  ;;  %v3730_v48 = vrot.slane %v625_v46, %v3722_v45  ;;  %v3733_v49 = vrot.slane %v625_v46, %v3727_v47  ;;  %v3247_v24 = vld [vmem:[%s5407_s6] ss:$8 sps:$4 sm:$0xff]   ;;  %v3250_v35 = vld [vmem:[%s5407_s6 + $0xf0] ss:$8 sps:$4 sm:$0xff]   ;;  %s4467_s22 = scalar_lea.vmem %s5446_s19, %s5445_s28  ;;  %s3010_s23 = sshll.u32 %s559_s30, 4  ;;  %s5362_s23 = int_to_ptr.vmem [resolvable:$true] %s3010_s23 }
  0x28   : > { %3089 = vmatmul.mubr.msk.bf16.vlgmr.msra.gmra.mxu0 %vm657_vm0, %v589_v8  ;;  %1447 = vmatpush1.bf16.msra.mxu1 %v3235_v37  ;;  %v3253_v46 = vld [vmem:[%s5407_s6 + $0xe0] ss:$8 sps:$4 sm:$0xff]   ;;  %s2998_s28 = scalar_lea.sflag [#allocation4], %s558_s16  ;;  %s3421_s1 = scalar_lea.vmem %s5362_s23, 16 }
  0x29   : > { %724 = vmatprep.mubr.bf16.mxu0 %v5423_v3  ;;  %1448 = vmatprep.subr.bf16.mxu1 %v3236_v38  ;;  %p3422_p11 = scmp.ne.s32.totalorder %s5362_s23, %s3421_s1  ;;  %s3425_s19 = sshll.u32 %s3484_s18, 4  ;;  %s3426_s19 = int_to_ptr.vmem [resolvable:$false] %s3425_s19 }
  0x2a   : > { %p3428_p0 = scmp.lt.s32.totalorder %s5362_s23, %s3426_s19 }
  0x2b   : > { %p3423_p12 = pnand %p3422_p11, %p3613_p5 }
  0x2c   : > { %1449 = vmatpush1.bf16.msra.mxu1 %v3238_v39 }
  0x2d   : > { %1450 = vmatprep.subr.bf16.mxu1 %v3239_v40  ;;  %p3424_p13 = pneg %p3423_p12 }
  0x30   : > { %3090 = vmatmul.mubr.msk.bf16.gmra.mxu0 %vm657_vm0, %v590_v11  ;;  %1451 = vmatpush1.bf16.msra.mxu1 %v3241_v41 }
  0x31   : > { %734 = vmatprep.mubr.bf16.mxu0 %v5423_v3  ;;  %1452 = vmatprep.subr.bf16.mxu1 %v3242_v42 }
  0x38   : > { %3091 = vmatmul.mubr.msk.bf16.gmra.mxu0 %vm657_vm0, %v591_v14  ;;  %v3244_v14 = vld [vmem:[%s5407_s6 + $0x10] ss:$8 sps:$4 sm:$0xff]  }
  0x39   : > { %744 = vmatprep.mubr.bf16.mxu0 %v5423_v3  ;;  %1453 = vmatpush1.bf16.msra.mxu1 %v3244_v14  ;;  %v3259_v14 = vld [vmem:[%s5407_s6 + $0xc0] ss:$8 sps:$4 sm:$0xff]  }
  0x40   : > { %3092 = vmatmul.mubr.msk.bf16.gmra.mxu0 %vm657_vm0, %v592_v17 }
  0x41   : > { %754 = vmatprep.mubr.bf16.mxu0 %v5423_v3 }
  0x48   : > { %3093 = vmatmul.mubr.msk.bf16.gmra.mxu0 %vm657_vm0, %v593_v20  ;;  %v3245_v20 = vld [vmem:[%s5407_s6 + $0x4] ss:$8 sps:$4 sm:$0xff]  }
  0x49   : > { %764 = vmatprep.mubr.bf16.mxu0 %v5423_v3  ;;  %1454 = vmatprep.subr.bf16.mxu1 %v3245_v20 }
  0x4a   : > { %1455 = vmatpush1.bf16.msra.mxu1 %v3247_v24  ;;  %v3260_v24 = vld [vmem:[%s5407_s6 + $0xb4] ss:$8 sps:$4 sm:$0xff]  }
  0x4b   : > { %1456 = vmatprep.subr.bf16.mxu1 %v3248_v33 }
  0x4e   : > { %1457 = vmatpush2.bf16.msra.mxu1 %v3250_v35 }
  0x4f   : > { %1458 = vmatprep.subr.bf16.mxu1 %v3251_v43 }
  0x50   : > { %3094 = vmatmul.mubr.msk.bf16.gmra.mxu0 %vm657_vm0, %v594_v23 }
  0x51   : > { %774 = vmatprep.mubr.bf16.mxu0 %v5423_v3 }
  0x52   : > { %1459 = vmatpush2.bf16.msra.mxu1 %v3253_v46 }
  0x58   : > { %3095 = vmatmul.mubr.msk.bf16.gmra.mxu0 %vm657_vm0, %v595_v26 }
  0x59   : > { %784 = vmatprep.mubr.bf16.mxu0 %v5423_v3 }
  0x60   : > { %3096 = vmatmul.mubr.msk.bf16.gmra.mxu0 %vm657_vm0, %v596_v29 }
  0x61   : > { %2095 = vmatprep.mubr.bf16.mxu0 %v5423_v3 }
  0xe8   : > { %v716_v50 = vpop.f32.mrf.mxu0 }
  0xe9   : > { %v3736_v51 = vadd.f32 %v716_v50, %v3730_v48 }
  0xea   : > { %v718_v52 = vpop.f32.mrf.mxu0 }
  0xeb   : > { %v3739_v53 = vadd.f32 %v718_v52, %v3733_v49  ;;  %v862_v57 = vmul.f32 %v3736_v51, %v3736_v51 }
  0xec   : > { %v720_v54 = vpop.f32.mrf.mxu0 }
  0xed   : > { %v3742_v55 = vadd.f32 %v720_v54, %v3730_v48  ;;  %v797_v56 = vadd.f32 %v3739_v53, %v3736_v51  ;;  %v863_v58 = vmul.f32 %v3739_v53, %v3739_v53 }
  0xee   : > { %v722_v59 = vpop.f32.mrf.mxu0 }
  0xef   : > { %v3751_v60 = vadd.f32 %v722_v59, %v3733_v49  ;;  %798 = vadd.xlane.f32.xlu0 %v797_v56  ;;  %v894_v61 = vadd.f32 %v863_v58, %v862_v57  ;;  %v864_v0 = vmul.f32 %v3742_v55, %v3742_v55 }
  0xf0   : > { %v726_v62 = vpop.f32.mrf.mxu0 }
  0xf1   : > { %895 = vadd.xlane.f32.xlu1 %v894_v61  ;;  %v800_v63 = vadd.f32 %v3751_v60, %v3742_v55  ;;  %v865_v1 = vmul.f32 %v3751_v60, %v3751_v60  ;;  %v3760_v4 = vadd.f32 %v726_v62, %v3730_v48  ;;  %v3254_v61 = vld [vmem:[%s5407_s6 + $0xd4] ss:$8 sps:$4 sm:$0xff]  }
  0xf2   : > { %v728_v2 = vpop.f32.mrf.mxu0  ;;  %1460 = vmatprep.subr.bf16.mxu1 %v3254_v61 }
  0xf3   : > { %v3763_v5 = vadd.f32 %v728_v2, %v3733_v49  ;;  %801 = vadd.xlane.f32.xlu0 %v800_v63  ;;  %v897_v6 = vadd.f32 %v865_v1, %v864_v0  ;;  %v866_v13 = vmul.f32 %v3760_v4, %v3760_v4  ;;  %v3256_v63 = vld [vmem:[%s5407_s6 + $0xd0] ss:$8 sps:$4 sm:$0xff]  }
  0xf4   : > { %v730_v7 = vpop.f32.mrf.mxu0  ;;  %1461 = vmatpush2.bf16.msra.mxu1 %v3256_v63 }
  0xf5   : > { %898 = vadd.xlane.f32.xlu1 %v897_v6  ;;  %v803_v8 = vadd.f32 %v3763_v5, %v3760_v4  ;;  %v867_v9 = vmul.f32 %v3763_v5, %v3763_v5  ;;  %v3770_v11 = vadd.f32 %v730_v7, %v3730_v48 }
  0xf6   : > { %v732_v10 = vpop.f32.mrf.mxu0 }
  0xf7   : > { %v3773_v12 = vadd.f32 %v732_v10, %v3733_v49  ;;  %804 = vadd.xlane.f32.xlu0 %v803_v8  ;;  %v900_v17 = vadd.f32 %v867_v9, %v866_v13  ;;  %v868_v23 = vmul.f32 %v3770_v11, %v3770_v11  ;;  %v3257_v10 = vld [vmem:[%s5407_s6 + $0xc4] ss:$8 sps:$4 sm:$0xff]  }
  0xf8   : > { %v736_v15 = vpop.f32.mrf.mxu0  ;;  %1462 = vmatprep.subr.bf16.mxu1 %v3257_v10 }
  0xf9   : > { %v806_v16 = vadd.f32 %v3773_v12, %v3770_v11  ;;  %v869_v18 = vmul.f32 %v3773_v12, %v3773_v12  ;;  %v3788_v21 = vadd.f32 %v736_v15, %v3730_v48  ;;  %1463 = vmatpush2.bf16.msra.mxu1 %v3259_v14 }
  0xfa   : > { %v738_v19 = vpop.f32.mrf.mxu0  ;;  %1464 = vmatprep.subr.bf16.mxu1 %v3260_v24 }
  0xfb   : > { %v3791_v22 = vadd.f32 %v738_v19, %v3733_v49  ;;  %807 = vadd.xlane.f32.xlu1 %v806_v16  ;;  %901 = vadd.xlane.f32.xlu0 %v900_v17  ;;  %v903_v26 = vadd.f32 %v869_v18, %v868_v23  ;;  %v870_v32 = vmul.f32 %v3788_v21, %v3788_v21 }
  0xfc   : > { %v740_v25 = vpop.f32.mrf.mxu0 }
  0xfd   : > { %v809_v27 = vadd.f32 %v3791_v22, %v3788_v21  ;;  %v871_v28 = vmul.f32 %v3791_v22, %v3791_v22  ;;  %v3803_v30 = vadd.f32 %v740_v25, %v3730_v48 }
  0xfe   : > { %v742_v29 = vpop.f32.mrf.mxu0 }
  0xff   : > { %v3806_v31 = vadd.f32 %v742_v29, %v3733_v49  ;;  %904 = vadd.xlane.f32.xlu1 %v903_v26  ;;  %810 = vadd.xlane.f32.xlu0 %v809_v27  ;;  %v906_v37 = vadd.f32 %v871_v28, %v870_v32  ;;  %v872_v42 = vmul.f32 %v3803_v30, %v3803_v30  ;;  %v3262_v26 = vld [vmem:[%s5407_s6 + $0xb0] ss:$8 sps:$4 sm:$0xff]  }
 0x100   : > { %v746_v34 = vpop.f32.mrf.mxu0  ;;  %1465 = vmatpush2.bf16.msra.mxu1 %v3262_v26 }
 0x101   : > { %v812_v36 = vadd.f32 %v3806_v31, %v3803_v30  ;;  %v873_v38 = vmul.f32 %v3806_v31, %v3806_v31  ;;  %v3821_v40 = vadd.f32 %v746_v34, %v3730_v48 }
 0x102   : > { %v748_v39 = vpop.f32.mrf.mxu0 }
 0x103   : > { %v3824_v41 = vadd.f32 %v748_v39, %v3733_v49  ;;  %813 = vadd.xlane.f32.xlu1 %v812_v36  ;;  %907 = vadd.xlane.f32.xlu0 %v906_v37  ;;  %v909_v50 = vadd.f32 %v873_v38, %v872_v42  ;;  %v874_v59 = vmul.f32 %v3821_v40, %v3821_v40  ;;  %v3263_v36 = vld [vmem:[%s5407_s6 + $0xa4] ss:$8 sps:$4 sm:$0xff]   ;;  %v3265_v38 = vld [vmem:[%s5407_s6 + $0xa0] ss:$8 sps:$4 sm:$0xff]  }
 0x104   : > { %v750_v44 = vpop.f32.mrf.mxu0  ;;  %1466 = vmatprep.subr.bf16.mxu1 %v3263_v36 }
 0x105   : > { %v815_v52 = vadd.f32 %v3824_v41, %v3821_v40  ;;  %v875_v54 = vmul.f32 %v3824_v41, %v3824_v41  ;;  %v3839_v57 = vadd.f32 %v750_v44, %v3730_v48  ;;  %1467 = vmatpush2.bf16.msra.mxu1 %v3265_v38 }
 0x106   : > { %v752_v56 = vpop.f32.mrf.mxu0 }
 0x107   : > { %v3842_v58 = vadd.f32 %v752_v56, %v3733_v49  ;;  %910 = vadd.xlane.f32.xlu1 %v909_v50  ;;  %816 = vadd.xlane.f32.xlu0 %v815_v52  ;;  %v912_v1 = vadd.f32 %v875_v54, %v874_v59  ;;  %v876_v9 = vmul.f32 %v3839_v57, %v3839_v57  ;;  %v3266_v54 = vld [vmem:[%s5407_s6 + $0x94] ss:$8 sps:$4 sm:$0xff]   ;;  %v3268_v59 = vld [vmem:[%s5407_s6 + $0x90] ss:$8 sps:$4 sm:$0xff]  }
 0x108   : > { %v756_v62 = vpop.f32.mrf.mxu0  ;;  %1468 = vmatprep.subr.bf16.mxu1 %v3266_v54 }
 0x109   : > { %v818_v0 = vadd.f32 %v3842_v58, %v3839_v57  ;;  %v877_v2 = vmul.f32 %v3842_v58, %v3842_v58  ;;  %v3857_v7 = vadd.f32 %v756_v62, %v3730_v48  ;;  %1469 = vmatpush2.bf16.msra.mxu1 %v3268_v59 }
 0x10a   : > { %v758_v6 = vpop.f32.mrf.mxu0 }
 0x10b   : > { %v3860_v8 = vadd.f32 %v758_v6, %v3733_v49  ;;  %819 = vadd.xlane.f32.xlu1 %v818_v0  ;;  %913 = vadd.xlane.f32.xlu0 %v912_v1  ;;  %v915_v15 = vadd.f32 %v877_v2, %v876_v9  ;;  %v878_v23 = vmul.f32 %v3857_v7, %v3857_v7  ;;  %v3269_v9 = vld [vmem:[%s5407_s6 + $0x84] ss:$8 sps:$4 sm:$0xff]  }
 0x10c   : > { %v760_v13 = vpop.f32.mrf.mxu0  ;;  %1470 = vmatprep.subr.bf16.mxu1 %v3269_v9 }
 0x10d   : > { %v821_v16 = vadd.f32 %v3860_v8, %v3857_v7  ;;  %v879_v17 = vmul.f32 %v3860_v8, %v3860_v8  ;;  %v3875_v19 = vadd.f32 %v760_v13, %v3730_v48  ;;  %v3271_v13 = vld [vmem:[%s5407_s6 + $0x80] ss:$8 sps:$4 sm:$0xff]  }
 0x10e   : > { %v762_v18 = vpop.f32.mrf.mxu0  ;;  %1471 = vmatpush2.bf16.msra.mxu1 %v3271_v13 }
 0x10f   : > { %v3878_v20 = vadd.f32 %v762_v18, %v3733_v49  ;;  %916 = vadd.xlane.f32.xlu1 %v915_v15  ;;  %822 = vadd.xlane.f32.xlu0 %v821_v16  ;;  %v918_v28 = vadd.f32 %v879_v17, %v878_v23  ;;  %v880_v35 = vmul.f32 %v3875_v19, %v3875_v19 }
 0x110   : > { %v766_v25 = vpop.f32.mrf.mxu0 }
 0x111   : > { %v824_v27 = vadd.f32 %v3878_v20, %v3875_v19  ;;  %v881_v29 = vmul.f32 %v3878_v20, %v3878_v20  ;;  %v3893_v33 = vadd.f32 %v766_v25, %v3730_v48 }
 0x112   : > { %v768_v32 = vpop.f32.mrf.mxu0 }
 0x113   : > { %v3896_v34 = vadd.f32 %v768_v32, %v3733_v49  ;;  %825 = vadd.xlane.f32.xlu1 %v824_v27  ;;  %919 = vadd.xlane.f32.xlu0 %v918_v28  ;;  %v921_v39 = vadd.f32 %v881_v29, %v880_v35  ;;  %v882_v52 = vmul.f32 %v3893_v33, %v3893_v33 }
 0x114   : > { %v770_v37 = vpop.f32.mrf.mxu0 }
 0x115   : > { %v827_v42 = vadd.f32 %v3896_v34, %v3893_v33  ;;  %v883_v43 = vmul.f32 %v3896_v34, %v3896_v34  ;;  %v3911_v46 = vadd.f32 %v770_v37, %v3730_v48 }
 0x116   : > { %v772_v44 = vpop.f32.mrf.mxu0 }
 0x117   : > { %v3914_v50 = vadd.f32 %v772_v44, %v3733_v49  ;;  %922 = vadd.xlane.f32.xlu1 %v921_v39  ;;  %828 = vadd.xlane.f32.xlu0 %v827_v42  ;;  %v924_v62 = vadd.f32 %v883_v43, %v882_v52  ;;  %v884_v6 = vmul.f32 %v3911_v46, %v3911_v46 }
 0x118   : > { %v776_v56 = vpop.f32.mrf.mxu0 }
 0x119   : > { %v830_v61 = vadd.f32 %v3914_v50, %v3911_v46  ;;  %v885_v63 = vmul.f32 %v3914_v50, %v3914_v50  ;;  %v3929_v1 = vadd.f32 %v776_v56, %v3730_v48 }
 0x11a   : > { %v778_v0 = vpop.f32.mrf.mxu0 }
 0x11b   : > { %v3932_v2 = vadd.f32 %v778_v0, %v3733_v49  ;;  %831 = vadd.xlane.f32.xlu1 %v830_v61  ;;  %925 = vadd.xlane.f32.xlu0 %v924_v62  ;;  %v927_v14 = vadd.f32 %v885_v63, %v884_v6  ;;  %v886_v24 = vmul.f32 %v3929_v1, %v3929_v1 }
 0x11c   : > { %v780_v10 = vpop.f32.mrf.mxu0 }
 0x11d   : > { %v833_v15 = vadd.f32 %v3932_v2, %v3929_v1  ;;  %v887_v16 = vmul.f32 %v3932_v2, %v3932_v2  ;;  %v3947_v18 = vadd.f32 %v780_v10, %v3730_v48 }
 0x11e   : > { %v782_v17 = vpop.f32.mrf.mxu0 }
 0x11f   : > { %v3950_v23 = vadd.f32 %v782_v17, %v3733_v49  ;;  %928 = vadd.xlane.f32.xlu1 %v927_v14  ;;  %834 = vadd.xlane.f32.xlu0 %v833_v15  ;;  %v930_v27 = vadd.f32 %v887_v16, %v886_v24  ;;  %v888_v36 = vmul.f32 %v3947_v18, %v3947_v18 }
 0x120   : > { %v786_v25 = vpop.f32.mrf.mxu0 }
 0x121   : > { %v836_v26 = vadd.f32 %v3950_v23, %v3947_v18  ;;  %v889_v28 = vmul.f32 %v3950_v23, %v3950_v23  ;;  %v3959_v32 = vadd.f32 %v786_v25, %v3730_v48 }
 0x122   : > { %v788_v29 = vpop.f32.mrf.mxu0 }
 0x123   : > { %v3962_v35 = vadd.f32 %v788_v29, %v3733_v49  ;;  %837 = vadd.xlane.f32.xlu1 %v836_v26  ;;  %931 = vadd.xlane.f32.xlu0 %v930_v27  ;;  %v933_v38 = vadd.f32 %v889_v28, %v888_v36  ;;  %v890_v54 = vmul.f32 %v3959_v32, %v3959_v32 }
 0x124   : > { %v790_v37 = vpop.f32.mrf.mxu0 }
 0x125   : > { %v839_v39 = vadd.f32 %v3962_v35, %v3959_v32  ;;  %v891_v42 = vmul.f32 %v3962_v35, %v3962_v35  ;;  %v3971_v44 = vadd.f32 %v790_v37, %v3730_v48 }
 0x126   : > { %v792_v43 = vpop.f32.mrf.mxu0 }
 0x127   : > { %v3974_v52 = vadd.f32 %v792_v43, %v3733_v49  ;;  %934 = vadd.xlane.f32.xlu1 %v933_v38  ;;  %840 = vadd.xlane.f32.xlu0 %v839_v39  ;;  %v936_v59 = vadd.f32 %v891_v42, %v890_v54  ;;  %v892_v48 = vmul.f32 %v3971_v44, %v3971_v44 }
 0x129   : > { %v842_v56 = vadd.f32 %v3974_v52, %v3971_v44  ;;  %v893_v61 = vmul.f32 %v3974_v52, %v3974_v52 }
 0x12b   : > { %843 = vadd.xlane.f32.xlu1 %v842_v56  ;;  %937 = vadd.xlane.f32.xlu0 %v936_v59  ;;  %v939_v62 = vadd.f32 %v893_v61, %v892_v48 }
 0x12f   : > { %940 = vadd.xlane.f32.xlu1 %v939_v62 }
 0x178   : > { %v799_v49 = vpop.xlane.xlu0 %798 }
 0x179   : > { %v846_v63 = vmul.f32 0.00390625, %v799_v49 }
 0x17a   : > { %v896_v0 = vpop.xlane.xlu1 %895 }
 0x17b   : > { %v942_v6 = vmul.f32 0.00390625, %v896_v0  ;;  %v958_v9 = vmul.f32 %v846_v63, %v846_v63 }
 0x17c   : > { %v802_v10 = vpop.xlane.xlu0 %801 }
 0x17d   : > { %v974_v13 = vsub.f32 %v942_v6, %v958_v9  ;;  %v3984_v14 = vmul.f32 0.00390625, %v802_v10 }
 0x17e   : > { %v899_v15 = vpop.xlane.xlu1 %898 }
 0x17f   : > { %v990_v16 = vmax.f32 %v974_v13, 0.0  ;;  %v943_v17 = vmul.f32 0.00390625, %v899_v15  ;;  %v959_v24 = vmul.f32 %v3984_v14, %v3984_v14  ;;  %v795_v15 = vld [vmem:[%s5405_s4] sm:$0x3] }
 0x180   : > { %v805_v25 = vpop.xlane.xlu0 %804 }
 0x181   : > { %v1038_v26 = vadd.f32 1e-05, %v990_v16  ;;  %v3988_v27 = vmul.f32 0.00390625, %v805_v25  ;;  %v975_v28 = vsub.f32 %v943_v17, %v959_v24  ;;  %v796_v25 = vld [vmem:[%s5406_s5] sm:$0x3] }
 0x183   : > { %3325 = vrsqrt.f32 %v1038_v26  ;;  %v991_v29 = vmax.f32 %v975_v28, 0.0  ;;  %v960_v39 = vmul.f32 %v3988_v27, %v3988_v27 }
 0x184   : > { %v808_v36 = vpop.xlane.xlu1 %807  ;;  %v902_v37 = vpop.xlane.xlu0 %901 }
 0x185   : > { %v3990_v38 = vmul.f32 0.00390625, %v808_v36  ;;  %v944_v42 = vmul.f32 0.00390625, %v902_v37  ;;  %v1039_v43 = vadd.f32 1e-05, %v991_v29  ;;  %v4009_v29 = vrot.slane %v795_v15, %v3722_v45 }
 0x186   : > { %v4012_v36 = vrot.slane %v795_v15, %v3727_v47  ;;  %v1011_v15 = vsub.f32 %v3763_v5, %v3988_v27 }
 0x187   : > { %v976_v54 = vsub.f32 %v944_v42, %v960_v39  ;;  %3327 = vrsqrt.f32 %v1039_v43  ;;  %v961_v48 = vmul.f32 %v3990_v38, %v3990_v38  ;;  %v1006_v39 = vsub.f32 %v3736_v51, %v846_v63 }
 0x188   : > { %v905_v56 = vpop.xlane.xlu1 %904  ;;  %v811_v59 = vpop.xlane.xlu0 %810  ;;  %v1007_v42 = vsub.f32 %v3739_v53, %v846_v63  ;;  %v4026_v51 = vrot.slane %v796_v25, %v3727_v47  ;;  %v1009_v63 = vsub.f32 %v3751_v60, %v3984_v14  ;;  %v1013_v5 = vsub.f32 %v3773_v12, %v3990_v38 }
 0x189   : > { %v992_v61 = vmax.f32 %v976_v54, 0.0  ;;  %v945_v62 = vmul.f32 0.00390625, %v905_v56  ;;  %v3996_v49 = vmul.f32 0.00390625, %v811_v59  ;;  %v4019_v59 = vrot.slane %v796_v25, %v3722_v45 }
 0x18b   : > { %v1040_v0 = vadd.f32 1e-05, %v992_v61  ;;  %v977_v6 = vsub.f32 %v945_v62, %v961_v48  ;;  %v962_v10 = vmul.f32 %v3996_v49, %v3996_v49 }
 0x18c   : > { %v814_v9 = vpop.xlane.xlu1 %813  ;;  %v908_v13 = vpop.xlane.xlu0 %907 }
 0x18d   : > { %3329 = vrsqrt.f32 %v1040_v0  ;;  %v993_v16 = vmax.f32 %v977_v6, 0.0  ;;  %v4003_v17 = vmul.f32 0.00390625, %v814_v9  ;;  %v946_v24 = vmul.f32 0.00390625, %v908_v13 }
 0x18e   : > { %v1008_v0 = vsub.f32 %v3742_v55, %v3984_v14  ;;  %v1010_v9 = vsub.f32 %v3760_v4, %v3988_v27 }
 0x18f   : > { %v1041_v26 = vadd.f32 1e-05, %v993_v16  ;;  %v978_v28 = vsub.f32 %v946_v24, %v962_v10  ;;  %v963_v43 = vmul.f32 %v4003_v17, %v4003_v17  ;;  %v1012_v16 = vsub.f32 %v3770_v11, %v3990_v38 }
 0x190   : > { %v3326_v37 = vpop.eup %3325  ;;  %v911_v54 = vpop.xlane.xlu1 %910 }
 0x191   : > { %v817_v56 = vpop.xlane.xlu0 %816  ;;  %3331 = vrsqrt.f32 %v1041_v26  ;;  %v994_v61 = vmax.f32 %v978_v28, 0.0  ;;  %v947_v48 = vmul.f32 0.00390625, %v911_v54  ;;  %v1071_v6 = vmul.f32 %v3326_v37, %v1007_v42 }
 0x192   : > { %v4021_v62 = vmul.f32 0.00390625, %v817_v56  ;;  %v1070_v53 = vmul.f32 %v3326_v37, %v1006_v39 }
 0x193   : > { %v1042_v10 = vadd.f32 1e-05, %v994_v61  ;;  %v979_v13 = vsub.f32 %v947_v48, %v963_v43  ;;  %v1114_v25 = vmul.f32 %v4012_v36, %v1071_v6 }
 0x194   : > { %v820_v55 = vpop.xlane.xlu1 %819  ;;  %v1113_v26 = vmul.f32 %v4009_v29, %v1070_v53  ;;  %v3328_v28 = vpop.eup %3327  ;;  %v964_v4 = vmul.f32 %v4021_v62, %v4021_v62 }
 0x195   : > { %v914_v24 = vpop.xlane.xlu0 %913  ;;  %v995_v37 = vmax.f32 %v979_v13, 0.0  ;;  %v4038_v60 = vmul.f32 0.00390625, %v820_v55  ;;  %3333 = vrsqrt.f32 %v1042_v10  ;;  %v1073_v27 = vmul.f32 %v3328_v28, %v1009_v63 }
 0x196   : > { %v948_v14 = vmul.f32 0.00390625, %v914_v24  ;;  %v1072_v11 = vmul.f32 %v3328_v28, %v1008_v0  ;;  %v1157_v43 = vadd.f32 %v4026_v51, %v1114_v25  ;;  %v1156_v54 = vadd.f32 %v4019_v59, %v1113_v26 }
 0x197   : > { %v1043_v39 = vadd.f32 1e-05, %v995_v37  ;;  %v965_v61 = vmul.f32 %v4038_v60, %v4038_v60  ;;  %v1116_v53 = vmul.f32 %v4012_v36, %v1073_v27  ;;  %v1015_v13 = vsub.f32 %v3791_v22, %v3996_v49 }
 0x198   : > { %v980_v42 = vsub.f32 %v948_v14, %v964_v4  ;;  %v917_v48 = vpop.xlane.xlu1 %916  ;;  %v1115_v12 = vmul.f32 %v4009_v29, %v1072_v11  ;;  %v1017_v26 = vsub.f32 %v3806_v31, %v4003_v17  ;;  %v1189_v37 = vmax.f32 %v1157_v43, 0.0 }
 0x199   : > { %v823_v6 = vpop.xlane.xlu0 %822  ;;  %3335 = vrsqrt.f32 %v1043_v39  ;;  %v949_v0 = vmul.f32 0.00390625, %v917_v48  ;;  %v1159_v24 = vadd.f32 %v4026_v51, %v1116_v53  ;;  %v1188_v4 = vmax.f32 %v1156_v54, 0.0 }
 0x19a   : > { %v996_v38 = vmax.f32 %v980_v42, 0.0  ;;  %v4052_v63 = vmul.f32 0.00390625, %v823_v6  ;;  %v3330_v10 = vpop.eup %3329  ;;  %v1158_v25 = vadd.f32 %v4019_v59, %v1115_v12 }
 0x19b   : > { %v981_v28 = vsub.f32 %v949_v0, %v965_v61  ;;  %v1191_v39 = vmax.f32 %v1159_v24, 0.0  ;;  %v1075_v48 = vmul.f32 %v3330_v10, %v1011_v15  ;;  %v1074_v43 = vmul.f32 %v3330_v10, %v1010_v9 }
 0x19c   : > { %v1044_v14 = vadd.f32 1e-05, %v996_v38  ;;  %v826_v27 = vpop.xlane.xlu1 %825  ;;  %v1190_v42 = vmax.f32 %v1158_v25, 0.0  ;;  %v966_v53 = vmul.f32 %v4052_v63, %v4052_v63  ;;  %v1019_v38 = vsub.f32 %v3824_v41, %v4021_v62 }
 0x19d   : > { %v920_v11 = vpop.xlane.xlu0 %919  ;;  %v997_v22 = vmax.f32 %v981_v28, 0.0  ;;  %v4062_v6 = vmul.f32 0.00390625, %v826_v27  ;;  %v1221_v55 = vpack.c.bf16 %v1191_v39, %v1189_v37  ;;  %v1118_v61 = vmul.f32 %v4012_v36, %v1075_v48 }
 0x19e   : > { %v950_v3 = vmul.f32 0.00390625, %v920_v11  ;;  %v3332_v12 = vpop.eup %3331  ;;  %v1220_v56 = vpack.c.bf16 %v1190_v42, %v1188_v4  ;;  %3337 = vrsqrt.f32 %v1044_v14  ;;  %v1023_v31 = vsub.f32 %v3860_v8, %v4052_v63 }
 0x19f   : > { %v1045_v15 = vadd.f32 1e-05, %v997_v22  ;;  %1472 = vmatprep.mubr.bf16.mxu1 %v1221_v55  ;;  %v1077_v28 = vmul.f32 %v3332_v12, %v1013_v5  ;;  %v1161_v27 = vadd.f32 %v4026_v51, %v1118_v61  ;;  %v1076_v37 = vmul.f32 %v3332_v12, %v1012_v16 }
 0x1a0   : > { %v982_v0 = vsub.f32 %v950_v3, %v966_v53  ;;  %v923_v24 = vpop.xlane.xlu1 %922  ;;  %v967_v9 = vmul.f32 %v4062_v6, %v4062_v6  ;;  %1473 = vmatmul.mubr.bf16.vlgmr.msra.gmra.mxu1 %v1220_v56  ;;  %v1117_v3 = vmul.f32 %v4009_v29, %v1074_v43  ;;  %v1021_v16 = vsub.f32 %v3842_v58, %v4038_v60 }
 0x1a1   : > { %v829_v25 = vpop.xlane.xlu0 %828  ;;  %v951_v10 = vmul.f32 0.00390625, %v923_v24  ;;  %3339 = vrsqrt.f32 %v1045_v15  ;;  %v1120_v39 = vmul.f32 %v4012_v36, %v1077_v28  ;;  %v1119_v55 = vmul.f32 %v4009_v29, %v1076_v37 }
 0x1a2   : > { %v998_v4 = vmax.f32 %v982_v0, 0.0  ;;  %v4074_v11 = vmul.f32 0.00390625, %v829_v25  ;;  %v3334_v14 = vpop.eup %3333  ;;  %v1193_v12 = vmax.f32 %v1161_v27, 0.0  ;;  %v1160_v61 = vadd.f32 %v4019_v59, %v1117_v3 }
 0x1a3   : > { %v983_v48 = vsub.f32 %v951_v10, %v967_v9  ;;  %v1163_v53 = vadd.f32 %v4026_v51, %v1120_v39  ;;  %v1162_v43 = vadd.f32 %v4019_v59, %v1119_v55  ;;  %v1079_v10 = vmul.f32 %v3334_v14, %v1015_v13 }
 0x1a4   : > { %v1046_v42 = vadd.f32 1e-05, %v998_v4  ;;  %v832_v22 = vpop.xlane.xlu1 %831  ;;  %v968_v24 = vmul.f32 %v4074_v11, %v4074_v11  ;;  %v1192_v4 = vmax.f32 %v1160_v61, 0.0  ;;  %v1022_v39 = vsub.f32 %v3857_v7, %v4052_v63 }
 0x1a5   : > { %v926_v56 = vpop.xlane.xlu0 %925  ;;  %v999_v15 = vmax.f32 %v983_v48, 0.0  ;;  %v4086_v0 = vmul.f32 0.00390625, %v832_v22  ;;  %v1195_v37 = vmax.f32 %v1163_v53, 0.0  ;;  %v1194_v9 = vmax.f32 %v1162_v43, 0.0 }
 0x1a6   : > { %v952_v25 = vmul.f32 0.00390625, %v926_v56  ;;  %v3336_v28 = vpop.eup %3335  ;;  %3341 = vrsqrt.f32 %v1046_v42  ;;  %v1122_v42 = vmul.f32 %v4012_v36, %v1079_v10 }
 0x1a7   : > { %v1047_v27 = vadd.f32 1e-05, %v999_v15  ;;  %v969_v55 = vmul.f32 %v4086_v0, %v4086_v0  ;;  %v1223_v5 = vpack.c.bf16 %v1195_v37, %v1193_v12  ;;  %v1222_v54 = vpack.c.bf16 %v1194_v9, %v1192_v4 }
 0x1a8   : > { %v984_v3 = vsub.f32 %v952_v25, %v968_v24  ;;  %v929_v48 = vpop.xlane.xlu1 %928  ;;  %v1081_v56 = vmul.f32 %v3336_v28, %v1017_v26  ;;  %v5441_v15 = vsub.f32 %v3788_v21, %v3996_v49  ;;  %v5442_v12 = vsub.f32 %v3803_v30, %v4003_v17 }
 0x1a9   : > { %v835_v22 = vpop.xlane.xlu0 %834  ;;  %3343 = vrsqrt.f32 %v1047_v27  ;;  %v953_v13 = vmul.f32 0.00390625, %v929_v48  ;;  %1482 = vmatprep.mubr.bf16.mxu1 %v1223_v5  ;;  %v1024_v26 = vsub.f32 %v3875_v19, %v4062_v6  ;;  %v1165_v21 = vadd.f32 %v4026_v51, %v1122_v42 }
 0x1aa   : > { %v1000_v53 = vmax.f32 %v984_v3, 0.0  ;;  %v4097_v61 = vmul.f32 0.00390625, %v835_v22  ;;  %v1124_v43 = vmul.f32 %v4012_v36, %v1081_v56  ;;  %v1078_v24 = vmul.f32 %v3334_v14, %v5441_v15  ;;  %1483 = vmatmul.mubr.bf16.gmra.mxu1 %v1222_v54 }
 0x1ab   : > { %v1080_v25 = vmul.f32 %v3336_v28, %v5442_v12  ;;  %v985_v5 = vsub.f32 %v953_v13, %v969_v55  ;;  %v3338_v17 = vpop.eup %3337  ;;  %v1197_v3 = vmax.f32 %v1165_v21, 0.0  ;;  %v1025_v56 = vsub.f32 %v3878_v20, %v4062_v6 }
 0x1ac   : > { %v1048_v37 = vadd.f32 1e-05, %v1000_v53  ;;  %v838_v4 = vpop.xlane.xlu1 %837  ;;  %v970_v9 = vmul.f32 %v4097_v61, %v4097_v61  ;;  %v1167_v49 = vadd.f32 %v4026_v51, %v1124_v43  ;;  %v1121_v30 = vmul.f32 %v4009_v29, %v1078_v24 }
 0x1ad   : > { %v932_v10 = vpop.xlane.xlu0 %931  ;;  %v1001_v14 = vmax.f32 %v985_v5, 0.0  ;;  %v4116_v28 = vmul.f32 0.00390625, %v838_v4  ;;  %v1123_v54 = vmul.f32 %v4009_v29, %v1080_v25  ;;  %v1026_v53 = vsub.f32 %v3893_v33, %v4074_v11 }
 0x1ae   : > { %3345 = vrsqrt.f32 %v1048_v37  ;;  %v954_v27 = vmul.f32 0.00390625, %v932_v10  ;;  %v1199_v55 = vmax.f32 %v1167_v49, 0.0  ;;  %v1164_v48 = vadd.f32 %v4019_v59, %v1121_v30  ;;  %v3340_v22 = vpop.eup %3339 }
 0x1af   : > { %v1049_v13 = vadd.f32 1e-05, %v1001_v14  ;;  %v971_v43 = vmul.f32 %v4116_v28, %v4116_v28  ;;  %v1166_v37 = vadd.f32 %v4019_v59, %v1123_v54  ;;  %v1085_v21 = vmul.f32 %v3340_v22, %v1021_v16 }
 0x1b0   : > { %v986_v42 = vsub.f32 %v954_v27, %v970_v9  ;;  %v935_v15 = vpop.xlane.xlu1 %934  ;;  %v1225_v12 = vpack.c.bf16 %v1199_v55, %v1197_v3  ;;  %v1196_v25 = vmax.f32 %v1164_v48, 0.0  ;;  %v1083_v9 = vmul.f32 %v3338_v17, %v1019_v38 }
 0x1b1   : > { %v841_v24 = vpop.xlane.xlu0 %840  ;;  %3347 = vrsqrt.f32 %v1049_v13  ;;  %v955_v4 = vmul.f32 0.00390625, %v935_v15  ;;  %v1198_v20 = vmax.f32 %v1166_v37, 0.0  ;;  %v5443_v49 = vsub.f32 %v3821_v40, %v4021_v62 }
 0x1b2   : > { %v1002_v5 = vmax.f32 %v986_v42, 0.0  ;;  %v4127_v10 = vmul.f32 0.00390625, %v841_v24  ;;  %1492 = vmatprep.mubr.bf16.mxu1 %v1225_v12  ;;  %v1027_v14 = vsub.f32 %v3896_v34, %v4074_v11  ;;  %v1028_v27 = vsub.f32 %v3911_v46, %v4086_v0 }
 0x1b3   : > { %v1082_v30 = vmul.f32 %v3338_v17, %v5443_v49  ;;  %v987_v55 = vsub.f32 %v955_v4, %v971_v43  ;;  %v3342_v54 = vpop.eup %3341  ;;  %v1224_v48 = vpack.c.bf16 %v1198_v20, %v1196_v25  ;;  %v1126_v16 = vmul.f32 %v4012_v36, %v1083_v9 }
 0x1b4   : > { %v1050_v3 = vadd.f32 1e-05, %v1002_v5  ;;  %v844_v41 = vpop.xlane.xlu1 %843  ;;  %v972_v38 = vmul.f32 %v4127_v10, %v4127_v10  ;;  %v1128_v40 = vmul.f32 %v4012_v36, %v1085_v21  ;;  %v5444_v15 = vsub.f32 %v3839_v57, %v4038_v60 }
 0x1b5   : > { %v938_v58 = vpop.xlane.xlu0 %937  ;;  %v1003_v62 = vmax.f32 %v987_v55, 0.0  ;;  %v4146_v17 = vmul.f32 0.00390625, %v844_v41  ;;  %1493 = vmatmul.mubr.bf16.gmra.mxu1 %v1224_v48  ;;  %v1169_v42 = vadd.f32 %v4026_v51, %v1126_v16  ;;  %v1125_v12 = vmul.f32 %v4009_v29, %v1082_v30 }
 0x1b6   : > { %3349 = vrsqrt.f32 %v1050_v3  ;;  %v956_v34 = vmul.f32 0.00390625, %v938_v58  ;;  %v3344_v13 = vpop.eup %3343  ;;  %v1171_v43 = vadd.f32 %v4026_v51, %v1128_v40  ;;  %v1084_v24 = vmul.f32 %v3340_v22, %v5444_v15 }
 0x1b7   : > { %v1029_v37 = vsub.f32 %v3914_v50, %v4086_v0  ;;  %v1031_v25 = vsub.f32 %v3932_v2, %v4097_v61  ;;  %v1051_v5 = vadd.f32 1e-05, %v1003_v62  ;;  %v973_v20 = vmul.f32 %v4146_v17, %v4146_v17 }
 0x1b8   : > { %v988_v4 = vsub.f32 %v956_v34, %v972_v38  ;;  %v941_v9 = vpop.xlane.xlu1 %940  ;;  %v1201_v21 = vmax.f32 %v1169_v42, 0.0  ;;  %v1203_v49 = vmax.f32 %v1171_v43, 0.0  ;;  %v1127_v3 = vmul.f32 %v4009_v29, %v1084_v24 }
 0x1b9   : > { %3351 = vrsqrt.f32 %v1051_v5  ;;  %v957_v60 = vmul.f32 0.00390625, %v941_v9  ;;  %v1168_v22 = vadd.f32 %v4019_v59, %v1125_v12  ;;  %v1087_v2 = vmul.f32 %v3342_v54, %v1023_v31 }
 0x1ba   : > { %v1004_v57 = vmax.f32 %v988_v4, 0.0  ;;  %v1227_v50 = vpack.c.bf16 %v1203_v49, %v1201_v21  ;;  %v1170_v55 = vadd.f32 %v4019_v59, %v1127_v3  ;;  %v1089_v48 = vmul.f32 %v3344_v13, %v1025_v56 }
 0x1bb   : > { %v3346_v30 = vpop.eup %3345  ;;  %v989_v38 = vsub.f32 %v957_v60, %v973_v20  ;;  %v1200_v58 = vmax.f32 %v1168_v22, 0.0  ;;  %v1086_v16 = vmul.f32 %v3342_v54, %v1022_v39  ;;  %v1130_v62 = vmul.f32 %v4012_v36, %v1087_v2 }
 0x1bc   : > { %v1052_v41 = vadd.f32 1e-05, %v1004_v57  ;;  %1502 = vmatprep.mubr.bf16.mxu1 %v1227_v50  ;;  %v1202_v40 = vmax.f32 %v1170_v55, 0.0  ;;  %v1132_v34 = vmul.f32 %v4012_v36, %v1089_v48  ;;  %v1088_v42 = vmul.f32 %v3344_v13, %v1024_v26 }
 0x1bd   : > { %v1005_v8 = vmax.f32 %v989_v38, 0.0  ;;  %v1129_v31 = vmul.f32 %v4009_v29, %v1086_v16  ;;  %v1091_v56 = vmul.f32 %v3346_v30, %v1027_v14  ;;  %v1173_v7 = vadd.f32 %v4026_v51, %v1130_v62 }
 0x1be   : > { %3353 = vrsqrt.f32 %v1052_v41  ;;  %v3348_v43 = vpop.eup %3347  ;;  %v1226_v15 = vpack.c.bf16 %v1202_v40, %v1200_v58  ;;  %v1175_v63 = vadd.f32 %v4026_v51, %v1132_v34  ;;  %v1131_v39 = vmul.f32 %v4009_v29, %v1088_v42 }
 0x1bf   : > { %v1053_v54 = vadd.f32 1e-05, %v1005_v8  ;;  %v1172_v24 = vadd.f32 %v4019_v59, %v1129_v31  ;;  %v1093_v12 = vmul.f32 %v3348_v43, %v1029_v37  ;;  %v1134_v19 = vmul.f32 %v4012_v36, %v1091_v56 }
 0x1c0   : > { %1503 = vmatmul.mubr.bf16.gmra.mxu1 %v1226_v15  ;;  %v1205_v6 = vmax.f32 %v1173_v7, 0.0  ;;  %v1207_v26 = vmax.f32 %v1175_v63, 0.0  ;;  %v1174_v13 = vadd.f32 %v4019_v59, %v1131_v39  ;;  %v1090_v14 = vmul.f32 %v3346_v30, %v1026_v53 }
 0x1c1   : > { %3355 = vrsqrt.f32 %v1053_v54  ;;  %v1204_v5 = vmax.f32 %v1172_v24, 0.0  ;;  %v1136_v4 = vmul.f32 %v4012_v36, %v1093_v12  ;;  %v1177_v20 = vadd.f32 %v4026_v51, %v1134_v19 }
 0x1c2   : > { %v1229_v21 = vpack.c.bf16 %v1207_v26, %v1205_v6  ;;  %v1206_v37 = vmax.f32 %v1174_v13, 0.0  ;;  %v1092_v49 = vmul.f32 %v3348_v43, %v1028_v27  ;;  %v1133_v3 = vmul.f32 %v4009_v29, %v1090_v14 }
 0x1c3   : > { %v3350_v9 = vpop.eup %3349  ;;  %v1179_v57 = vadd.f32 %v4026_v51, %v1136_v4  ;;  %v1030_v33 = vsub.f32 %v3929_v1, %v4097_v61  ;;  %v1032_v11 = vsub.f32 %v3947_v18, %v4116_v28  ;;  %v1033_v30 = vsub.f32 %v3950_v23, %v4116_v28 }
 0x1c4   : > { %v1095_v60 = vmul.f32 %v3350_v9, %v1031_v25  ;;  %1512 = vmatprep.mubr.bf16.mxu1 %v1229_v21  ;;  %v1228_v53 = vpack.c.bf16 %v1206_v37, %v1204_v5  ;;  %v1135_v22 = vmul.f32 %v4009_v29, %v1092_v49  ;;  %v1209_v46 = vmax.f32 %v1177_v20, 0.0 }
 0x1c5   : > { %v1211_v0 = vmax.f32 %v1179_v57, 0.0  ;;  %v1176_v25 = vadd.f32 %v4019_v59, %v1133_v3  ;;  %v1094_v1 = vmul.f32 %v3350_v9, %v1030_v33  ;;  %v1034_v48 = vsub.f32 %v3959_v32, %v4127_v10  ;;  %v3279_v57 = vld [vmem:[%s5411_s10 + $0x64] ss:$8 sps:$4 sm:$0xff]   ;;  %v3277_v33 = vld [vmem:[%s5411_s10 + $0x60] ss:$8 sps:$4 sm:$0xff]  }
 0x1c6   : > { %v1138_v27 = vmul.f32 %v4012_v36, %v1095_v60  ;;  %v3352_v50 = vpop.eup %3351  ;;  %v1178_v55 = vadd.f32 %v4019_v59, %v1135_v22  ;;  %v1035_v23 = vsub.f32 %v3962_v35, %v4127_v10  ;;  %v1037_v8 = vsub.f32 %v3974_v52, %v4146_v17  ;;  %v3285_v22 = vld [vmem:[%s5411_s10 + $0x44] ss:$8 sps:$4 sm:$0xff]  }
 0x1c7   : > { %v1231_v61 = vpack.c.bf16 %v1211_v0, %v1209_v46  ;;  %v1097_v2 = vmul.f32 %v3352_v50, %v1033_v30  ;;  %v1096_v18 = vmul.f32 %v3352_v50, %v1032_v11  ;;  %v1208_v40 = vmax.f32 %v1176_v25, 0.0  ;;  %v3282_v11 = vld [vmem:[%s5411_s10 + $0x54] ss:$8 sps:$4 sm:$0xff]   ;;  %v3283_v30 = vld [vmem:[%s5411_s10 + $0x40] ss:$8 sps:$4 sm:$0xff]  }
 0x1c8   : > { %1513 = vmatmul.mubr.bf16.gmra.mxu1 %v1228_v53  ;;  %v1210_v41 = vmax.f32 %v1178_v55, 0.0  ;;  %v1181_v38 = vadd.f32 %v4026_v51, %v1138_v27  ;;  %v1137_v62 = vmul.f32 %v4009_v29, %v1094_v1  ;;  %v1036_v63 = vsub.f32 %v3971_v44, %v4146_v17  ;;  %v3280_v53 = vld [vmem:[%s5411_s10 + $0x50] ss:$8 sps:$4 sm:$0xff]   ;;  %v3288_v46 = vld [vmem:[%s5411_s10 + $0x34] ss:$8 sps:$4 sm:$0xff]  }
 0x1c9   : > { %1522 = vmatprep.mubr.bf16.mxu1 %v1231_v61  ;;  %v1140_v28 = vmul.f32 %v4012_v36, %v1097_v2  ;;  %v1139_v58 = vmul.f32 %v4009_v29, %v1096_v18  ;;  %v3286_v0 = vld [vmem:[%s5411_s10 + $0x30] ss:$8 sps:$4 sm:$0xff]   ;;  %v3291_v27 = vld [vmem:[%s5411_s10 + $0x24] ss:$8 sps:$4 sm:$0xff]   ;;  %v3289_v50 = vld [vmem:[%s5411_s10 + $0x20] ss:$8 sps:$4 sm:$0xff]  }
 0x1ca   : > { %v1230_v31 = vpack.c.bf16 %v1210_v41, %v1208_v40  ;;  %v1213_v10 = vmax.f32 %v1181_v38, 0.0  ;;  %v1180_v39 = vadd.f32 %v4019_v59, %v1137_v62  ;;  %v1268_v25 = vld [vmem:[%s5408_s7] sm:$0x3] }
 0x1cb   : > { %v3354_v16 = vpop.eup %3353  ;;  %v1183_v34 = vadd.f32 %v4026_v51, %v1140_v28  ;;  %v1182_v35 = vadd.f32 %v4019_v59, %v1139_v58  ;;  %v4267_v55 = vrot.slane %v1268_v25, %v3722_v45  ;;  %v4270_v1 = vrot.slane %v1268_v25, %v3727_v47 }
 0x1cc   : > { %v1099_v42 = vmul.f32 %v3354_v16, %v1035_v23  ;;  %v1098_v32 = vmul.f32 %v3354_v16, %v1034_v48  ;;  %v1212_v13 = vmax.f32 %v1180_v39, 0.0 }
 0x1cd   : > { %v1215_v56 = vmax.f32 %v1183_v34, 0.0  ;;  %v1214_v12 = vmax.f32 %v1182_v35, 0.0 }
 0x1ce   : > { %v1142_v43 = vmul.f32 %v4012_v36, %v1099_v42  ;;  %v1141_v15 = vmul.f32 %v4009_v29, %v1098_v32  ;;  %v3356_v7 = vpop.eup %3355 }
 0x1cf   : > { %v1233_v54 = vpack.c.bf16 %v1215_v56, %v1213_v10  ;;  %v1101_v24 = vmul.f32 %v3356_v7, %v1037_v8  ;;  %v1100_v52 = vmul.f32 %v3356_v7, %v1036_v63  ;;  %v1232_v44 = vpack.c.bf16 %v1214_v12, %v1212_v13 }
 0x1d0   : > { %1523 = vmatmul.mubr.bf16.gmra.mxu1 %v1230_v31  ;;  %v1184_v19 = vadd.f32 %v4019_v59, %v1141_v15  ;;  %v1185_v26 = vadd.f32 %v4026_v51, %v1142_v43 }
 0x1d1   : > { %1532 = vmatprep.mubr.bf16.mxu1 %v1233_v54  ;;  %v1144_v6 = vmul.f32 %v4012_v36, %v1101_v24  ;;  %v1143_v14 = vmul.f32 %v4009_v29, %v1100_v52  ;;  %v3272_v36 = vld [vmem:[%s5411_s10 + $0x70] ss:$8 sps:$4 sm:$0xff]   ;;  %v3274_v29 = vld [vmem:[%s5411_s10 + $0x74] ss:$8 sps:$4 sm:$0xff]  }
 0x1d2   : > { %v1217_v4 = vmax.f32 %v1185_v26, 0.0  ;;  %v1216_v9 = vmax.f32 %v1184_v19, 0.0  ;;  %2336 = vmatprep.subr.bf16.mxu1 %v3274_v29  ;;  %v3294_v26 = vld [vmem:[%s5411_s10 + $0x14] ss:$8 sps:$4 sm:$0xff]  }
 0x1d3   : > { %v1187_v5 = vadd.f32 %v4026_v51, %v1144_v6  ;;  %v1186_v17 = vadd.f32 %v4019_v59, %v1143_v14  ;;  %v2025_v59 = vld [vmem:[%s5412_s11] sm:$0xff]  ;;  %2337 = vmatpush1.bf16.msra.mxu1 %v3272_v36  ;;  %v3292_v6 = vld [vmem:[%s5411_s10 + $0x10] ss:$8 sps:$4 sm:$0xff]  }
 0x1d4   : > { %v3130_v51 = vcombine.high %v2025_v59, %v2025_v59  ;;  %v3129_v3 = vcombine.low %v2025_v59, %v2025_v59  ;;  %2338 = vmatprep.subr.bf16.mxu1 %v3279_v57  ;;  %v3297_v59 = vld [vmem:[%s5411_s10 + $0x4] ss:$8 sps:$4 sm:$0xff]  }
 0x1d5   : > { %v1219_v20 = vmax.f32 %v1187_v5, 0.0  ;;  %v1218_v21 = vmax.f32 %v1186_v17, 0.0 }
 0x1d6   : > { %3131 = vmatprep.subr.msk.bf16.mxu0 %vm2056_vm1, %v3130_v51  ;;  %v2058_v60 = vsel %vm2056_vm1, %v3129_v3, 0 }
 0x1d7   : > { %v1235_v37 = vpack.c.bf16 %v1219_v20, %v1217_v4  ;;  %v1234_v49 = vpack.c.bf16 %v1218_v21, %v1216_v9  ;;  %2078 = vmatpush1.bf16.msra.mxu0 %v2058_v60  ;;  %2339 = vmatpush1.bf16.msra.mxu1 %v3277_v33  ;;  %v3295_v60 = vld [vmem:[%s5411_s10] ss:$8 sps:$4 sm:$0xff]  }
 0x1d8   : > { %1533 = vmatmul.mubr.bf16.gmra.mxu1 %v1232_v44  ;;  %2340 = vmatprep.subr.bf16.mxu1 %v3282_v11 }
 0x1d9   : > { %1542 = vmatprep.mubr.bf16.mxu1 %v1235_v37 }
 0x1db   : > { %2341 = vmatpush1.bf16.msra.mxu1 %v3280_v53 }
 0x1dc   : > { %2342 = vmatprep.subr.bf16.mxu1 %v3285_v22  ;;  %v3300_v22 = vld [vmem:[%s5411_s10 + $0xf4] ss:$8 sps:$4 sm:$0xff]  }
 0x1df   : > { %2343 = vmatpush1.bf16.msra.mxu1 %v3283_v30 }
 0x1e0   : > { %1543 = vmatmul.mubr.bf16.gmra.mxu1 %v1234_v49  ;;  %2344 = vmatprep.subr.bf16.mxu1 %v3288_v46 }
 0x1e3   : > { %2345 = vmatpush1.bf16.msra.mxu1 %v3286_v0 }
 0x1e4   : > { %2346 = vmatprep.subr.bf16.mxu1 %v3291_v27  ;;  %v3298_v27 = vld [vmem:[%s5411_s10 + $0xf0] ss:$8 sps:$4 sm:$0xff]  }
 0x1e7   : > { %2347 = vmatpush1.bf16.msra.mxu1 %v3289_v50 }
 0x1e8   : > { %2348 = vmatprep.subr.bf16.mxu1 %v3294_v26 }
 0x1eb   : > { %2349 = vmatpush1.bf16.msra.mxu1 %v3292_v6  ;;  %v3309_v6 = vld [vmem:[%s5411_s10 + $0xc4] ss:$8 sps:$4 sm:$0xff]  }
 0x1ec   : > { %2350 = vmatprep.subr.bf16.mxu1 %v3297_v59 }
 0x1ef   : > { %2351 = vmatpush1.bf16.msra.mxu1 %v3295_v60 }
 0x1f0   : > { %2352 = vmatprep.subr.bf16.mxu1 %v3300_v22 }
 0x1f3   : > { %2353 = vmatpush2.bf16.msra.mxu1 %v3298_v27 }
 0x260   : > { %v1474_v61 = vpop.f32.mrf.mxu1 }
 0x261   : > { %v4273_v18 = vadd.f32 %v1474_v61, %v4267_v55 }
 0x262   : > { %v1476_v2 = vpop.f32.mrf.mxu1 }
 0x263   : > { %v4276_v48 = vadd.f32 %v1476_v2, %v4270_v1  ;;  %v1619_v40 = vmul.f32 %v4273_v18, %v4273_v18 }
 0x264   : > { %v1478_v41 = vpop.f32.mrf.mxu1 }
 0x265   : > { %v1555_v23 = vadd.f32 %v4276_v48, %v4273_v18  ;;  %v1620_v28 = vmul.f32 %v4276_v48, %v4276_v48  ;;  %v4283_v58 = vadd.f32 %v1478_v41, %v4267_v55  ;;  %v3303_v41 = vld [vmem:[%s5411_s10 + $0xe4] ss:$8 sps:$4 sm:$0xff]  }
 0x266   : > { %v1480_v38 = vpop.f32.mrf.mxu1  ;;  %2354 = vmatprep.subr.bf16.mxu1 %v3303_v41 }
 0x267   : > { %v4286_v16 = vadd.f32 %v1480_v38, %v4270_v1  ;;  %1556 = vadd.xlane.f32.xlu0 %v1555_v23  ;;  %v1651_v34 = vadd.f32 %v1620_v28, %v1619_v40  ;;  %v1621_v8 = vmul.f32 %v4283_v58, %v4283_v58  ;;  %v3301_v40 = vld [vmem:[%s5411_s10 + $0xe0] ss:$8 sps:$4 sm:$0xff]  }
 0x268   : > { %2355 = vmatpush2.bf16.msra.mxu1 %v3301_v40 }
 0x269   : > { %v1558_v62 = vadd.f32 %v4286_v16, %v4283_v58  ;;  %v1622_v42 = vmul.f32 %v4286_v16, %v4286_v16 }
 0x26a   : > { %v1484_v32 = vpop.f32.mrf.mxu1 }
 0x26b   : > { %1559 = vadd.xlane.f32.xlu1 %v1558_v62  ;;  %1652 = vadd.xlane.f32.xlu0 %v1651_v34  ;;  %v4297_v35 = vadd.f32 %v1484_v32, %v4267_v55  ;;  %v1654_v56 = vadd.f32 %v1622_v42, %v1621_v8 }
 0x26c   : > { %v1486_v31 = vpop.f32.mrf.mxu1 }
 0x26d   : > { %v4300_v10 = vadd.f32 %v1486_v31, %v4270_v1  ;;  %v1623_v24 = vmul.f32 %v4297_v35, %v4297_v35  ;;  %v3306_v31 = vld [vmem:[%s5411_s10 + $0xd4] ss:$8 sps:$4 sm:$0xff]  }
 0x26e   : > { %v1488_v43 = vpop.f32.mrf.mxu1  ;;  %2356 = vmatprep.subr.bf16.mxu1 %v3306_v31  ;;  %v3316_v31 = vld [vmem:[%s5411_s10 + $0x90] ss:$8 sps:$4 sm:$0xff]  }
 0x26f   : > { %1655 = vadd.xlane.f32.xlu1 %v1654_v56  ;;  %v1561_v15 = vadd.f32 %v4300_v10, %v4297_v35  ;;  %v1624_v7 = vmul.f32 %v4300_v10, %v4300_v10  ;;  %v4307_v39 = vadd.f32 %v1488_v43, %v4267_v55 }
 0x270   : > { %v1490_v63 = vpop.f32.mrf.mxu1 }
 0x271   : > { %v4310_v54 = vadd.f32 %v1490_v63, %v4270_v1  ;;  %1562 = vadd.xlane.f32.xlu0 %v1561_v15  ;;  %v1657_v52 = vadd.f32 %v1624_v7, %v1623_v24  ;;  %v1625_v14 = vmul.f32 %v4307_v39, %v4307_v39  ;;  %v3304_v7 = vld [vmem:[%s5411_s10 + $0xd0] ss:$8 sps:$4 sm:$0xff]  }
 0x272   : > { %2357 = vmatpush2.bf16.msra.mxu1 %v3304_v7 }
 0x273   : > { %v1564_v12 = vadd.f32 %v4310_v54, %v4307_v39  ;;  %v1626_v19 = vmul.f32 %v4310_v54, %v4310_v54  ;;  %2358 = vmatprep.subr.bf16.mxu1 %v3309_v6 }
 0x275   : > { %v1494_v13 = vpop.f32.mrf.mxu1  ;;  %1565 = vadd.xlane.f32.xlu1 %v1564_v12  ;;  %1658 = vadd.xlane.f32.xlu0 %v1657_v52  ;;  %v1660_v44 = vadd.f32 %v1626_v19, %v1625_v14 }
 0x276   : > { %v4327_v17 = vadd.f32 %v1494_v13, %v4267_v55 }
 0x277   : > { %v1496_v5 = vpop.f32.mrf.mxu1 }
 0x278   : > { %v4330_v4 = vadd.f32 %v1496_v5, %v4270_v1  ;;  %v1627_v29 = vmul.f32 %v4327_v17, %v4327_v17  ;;  %v3307_v5 = vld [vmem:[%s5411_s10 + $0xc0] ss:$8 sps:$4 sm:$0xff]  }
 0x279   : > { %v1498_v20 = vpop.f32.mrf.mxu1  ;;  %1661 = vadd.xlane.f32.xlu1 %v1660_v44  ;;  %2359 = vmatpush2.bf16.msra.mxu1 %v3307_v5 }
 0x27a   : > { %v1567_v9 = vadd.f32 %v4330_v4, %v4327_v17  ;;  %v1628_v21 = vmul.f32 %v4330_v4, %v4330_v4  ;;  %v4337_v49 = vadd.f32 %v1498_v20, %v4267_v55 }
 0x27b   : > { %v1500_v37 = vpop.f32.mrf.mxu1 }
 0x27c   : > { %v4340_v36 = vadd.f32 %v1500_v37, %v4270_v1  ;;  %1568 = vadd.xlane.f32.xlu0 %v1567_v9  ;;  %v1663_v3 = vadd.f32 %v1628_v21, %v1627_v29  ;;  %v1629_v11 = vmul.f32 %v4337_v49, %v4337_v49  ;;  %v3312_v29 = vld [vmem:[%s5411_s10 + $0xb4] ss:$8 sps:$4 sm:$0xff]  }
 0x27d   : > { %2360 = vmatprep.subr.bf16.mxu1 %v3312_v29 }
 0x27e   : > { %v1570_v51 = vadd.f32 %v4340_v36, %v4337_v49  ;;  %v1630_v57 = vmul.f32 %v4340_v36, %v4340_v36 }
 0x280   : > { %v1504_v33 = vpop.f32.mrf.mxu1  ;;  %1571 = vadd.xlane.f32.xlu1 %v1570_v51  ;;  %1664 = vadd.xlane.f32.xlu0 %v1663_v3  ;;  %v1666_v0 = vadd.f32 %v1630_v57, %v1629_v11  ;;  %v3310_v57 = vld [vmem:[%s5411_s10 + $0xb0] ss:$8 sps:$4 sm:$0xff]  }
 0x281   : > { %v4360_v30 = vadd.f32 %v1504_v33, %v4267_v55  ;;  %2361 = vmatpush2.bf16.msra.mxu1 %v3310_v57  ;;  %v5447_v57 = vmov 0  }
 0x282   : > { %v1506_v53 = vpop.f32.mrf.mxu1 }
 0x283   : > { %v4363_v46 = vadd.f32 %v1506_v53, %v4270_v1  ;;  %v1631_v38 = vmul.f32 %v4360_v30, %v4360_v30 }
 0x284   : > { %v1508_v50 = vpop.f32.mrf.mxu1  ;;  %1667 = vadd.xlane.f32.xlu1 %v1666_v0  ;;  %v3315_v0 = vld [vmem:[%s5411_s10 + $0xa4] ss:$8 sps:$4 sm:$0xff]  }
 0x285   : > { %v1573_v25 = vadd.f32 %v4363_v46, %v4360_v30  ;;  %v1632_v61 = vmul.f32 %v4363_v46, %v4363_v46  ;;  %v4376_v23 = vadd.f32 %v1508_v50, %v4267_v55  ;;  %2362 = vmatprep.subr.bf16.mxu1 %v3315_v0 }
 0x286   : > { %v1510_v2 = vpop.f32.mrf.mxu1 }
 0x287   : > { %v4379_v28 = vadd.f32 %v1510_v2, %v4270_v1  ;;  %1574 = vadd.xlane.f32.xlu0 %v1573_v25  ;;  %v1669_v42 = vadd.f32 %v1632_v61, %v1631_v38  ;;  %v1633_v15 = vmul.f32 %v4376_v23, %v4376_v23  ;;  %v3313_v61 = vld [vmem:[%s5411_s10 + $0xa0] ss:$8 sps:$4 sm:$0xff]  }
 0x288   : > { %v1514_v62 = vpop.f32.mrf.mxu1  ;;  %2363 = vmatpush2.bf16.msra.mxu1 %v3313_v61 }
 0x289   : > { %v1576_v34 = vadd.f32 %v4379_v28, %v4376_v23  ;;  %v1634_v32 = vmul.f32 %v4379_v28, %v4379_v28  ;;  %v4394_v56 = vadd.f32 %v1514_v62, %v4267_v55 }
 0x28a   : > { %v1516_v8 = vpop.f32.mrf.mxu1 }
 0x28b   : > { %v4397_v43 = vadd.f32 %v1516_v8, %v4270_v1  ;;  %1577 = vadd.xlane.f32.xlu1 %v1576_v34  ;;  %1670 = vadd.xlane.f32.xlu0 %v1669_v42  ;;  %v1672_v24 = vadd.f32 %v1634_v32, %v1633_v15  ;;  %v1635_v14 = vmul.f32 %v4394_v56, %v4394_v56  ;;  %v3318_v34 = vld [vmem:[%s5411_s10 + $0x94] ss:$8 sps:$4 sm:$0xff]  }
 0x28c   : > { %v1518_v63 = vpop.f32.mrf.mxu1  ;;  %2364 = vmatprep.subr.bf16.mxu1 %v3318_v34 }
 0x28d   : > { %v1579_v12 = vadd.f32 %v4397_v43, %v4394_v56  ;;  %v1636_v52 = vmul.f32 %v4397_v43, %v4397_v43  ;;  %v4412_v26 = vadd.f32 %v1518_v63, %v4267_v55  ;;  %2365 = vmatpush2.bf16.msra.mxu1 %v3316_v31 }
 0x28e   : > { %v1520_v19 = vpop.f32.mrf.mxu1 }
 0x28f   : > { %v4415_v13 = vadd.f32 %v1520_v19, %v4270_v1  ;;  %1673 = vadd.xlane.f32.xlu1 %v1672_v24  ;;  %1580 = vadd.xlane.f32.xlu0 %v1579_v12  ;;  %v1675_v9 = vadd.f32 %v1636_v52, %v1635_v14  ;;  %v1637_v3 = vmul.f32 %v4412_v26, %v4412_v26  ;;  %v597_v12 = vld [vmem:[%s4467_s22] sm:$0xff]  ;;  %v598_v52 = vld [vmem:[%s4467_s22 + $0x8] sm:$0xff] }
 0x290   : > { %v1524_v44 = vpop.f32.mrf.mxu1  ;;  %v613_v6 = vpack.c.bf16 %v598_v52, %v597_v12  ;;  %v3321_v14 = vld [vmem:[%s5411_s10 + $0x84] ss:$8 sps:$4 sm:$0xff]   ;;  %v603_v52 = vld [vmem:[%s4467_s22 + $0x30] sm:$0xff] }
 0x291   : > { %v1582_v20 = vadd.f32 %v4415_v13, %v4412_v26  ;;  %v1638_v21 = vmul.f32 %v4415_v13, %v4415_v13  ;;  %v4430_v59 = vadd.f32 %v1524_v44, %v4267_v55  ;;  %2366 = vmatprep.subr.bf16.mxu1 %v3321_v14  ;;  %v605_v14 = vld [vmem:[%s4467_s22 + $0x40] sm:$0xff] }
 0x292   : > { %v1526_v37 = vpop.f32.mrf.mxu1  ;;  %3132 = vmatmul.mubr.msk.bf16.vlgmr.msra.gmra.mxu0 %vm2031_vm2, %v613_v6 }
 0x293   : > { %v4433_v51 = vadd.f32 %v1526_v37, %v4270_v1  ;;  %1583 = vadd.xlane.f32.xlu1 %v1582_v20  ;;  %1676 = vadd.xlane.f32.xlu0 %v1675_v9  ;;  %v1678_v33 = vadd.f32 %v1638_v21, %v1637_v3  ;;  %v1639_v25 = vmul.f32 %v4430_v59, %v4430_v59  ;;  %v3319_v9 = vld [vmem:[%s5411_s10 + $0x80] ss:$8 sps:$4 sm:$0xff]  }
 0x294   : > { %v1528_v60 = vpop.f32.mrf.mxu1  ;;  %2105 = vmatprep.mubr.bf16.mxu0 %v5447_v57  ;;  %2367 = vmatpush2.bf16.msra.mxu1 %v3319_v9 }
 0x295   : > { %v1585_v11 = vadd.f32 %v4433_v51, %v4430_v59  ;;  %v1640_v53 = vmul.f32 %v4433_v51, %v4433_v51  ;;  %v4448_v27 = vadd.f32 %v1528_v60, %v4267_v55 }
 0x296   : > { %v1530_v22 = vpop.f32.mrf.mxu1 }
 0x297   : > { %v4451_v50 = vadd.f32 %v1530_v22, %v4270_v1  ;;  %1679 = vadd.xlane.f32.xlu1 %v1678_v33  ;;  %1586 = vadd.xlane.f32.xlu0 %v1585_v11  ;;  %v1681_v38 = vadd.f32 %v1640_v53, %v1639_v25  ;;  %v1641_v8 = vmul.f32 %v4448_v27, %v4448_v27 }
 0x298   : > { %v1534_v2 = vpop.f32.mrf.mxu1 }
 0x299   : > { %v1588_v41 = vadd.f32 %v4451_v50, %v4448_v27  ;;  %v1642_v40 = vmul.f32 %v4451_v50, %v4451_v50  ;;  %v4473_v42 = vadd.f32 %v1534_v2, %v4267_v55  ;;  %v599_v2 = vld [vmem:[%s4467_s22 + $0x10] sm:$0xff] }
 0x29a   : > { %v1536_v62 = vpop.f32.mrf.mxu1 }
 0x29b   : > { %v4476_v32 = vadd.f32 %v1536_v62, %v4270_v1  ;;  %1589 = vadd.xlane.f32.xlu1 %v1588_v41  ;;  %1682 = vadd.xlane.f32.xlu0 %v1681_v38  ;;  %v1684_v7 = vadd.f32 %v1642_v40, %v1641_v8  ;;  %v1643_v20 = vmul.f32 %v4473_v42, %v4473_v42  ;;  %v600_v41 = vld [vmem:[%s4467_s22 + $0x18] sm:$0xff] }
 0x29c   : > { %v1538_v15 = vpop.f32.mrf.mxu1  ;;  %v614_v40 = vpack.c.bf16 %v600_v41, %v599_v2 }
 0x29d   : > { %v1591_v63 = vadd.f32 %v4476_v32, %v4473_v42  ;;  %v1644_v24 = vmul.f32 %v4476_v32, %v4476_v32  ;;  %v4493_v5 = vadd.f32 %v1538_v15, %v4267_v55 }
 0x29e   : > { %v1540_v19 = vpop.f32.mrf.mxu1  ;;  %3133 = vmatmul.mubr.msk.bf16.gmra.mxu0 %vm2031_vm2, %v614_v40 }
 0x29f   : > { %v4496_v44 = vadd.f32 %v1540_v19, %v4270_v1  ;;  %1685 = vadd.xlane.f32.xlu1 %v1684_v7  ;;  %1592 = vadd.xlane.f32.xlu0 %v1591_v63  ;;  %v1687_v29 = vadd.f32 %v1644_v24, %v1643_v20  ;;  %v1645_v53 = vmul.f32 %v4493_v5, %v4493_v5  ;;  %v601_v63 = vld [vmem:[%s4467_s22 + $0x20] sm:$0xff]  ;;  %v602_v24 = vld [vmem:[%s4467_s22 + $0x28] sm:$0xff]  ;;  %v604_v19 = vld [vmem:[%s4467_s22 + $0x38] sm:$0xff] }
 0x2a0   : > { %v1544_v21 = vpop.f32.mrf.mxu1  ;;  %2115 = vmatprep.mubr.bf16.mxu0 %v5447_v57  ;;  %v615_v12 = vpack.c.bf16 %v602_v24, %v601_v63  ;;  %v616_v6 = vpack.c.bf16 %v604_v19, %v603_v52  ;;  %v606_v20 = vld [vmem:[%s4467_s22 + $0x48] sm:$0xff] }
 0x2a1   : > { %v1594_v37 = vadd.f32 %v4496_v44, %v4493_v5  ;;  %v1646_v3 = vmul.f32 %v4496_v44, %v4496_v44  ;;  %v4510_v33 = vadd.f32 %v1544_v21, %v4267_v55  ;;  %v617_v9 = vpack.c.bf16 %v606_v20, %v605_v14  ;;  %v607_v21 = vld [vmem:[%s4467_s22 + $0x50] sm:$0xff] }
 0x2a2   : > { %v1546_v60 = vpop.f32.mrf.mxu1 }
 0x2a3   : > { %v4513_v11 = vadd.f32 %v1546_v60, %v4270_v1  ;;  %1595 = vadd.xlane.f32.xlu1 %v1594_v37  ;;  %1688 = vadd.xlane.f32.xlu0 %v1687_v29  ;;  %v1690_v0 = vadd.f32 %v1646_v3, %v1645_v53  ;;  %v1647_v8 = vmul.f32 %v4510_v33, %v4510_v33  ;;  %v608_v37 = vld [vmem:[%s4467_s22 + $0x58] sm:$0xff]  ;;  %v609_v3 = vld [vmem:[%s4467_s22 + $0x60] sm:$0xff]  ;;  %v610_v60 = vld [vmem:[%s4467_s22 + $0x68] sm:$0xff] }
 0x2a4   : > { %v1548_v22 = vpop.f32.mrf.mxu1  ;;  %v618_v29 = vpack.c.bf16 %v608_v37, %v607_v21  ;;  %v619_v53 = vpack.c.bf16 %v610_v60, %v609_v3 }
 0x2a5   : > { %v1597_v25 = vadd.f32 %v4513_v11, %v4510_v33  ;;  %v1648_v61 = vmul.f32 %v4513_v11, %v4513_v11  ;;  %v4524_v62 = vadd.f32 %v1548_v22, %v4267_v55  ;;  %v611_v22 = vld [vmem:[%s4467_s22 + $0x70] sm:$0xff] }
 0x2a6   : > { %v1550_v38 = vpop.f32.mrf.mxu1  ;;  %3134 = vmatmul.mubr.msk.bf16.gmra.mxu0 %vm2031_vm2, %v615_v12 }
 0x2a7   : > { %v4527_v34 = vadd.f32 %v1550_v38, %v4270_v1  ;;  %1691 = vadd.xlane.f32.xlu1 %v1690_v0  ;;  %1598 = vadd.xlane.f32.xlu0 %v1597_v25  ;;  %v1693_v15 = vadd.f32 %v1648_v61, %v1647_v8  ;;  %v1649_v1 = vmul.f32 %v4524_v62, %v4524_v62  ;;  %v612_v0 = vld [vmem:[%s4467_s22 + $0x78] sm:$0xff]  ;;  %s3427_s22 = scalar_lea.vmem %s3426_s19, 32 }
 0x2a8   : > { %2125 = vmatprep.mubr.bf16.mxu0 %v5447_v57  ;;  %v620_v25 = vpack.c.bf16 %v612_v0, %v611_v22  ;;  %p3429_p1 = scmp.lt.s32.totalorder %s3427_s22, %s3421_s1 }
 0x2a9   : > { %v1600_v31 = vadd.f32 %v4527_v34, %v4524_v62  ;;  %v1650_v55 = vmul.f32 %v4527_v34, %v4527_v34 }
 0x2aa   : > { %p3430_p2 = por %p3429_p1, %p3428_p0 }
 0x2ab   : > { %1601 = vadd.xlane.f32.xlu1 %v1600_v31  ;;  %1694 = vadd.xlane.f32.xlu0 %v1693_v15  ;;  %v1696_v7 = vadd.f32 %v1650_v55, %v1649_v1 }
 0x2ac   : > { %p3431_p3 = pnand %p3430_p2, %p3424_p13 }
 0x2ae   : > { %3135 = vmatmul.mubr.msk.bf16.gmra.mxu0 %vm2031_vm2, %v616_v6 }
 0x2af   : > { %1697 = vadd.xlane.f32.xlu1 %v1696_v7  ;;  %2135 = vmatprep.mubr.bf16.mxu0 %v5447_v57 }
 0x2b6   : > { %3136 = vmatmul.mubr.msk.bf16.gmra.mxu0 %vm2031_vm2, %v617_v9 }
 0x2b7   : > { %2145 = vmatprep.mubr.bf16.mxu0 %v5447_v57 }
 0x2be   : > { %3137 = vmatmul.mubr.msk.bf16.gmra.mxu0 %vm2031_vm2, %v618_v29 }
 0x2bf   : > { %2155 = vmatprep.mubr.bf16.mxu0 %v5447_v57 }
 0x2c6   : > { %3138 = vmatmul.mubr.msk.bf16.gmra.mxu0 %vm2031_vm2, %v619_v53 }
 0x2c7   : > { %2165 = vmatprep.mubr.bf16.mxu0 %v5447_v57 }
 0x2ce   : > { %3139 = vmatmul.mubr.msk.bf16.gmra.mxu0 %vm2031_vm2, %v620_v25 }
 0x2f0   : > { %v1557_v61 = vpop.xlane.xlu0 %1556 }
 0x2f1   : > { %v1603_v2 = vmul.f32 0.00390625, %v1557_v61 }
 0x2f3   : > { %v1715_v8 = vmul.f32 %v1603_v2, %v1603_v2 }
 0x2f4   : > { %v1560_v41 = vpop.xlane.xlu1 %1559  ;;  %v1653_v38 = vpop.xlane.xlu0 %1652 }
 0x2f5   : > { %v4562_v40 = vmul.f32 0.00390625, %v1560_v41  ;;  %v1699_v31 = vmul.f32 0.00390625, %v1653_v38  ;;  %v1553_v41 = vld [vmem:[%s5409_s8] sm:$0x3] }
 0x2f7   : > { %v1731_v15 = vsub.f32 %v1699_v31, %v1715_v8  ;;  %v1716_v7 = vmul.f32 %v4562_v40, %v4562_v40  ;;  %v1554_v31 = vld [vmem:[%s5410_s9] sm:$0x3] }
 0x2f8   : > { %v1656_v55 = vpop.xlane.xlu1 %1655 }
 0x2f9   : > { %v1747_v1 = vmax.f32 %v1731_v15, 0.0  ;;  %v1700_v57 = vmul.f32 0.00390625, %v1656_v55  ;;  %v4583_v15 = vrot.slane %v1553_v41, %v3722_v45  ;;  %v1763_v55 = vsub.f32 %v4273_v18, %v1603_v2 }
 0x2fa   : > { %v1563_v63 = vpop.xlane.xlu0 %1562 }
 0x2fb   : > { %v1795_v24 = vadd.f32 1e-05, %v1747_v1  ;;  %v1732_v12 = vsub.f32 %v1700_v57, %v1716_v7  ;;  %v4566_v52 = vmul.f32 0.00390625, %v1563_v63  ;;  %v1764_v1 = vsub.f32 %v4276_v48, %v1603_v2 }
 0x2fc   : > { %v4598_v48 = vrot.slane %v1554_v31, %v3727_v47 }
 0x2fd   : > { %3357 = vrsqrt.f32 %v1795_v24  ;;  %v1748_v19 = vmax.f32 %v1732_v12, 0.0  ;;  %v1717_v21 = vmul.f32 %v4566_v52, %v4566_v52  ;;  %v4588_v24 = vrot.slane %v1553_v41, %v3727_v47 }
 0x2fe   : > { %v1566_v6 = vpop.xlane.xlu1 %1565  ;;  %v1659_v14 = vpop.xlane.xlu0 %1658 }
 0x2ff   : > { %v1796_v20 = vadd.f32 1e-05, %v1748_v19  ;;  %v4568_v9 = vmul.f32 0.00390625, %v1566_v6  ;;  %v1701_v37 = vmul.f32 0.00390625, %v1659_v14 }
 0x301   : > { %3359 = vrsqrt.f32 %v1796_v20  ;;  %v1733_v29 = vsub.f32 %v1701_v37, %v1717_v21  ;;  %v1718_v53 = vmul.f32 %v4568_v9, %v4568_v9  ;;  %v4595_v20 = vrot.slane %v1554_v31, %v3722_v45 }
 0x302   : > { %v1662_v3 = vpop.xlane.xlu1 %1661  ;;  %v1765_v37 = vsub.f32 %v4283_v58, %v4562_v40 }
 0x303   : > { %v1749_v60 = vmax.f32 %v1733_v29, 0.0  ;;  %v1702_v22 = vmul.f32 0.00390625, %v1662_v3  ;;  %v1766_v29 = vsub.f32 %v4286_v16, %v4562_v40 }
 0x305   : > { %v1797_v0 = vadd.f32 1e-05, %v1749_v60  ;;  %v1734_v25 = vsub.f32 %v1702_v22, %v1718_v53  ;;  %v1569_v61 = vpop.xlane.xlu0 %1568 }
 0x306   : > { %v4577_v38 = vmul.f32 0.00390625, %v1569_v61 }
 0x307   : > { %3361 = vrsqrt.f32 %v1797_v0  ;;  %v1750_v8 = vmax.f32 %v1734_v25, 0.0 }
 0x308   : > { %v1719_v6 = vmul.f32 %v4577_v38, %v4577_v38 }
 0x309   : > { %v1798_v7 = vadd.f32 1e-05, %v1750_v8  ;;  %v1572_v57 = vpop.xlane.xlu1 %1571  ;;  %v1665_v63 = vpop.xlane.xlu0 %1664 }
 0x30a   : > { %v3358_v12 = vpop.eup %3357  ;;  %v4590_v19 = vmul.f32 0.00390625, %v1572_v57  ;;  %v1703_v14 = vmul.f32 0.00390625, %v1665_v63  ;;  %v1767_v63 = vsub.f32 %v4297_v35, %v4566_v52 }
 0x30b   : > { %v1827_v21 = vmul.f32 %v3358_v12, %v1763_v55  ;;  %3363 = vrsqrt.f32 %v1798_v7  ;;  %v1828_v18 = vmul.f32 %v3358_v12, %v1764_v1  ;;  %v1768_v12 = vsub.f32 %v4300_v10, %v4566_v52 }
 0x30c   : > { %v1735_v2 = vsub.f32 %v1703_v14, %v1719_v6  ;;  %v1720_v25 = vmul.f32 %v4590_v19, %v4590_v19 }
 0x30d   : > { %v1668_v3 = vpop.xlane.xlu1 %1667  ;;  %v1871_v60 = vmul.f32 %v4588_v24, %v1828_v18  ;;  %v1870_v53 = vmul.f32 %v4583_v15, %v1827_v21 }
 0x30e   : > { %v3360_v22 = vpop.eup %3359  ;;  %v1751_v0 = vmax.f32 %v1735_v2, 0.0  ;;  %v1704_v61 = vmul.f32 0.00390625, %v1668_v3 }
 0x30f   : > { %v1829_v41 = vmul.f32 %v3360_v22, %v1765_v37  ;;  %v1830_v31 = vmul.f32 %v3360_v22, %v1766_v29  ;;  %v1914_v55 = vadd.f32 %v4598_v48, %v1871_v60  ;;  %v1913_v58 = vadd.f32 %v4595_v20, %v1870_v53 }
 0x310   : > { %v1575_v8 = vpop.xlane.xlu0 %1574  ;;  %v1799_v1 = vadd.f32 1e-05, %v1751_v0  ;;  %v1736_v16 = vsub.f32 %v1704_v61, %v1720_v25  ;;  %v1769_v61 = vsub.f32 %v4307_v39, %v4568_v9 }
 0x311   : > { %v4610_v40 = vmul.f32 0.00390625, %v1575_v8  ;;  %v1873_v7 = vmul.f32 %v4588_v24, %v1830_v31  ;;  %v1872_v57 = vmul.f32 %v4583_v15, %v1829_v41  ;;  %v1946_v2 = vmax.f32 %v1914_v55, 0.0 }
 0x312   : > { %3365 = vrsqrt.f32 %v1799_v1  ;;  %v1752_v6 = vmax.f32 %v1736_v16, 0.0  ;;  %v1945_v29 = vmax.f32 %v1913_v58, 0.0  ;;  %v1770_v8 = vsub.f32 %v4310_v54, %v4568_v9 }
 0x313   : > { %v1916_v18 = vadd.f32 %v4598_v48, %v1873_v7  ;;  %v1915_v37 = vadd.f32 %v4595_v20, %v1872_v57  ;;  %v1721_v35 = vmul.f32 %v4610_v40, %v4610_v40 }
 0x314   : > { %v1578_v14 = vpop.xlane.xlu1 %1577  ;;  %v1671_v21 = vpop.xlane.xlu0 %1670  ;;  %v1800_v60 = vadd.f32 1e-05, %v1752_v6 }
 0x315   : > { %v3362_v3 = vpop.eup %3361  ;;  %v4620_v53 = vmul.f32 0.00390625, %v1578_v14  ;;  %v1705_v22 = vmul.f32 0.00390625, %v1671_v21  ;;  %v1948_v0 = vmax.f32 %v1916_v18, 0.0  ;;  %v1947_v10 = vmax.f32 %v1915_v37, 0.0 }
 0x316   : > { %v1832_v52 = vmul.f32 %v3362_v3, %v1768_v12  ;;  %v1831_v25 = vmul.f32 %v3362_v3, %v1767_v63  ;;  %3367 = vrsqrt.f32 %v1800_v60 }
 0x317   : > { %v1737_v41 = vsub.f32 %v1705_v22, %v1721_v35  ;;  %v1978_v58 = vpack.c.bf16 %v1948_v0, %v1946_v2  ;;  %v1977_v1 = vpack.c.bf16 %v1947_v10, %v1945_v29  ;;  %v1722_v12 = vmul.f32 %v4620_v53, %v4620_v53 }
 0x318   : > { %v1674_v31 = vpop.xlane.xlu1 %1673  ;;  %v1581_v55 = vpop.xlane.xlu0 %1580  ;;  %v1875_v16 = vmul.f32 %v4588_v24, %v1832_v52  ;;  %v1874_v21 = vmul.f32 %v4583_v15, %v1831_v25  ;;  %v1771_v10 = vsub.f32 %v4327_v17, %v4577_v38 }
 0x319   : > { %v3364_v7 = vpop.eup %3363  ;;  %v1753_v57 = vmax.f32 %v1737_v41, 0.0  ;;  %v1706_v63 = vmul.f32 0.00390625, %v1674_v31  ;;  %v4631_v6 = vmul.f32 0.00390625, %v1581_v55  ;;  %2368 = vmatprep.mubr.bf16.mxu1 %v1978_v58  ;;  %v1772_v41 = vsub.f32 %v4330_v4, %v4577_v38 }
 0x31a   : > { %v1834_v39 = vmul.f32 %v3364_v7, %v1770_v8  ;;  %v1833_v14 = vmul.f32 %v3364_v7, %v1769_v61  ;;  %2369 = vmatmul.mubr.bf16.vlgmr.msra.gmra.mxu1 %v1977_v1  ;;  %v1918_v18 = vadd.f32 %v4598_v48, %v1875_v16  ;;  %v1917_v25 = vadd.f32 %v4595_v20, %v1874_v21 }
 0x31b   : > { %v1801_v54 = vadd.f32 1e-05, %v1753_v57  ;;  %v1738_v9 = vsub.f32 %v1706_v63, %v1722_v12  ;;  %v1723_v37 = vmul.f32 %v4631_v6, %v4631_v6 }
 0x31c   : > { %v1584_v2 = vpop.xlane.xlu1 %1583  ;;  %v1677_v29 = vpop.xlane.xlu0 %1676  ;;  %v1877_v3 = vmul.f32 %v4588_v24, %v1834_v39  ;;  %v1876_v60 = vmul.f32 %v4583_v15, %v1833_v14  ;;  %v1950_v55 = vmax.f32 %v1918_v18, 0.0  ;;  %v1949_v17 = vmax.f32 %v1917_v25, 0.0 }
 0x31d   : > { %3369 = vrsqrt.f32 %v1801_v54  ;;  %v1754_v35 = vmax.f32 %v1738_v9, 0.0  ;;  %v4639_v22 = vmul.f32 0.00390625, %v1584_v2  ;;  %v1707_v0 = vmul.f32 0.00390625, %v1677_v29 }
 0x31e   : > { %v1920_v52 = vadd.f32 %v4598_v48, %v1877_v3  ;;  %v1919_v61 = vadd.f32 %v4595_v20, %v1876_v60  ;;  %v1773_v9 = vsub.f32 %v4337_v49, %v4590_v19  ;;  %v1774_v29 = vsub.f32 %v4340_v36, %v4590_v19 }
 0x31f   : > { %v1802_v8 = vadd.f32 1e-05, %v1754_v35  ;;  %v1739_v31 = vsub.f32 %v1707_v0, %v1723_v37  ;;  %v3366_v58 = vpop.eup %3365  ;;  %v1724_v1 = vmul.f32 %v4639_v22, %v4639_v22  ;;  %v1775_v3 = vsub.f32 %v4360_v30, %v4610_v40 }
 0x320   : > { %v1680_v16 = vpop.xlane.xlu1 %1679  ;;  %v1587_v7 = vpop.xlane.xlu0 %1586  ;;  %v1952_v57 = vmax.f32 %v1920_v52, 0.0  ;;  %v1951_v12 = vmax.f32 %v1919_v61, 0.0  ;;  %v1836_v4 = vmul.f32 %v3366_v58, %v1772_v41  ;;  %v1835_v38 = vmul.f32 %v3366_v58, %v1771_v10 }
 0x321   : > { %3371 = vrsqrt.f32 %v1802_v8  ;;  %v1755_v63 = vmax.f32 %v1739_v31, 0.0  ;;  %v1708_v39 = vmul.f32 0.00390625, %v1680_v16  ;;  %v4650_v14 = vmul.f32 0.00390625, %v1587_v7 }
 0x322   : > { %v1980_v21 = vpack.c.bf16 %v1952_v57, %v1950_v55  ;;  %v1979_v54 = vpack.c.bf16 %v1951_v12, %v1949_v17  ;;  %v1879_v0 = vmul.f32 %v4588_v24, %v1836_v4  ;;  %v1878_v52 = vmul.f32 %v4583_v15, %v1835_v38 }
 0x323   : > { %v1803_v18 = vadd.f32 1e-05, %v1755_v63  ;;  %v1740_v2 = vsub.f32 %v1708_v39, %v1724_v1  ;;  %v3368_v37 = vpop.eup %3367  ;;  %v1725_v49 = vmul.f32 %v4650_v14, %v4650_v14  ;;  %v1776_v36 = vsub.f32 %v4363_v46, %v4610_v40 }
 0x324   : > { %v1590_v60 = vpop.xlane.xlu1 %1589  ;;  %v1683_v35 = vpop.xlane.xlu0 %1682  ;;  %2378 = vmatprep.mubr.bf16.mxu1 %v1980_v21  ;;  %v1838_v30 = vmul.f32 %v3368_v37, %v1774_v29  ;;  %v1837_v19 = vmul.f32 %v3368_v37, %v1773_v9  ;;  %v1922_v31 = vadd.f32 %v4598_v48, %v1879_v0  ;;  %v1921_v55 = vadd.f32 %v4595_v20, %v1878_v52 }
 0x325   : > { %v1756_v10 = vmax.f32 %v1740_v2, 0.0  ;;  %v4660_v25 = vmul.f32 0.00390625, %v1590_v60  ;;  %v1709_v61 = vmul.f32 0.00390625, %v1683_v35  ;;  %2379 = vmatmul.mubr.bf16.gmra.mxu1 %v1979_v54  ;;  %3373 = vrsqrt.f32 %v1803_v18 }
 0x326   : > { %v1777_v58 = vsub.f32 %v4376_v23, %v4620_v53  ;;  %v1881_v57 = vmul.f32 %v4588_v24, %v1838_v30  ;;  %v1880_v46 = vmul.f32 %v4583_v15, %v1837_v19  ;;  %v1778_v39 = vsub.f32 %v4379_v28, %v4620_v53 }
 0x327   : > { %v1804_v41 = vadd.f32 1e-05, %v1756_v10  ;;  %v1741_v8 = vsub.f32 %v1709_v61, %v1725_v49  ;;  %v1726_v1 = vmul.f32 %v4660_v25, %v4660_v25  ;;  %v1779_v23 = vsub.f32 %v4394_v56, %v4631_v6 }
 0x328   : > { %v1686_v16 = vpop.xlane.xlu1 %1685  ;;  %v1593_v7 = vpop.xlane.xlu0 %1592  ;;  %v1924_v21 = vadd.f32 %v4598_v48, %v1881_v57  ;;  %v1923_v54 = vadd.f32 %v4595_v20, %v1880_v46  ;;  %v1954_v9 = vmax.f32 %v1922_v31, 0.0  ;;  %v1953_v18 = vmax.f32 %v1921_v55, 0.0 }
 0x329   : > { %3375 = vrsqrt.f32 %v1804_v41  ;;  %v1757_v40 = vmax.f32 %v1741_v8, 0.0  ;;  %v1710_v17 = vmul.f32 0.00390625, %v1686_v16  ;;  %v4674_v12 = vmul.f32 0.00390625, %v1593_v7 }
 0x32a   : > { %v3370_v63 = vpop.eup %3369  ;;  %v1956_v60 = vmax.f32 %v1924_v21, 0.0  ;;  %v1955_v35 = vmax.f32 %v1923_v54, 0.0  ;;  %v1780_v41 = vsub.f32 %v4397_v43, %v4631_v6  ;;  %v1781_v8 = vsub.f32 %v4412_v26, %v4639_v22 }
 0x32b   : > { %v1805_v4 = vadd.f32 1e-05, %v1757_v40  ;;  %v1742_v38 = vsub.f32 %v1710_v17, %v1726_v1  ;;  %v1727_v37 = vmul.f32 %v4674_v12, %v4674_v12  ;;  %v1840_v0 = vmul.f32 %v3370_v63, %v1776_v36 }
 0x32c   : > { %v1596_v2 = vpop.xlane.xlu1 %1595  ;;  %v1689_v29 = vpop.xlane.xlu0 %1688  ;;  %v1982_v49 = vpack.c.bf16 %v1956_v60, %v1954_v9  ;;  %v1981_v61 = vpack.c.bf16 %v1955_v35, %v1953_v18  ;;  %v1839_v19 = vmul.f32 %v3370_v63, %v1775_v3  ;;  %v1782_v43 = vsub.f32 %v4415_v13, %v4639_v22 }
 0x32d   : > { %3377 = vrsqrt.f32 %v1805_v4  ;;  %v1758_v28 = vmax.f32 %v1742_v38, 0.0  ;;  %v4684_v53 = vmul.f32 0.00390625, %v1596_v2  ;;  %v1711_v52 = vmul.f32 0.00390625, %v1689_v29 }
 0x32e   : > { %v3372_v10 = vpop.eup %3371  ;;  %v1883_v30 = vmul.f32 %v4588_v24, %v1840_v0  ;;  %2388 = vmatprep.mubr.bf16.mxu1 %v1982_v49  ;;  %v1882_v63 = vmul.f32 %v4583_v15, %v1839_v19  ;;  %v1784_v49 = vsub.f32 %v4433_v51, %v4650_v14  ;;  %v1786_v51 = vsub.f32 %v4451_v50, %v4660_v25 }
 0x32f   : > { %v1806_v31 = vadd.f32 1e-05, %v1758_v28  ;;  %v1743_v55 = vsub.f32 %v1711_v52, %v1727_v37  ;;  %v1728_v36 = vmul.f32 %v4684_v53, %v4684_v53  ;;  %v1842_v7 = vmul.f32 %v3372_v10, %v1778_v39  ;;  %2389 = vmatmul.mubr.bf16.gmra.mxu1 %v1981_v61 }
 0x330   : > { %v1692_v1 = vpop.xlane.xlu1 %1691  ;;  %v1599_v16 = vpop.xlane.xlu0 %1598  ;;  %v1926_v57 = vadd.f32 %v4598_v48, %v1883_v30  ;;  %v1841_v46 = vmul.f32 %v3372_v10, %v1777_v58  ;;  %v1783_v39 = vsub.f32 %v4430_v59, %v4650_v14  ;;  %v1925_v22 = vadd.f32 %v4595_v20, %v1882_v63 }
 0x331   : > { %3379 = vrsqrt.f32 %v1806_v31  ;;  %v1759_v3 = vmax.f32 %v1743_v55, 0.0  ;;  %v1712_v40 = vmul.f32 0.00390625, %v1692_v1  ;;  %v4694_v17 = vmul.f32 0.00390625, %v1599_v16 }
 0x332   : > { %v1885_v26 = vmul.f32 %v4588_v24, %v1842_v7  ;;  %v1884_v21 = vmul.f32 %v4583_v15, %v1841_v46  ;;  %v3374_v54 = vpop.eup %3373  ;;  %v1958_v38 = vmax.f32 %v1926_v57, 0.0  ;;  %v1957_v28 = vmax.f32 %v1925_v22, 0.0 }
 0x333   : > { %v1807_v58 = vadd.f32 1e-05, %v1759_v3  ;;  %v1744_v4 = vsub.f32 %v1712_v40, %v1728_v36  ;;  %v1729_v18 = vmul.f32 %v4694_v17, %v4694_v17  ;;  %v1844_v10 = vmul.f32 %v3374_v54, %v1780_v41 }
 0x334   : > { %v1602_v9 = vpop.xlane.xlu1 %1601  ;;  %v1695_v2 = vpop.xlane.xlu0 %1694  ;;  %v1928_v13 = vadd.f32 %v4598_v48, %v1885_v26  ;;  %v1927_v37 = vadd.f32 %v4595_v20, %v1884_v21  ;;  %v1785_v61 = vsub.f32 %v4448_v27, %v4660_v25  ;;  %v1843_v14 = vmul.f32 %v3374_v54, %v1779_v23 }
 0x335   : > { %3381 = vrsqrt.f32 %v1807_v58  ;;  %v1760_v29 = vmax.f32 %v1744_v4, 0.0  ;;  %v4708_v60 = vmul.f32 0.00390625, %v1602_v9  ;;  %v1713_v35 = vmul.f32 0.00390625, %v1695_v2 }
 0x336   : > { %v3376_v59 = vpop.eup %3375  ;;  %v1960_v0 = vmax.f32 %v1928_v13, 0.0  ;;  %v1959_v52 = vmax.f32 %v1927_v37, 0.0  ;;  %v1887_v41 = vmul.f32 %v4588_v24, %v1844_v10  ;;  %v1886_v58 = vmul.f32 %v4583_v15, %v1843_v14 }
 0x337   : > { %v1808_v30 = vadd.f32 1e-05, %v1760_v29  ;;  %v1745_v19 = vsub.f32 %v1713_v35, %v1729_v18  ;;  %v1730_v31 = vmul.f32 %v4708_v60, %v4708_v60  ;;  %v1846_v16 = vmul.f32 %v3376_v59, %v1782_v43 }
 0x338   : > { %v1698_v55 = vpop.xlane.xlu1 %1697  ;;  %v1984_v36 = vpack.c.bf16 %v1960_v0, %v1958_v38  ;;  %v1983_v1 = vpack.c.bf16 %v1959_v52, %v1957_v28  ;;  %v1845_v3 = vmul.f32 %v3376_v59, %v1781_v8  ;;  %v1930_v43 = vadd.f32 %v4598_v48, %v1887_v41 }
 0x339   : > { %3383 = vrsqrt.f32 %v1808_v30  ;;  %v1761_v7 = vmax.f32 %v1745_v19, 0.0  ;;  %v1714_v57 = vmul.f32 0.00390625, %v1698_v55  ;;  %v1889_v27 = vmul.f32 %v4588_v24, %v1846_v16 }
 0x33a   : > { %v3378_v46 = vpop.eup %3377  ;;  %2398 = vmatprep.mubr.bf16.mxu1 %v1984_v36  ;;  %v1888_v50 = vmul.f32 %v4583_v15, %v1845_v3  ;;  %v1962_v38 = vmax.f32 %v1930_v43, 0.0  ;;  %v1929_v8 = vadd.f32 %v4595_v20, %v1886_v58  ;;  %v1787_v18 = vsub.f32 %v4473_v42, %v4674_v12 }
 0x33b   : > { %v1809_v40 = vadd.f32 1e-05, %v1761_v7  ;;  %v1746_v26 = vsub.f32 %v1714_v57, %v1730_v31  ;;  %2399 = vmatmul.mubr.bf16.gmra.mxu1 %v1983_v1  ;;  %v1848_v63 = vmul.f32 %v3378_v46, %v1784_v49  ;;  %v1932_v21 = vadd.f32 %v4598_v48, %v1889_v27 }
 0x33c   : > { %v1847_v25 = vmul.f32 %v3378_v46, %v1783_v39  ;;  %v1931_v54 = vadd.f32 %v4595_v20, %v1888_v50  ;;  %v1788_v39 = vsub.f32 %v4476_v32, %v4674_v12  ;;  %v1961_v29 = vmax.f32 %v1929_v8, 0.0 }
 0x33d   : > { %3385 = vrsqrt.f32 %v1809_v40  ;;  %v1762_v4 = vmax.f32 %v1746_v26, 0.0  ;;  %v1891_v56 = vmul.f32 %v4588_v24, %v1848_v63  ;;  %v1964_v23 = vmax.f32 %v1932_v21, 0.0 }
 0x33e   : > { %v3380_v6 = vpop.eup %3379  ;;  %v1890_v9 = vmul.f32 %v4583_v15, %v1847_v25  ;;  %v1963_v35 = vmax.f32 %v1931_v54, 0.0  ;;  %v1790_v30 = vsub.f32 %v4496_v44, %v4684_v53  ;;  %v1789_v16 = vsub.f32 %v4493_v5, %v4684_v53 }
 0x33f   : > { %v1810_v2 = vadd.f32 1e-05, %v1762_v4  ;;  %v1850_v13 = vmul.f32 %v3380_v6, %v1786_v51  ;;  %v1849_v22 = vmul.f32 %v3380_v6, %v1785_v61  ;;  %v1986_v37 = vpack.c.bf16 %v1964_v23, %v1962_v38 }
 0x340   : > { %v1934_v0 = vadd.f32 %v4598_v48, %v1891_v56  ;;  %v1985_v10 = vpack.c.bf16 %v1963_v35, %v1961_v29  ;;  %v1933_v42 = vadd.f32 %v4595_v20, %v1890_v9  ;;  %v1791_v44 = vsub.f32 %v4510_v33, %v4694_v17 }
 0x341   : > { %3387 = vrsqrt.f32 %v1810_v2  ;;  %v1893_v59 = vmul.f32 %v4588_v24, %v1850_v13  ;;  %v1892_v28 = vmul.f32 %v4583_v15, %v1849_v22  ;;  %2408 = vmatprep.mubr.bf16.mxu1 %v1986_v37  ;;  %v1792_v14 = vsub.f32 %v4513_v11, %v4694_v17 }
 0x342   : > { %v3382_v52 = vpop.eup %3381  ;;  %v1966_v19 = vmax.f32 %v1934_v0, 0.0  ;;  %v1965_v7 = vmax.f32 %v1933_v42, 0.0  ;;  %v1793_v33 = vsub.f32 %v4524_v62, %v4708_v60  ;;  %v1794_v17 = vsub.f32 %v4527_v34, %v4708_v60 }
 0x343   : > { %v1936_v49 = vadd.f32 %v4598_v48, %v1893_v59  ;;  %v1935_v61 = vadd.f32 %v4595_v20, %v1892_v28  ;;  %v1852_v32 = vmul.f32 %v3382_v52, %v1788_v39  ;;  %v1851_v12 = vmul.f32 %v3382_v52, %v1787_v18  ;;  %2409 = vmatmul.mubr.bf16.gmra.mxu1 %v1985_v10 }
 0x345   : > { %v1968_v31 = vmax.f32 %v1936_v49, 0.0  ;;  %v1967_v55 = vmax.f32 %v1935_v61, 0.0  ;;  %v1895_v36 = vmul.f32 %v4588_v24, %v1852_v32  ;;  %v1894_v57 = vmul.f32 %v4583_v15, %v1851_v12 }
 0x346   : > { %v3384_v1 = vpop.eup %3383 }
 0x347   : > { %v1988_v41 = vpack.c.bf16 %v1968_v31, %v1966_v19  ;;  %v1854_v46 = vmul.f32 %v3384_v1, %v1790_v30  ;;  %v1987_v51 = vpack.c.bf16 %v1967_v55, %v1965_v7  ;;  %v1853_v27 = vmul.f32 %v3384_v1, %v1789_v16 }
 0x348   : > { %v1938_v40 = vadd.f32 %v4598_v48, %v1895_v36  ;;  %v1937_v53 = vadd.f32 %v4595_v20, %v1894_v57 }
 0x349   : > { %2418 = vmatprep.mubr.bf16.mxu1 %v1988_v41  ;;  %v1897_v3 = vmul.f32 %v4588_v24, %v1854_v46  ;;  %v1896_v5 = vmul.f32 %v4583_v15, %v1853_v27 }
 0x34a   : > { %v3386_v26 = vpop.eup %3385  ;;  %v1970_v58 = vmax.f32 %v1938_v40, 0.0  ;;  %v1969_v38 = vmax.f32 %v1937_v53, 0.0 }
 0x34b   : > { %v1940_v43 = vadd.f32 %v4598_v48, %v1897_v3  ;;  %v1856_v63 = vmul.f32 %v3386_v26, %v1792_v14  ;;  %v1855_v21 = vmul.f32 %v3386_v26, %v1791_v44  ;;  %2419 = vmatmul.mubr.bf16.gmra.mxu1 %v1987_v51  ;;  %v1939_v11 = vadd.f32 %v4595_v20, %v1896_v5 }
 0x34d   : > { %v1972_v50 = vmax.f32 %v1940_v43, 0.0  ;;  %v1899_v25 = vmul.f32 %v4588_v24, %v1856_v63  ;;  %v1971_v56 = vmax.f32 %v1939_v11, 0.0  ;;  %v1898_v6 = vmul.f32 %v4583_v15, %v1855_v21 }
 0x34e   : > { %v3388_v4 = vpop.eup %3387 }
 0x34f   : > { %v1990_v23 = vpack.c.bf16 %v1972_v50, %v1970_v58  ;;  %v1858_v8 = vmul.f32 %v3388_v4, %v1794_v17  ;;  %v1942_v54 = vadd.f32 %v4598_v48, %v1899_v25  ;;  %v1857_v62 = vmul.f32 %v3388_v4, %v1793_v33 }
 0x350   : > { %v1989_v9 = vpack.c.bf16 %v1971_v56, %v1969_v38  ;;  %v1941_v60 = vadd.f32 %v4595_v20, %v1898_v6 }
 0x351   : > { %2428 = vmatprep.mubr.bf16.mxu1 %v1990_v23  ;;  %v1901_v18 = vmul.f32 %v4588_v24, %v1858_v8  ;;  %v1900_v34 = vmul.f32 %v4583_v15, %v1857_v62  ;;  %v1974_v22 = vmax.f32 %v1942_v54, 0.0 }
 0x352   : > { %v1973_v29 = vmax.f32 %v1941_v60, 0.0  ;;  %v4769_v0 = vpop.f32.mrf.mxu0 }
 0x353   : > { %v1944_v2 = vadd.f32 %v4598_v48, %v1901_v18  ;;  %v1943_v13 = vadd.f32 %v4595_v20, %v1900_v34  ;;  %2429 = vmatmul.mubr.bf16.gmra.mxu1 %v1989_v9  ;;  %5448 = vst [vmem:[#allocation11_spill] sm:$0xff] %v4769_v0 }
 0x354   : > { %v4771_v24 = vpop.f32.mrf.mxu0 }
 0x355   : > { %v1976_v39 = vmax.f32 %v1944_v2, 0.0  ;;  %v1975_v37 = vmax.f32 %v1943_v13, 0.0  ;;  %5449 = vst [vmem:[#allocation12_spill] sm:$0xff] %v4771_v24 }
 0x356   : > { %v4773_v15 = vpop.f32.mrf.mxu0 }
 0x357   : > { %v1992_v35 = vpack.c.bf16 %v1976_v39, %v1974_v22  ;;  %v1991_v59 = vpack.c.bf16 %v1975_v37, %v1973_v29  ;;  %5450 = vst [vmem:[#allocation13_spill] sm:$0xff] %v4773_v15 }
 0x358   : > { %v4775_v28 = vpop.f32.mrf.mxu0 }
 0x359   : > { %2438 = vmatprep.mubr.bf16.mxu1 %v1992_v35  ;;  %5451 = vst [vmem:[#allocation14_spill] sm:$0xff] %v4775_v28  ;;  %v2449_v35 = vld [vmem:[%s5413_s12] sm:$0x3] }
 0x35b   : > { %2439 = vmatmul.mubr.bf16.gmra.mxu1 %v1991_v59 }
 0x35e   : > { %v4777_v48 = vpop.f32.mrf.mxu0 }
 0x360   : > { %v4779_v20 = vpop.f32.mrf.mxu0 }
 0x362   : > { %v4781_v52 = vpop.f32.mrf.mxu0 }
 0x364   : > { %v4783_v10 = vpop.f32.mrf.mxu0 }
 0x366   : > { %v4785_v42 = vpop.f32.mrf.mxu0 }
 0x368   : > { %v4787_v49 = vpop.f32.mrf.mxu0 }
 0x36a   : > { %v4789_v61 = vpop.f32.mrf.mxu0 }
 0x36c   : > { %v4791_v32 = vpop.f32.mrf.mxu0 }
 0x36e   : > { %v4793_v12 = vpop.f32.mrf.mxu0 }
 0x370   : > { %v2129_v30 = vpop.f32.mrf.mxu0 }
 0x372   : > { %v4799_v55 = vpop.f32.mrf.mxu0 }
 0x374   : > { %v2133_v1 = vpop.f32.mrf.mxu0 }
 0x376   : > { %v4807_v57 = vpop.f32.mrf.mxu0 }
 0x378   : > { %v4813_v51 = vpop.f32.mrf.mxu0 }
 0x37a   : > { %v4817_v44 = vpop.f32.mrf.mxu0 }
 0x37c   : > { %v4821_v3 = vpop.f32.mrf.mxu0 }
 0x37e   : > { %v4827_v5 = vpop.f32.mrf.mxu0 }
 0x380   : > { %v2149_v43 = vpop.f32.mrf.mxu0 }
 0x382   : > { %v4835_v11 = vpop.f32.mrf.mxu0 }
 0x384   : > { %v4841_v25 = vpop.f32.mrf.mxu0 }
 0x386   : > { %v2157_v56 = vpop.f32.mrf.mxu0 }
 0x388   : > { %v2159_v8 = vpop.f32.mrf.mxu0 }
 0x38a   : > { %v2161_v9 = vpop.f32.mrf.mxu0 }
 0x38c   : > { %v2163_v60 = vpop.f32.mrf.mxu0 }
 0x38e   : > { %v2167_v13 = vpop.f32.mrf.mxu0 }
 0x390   : > { %v2169_v37 = vpop.f32.mrf.mxu0 }
 0x3da   : > { %v4795_v19 = vpop.f32.mrf.mxu1 }
 0x3db   : > { %5452 = vst [vmem:[#allocation15_spill] sm:$0xff] %v4795_v19 }
 0x3dc   : > { %v4797_v31 = vpop.f32.mrf.mxu1 }
 0x3dd   : > { %5453 = vst [vmem:[#allocation16_spill] sm:$0xff] %v4797_v31 }
 0x3de   : > { %v4801_v36 = vpop.f32.mrf.mxu1 }
 0x3df   : > { %5454 = vst [vmem:[#allocation17_spill] sm:$0xff] %v4801_v36  ;;  %v4858_v36 = vrot.slane %v2449_v35, %v3727_v47 }
 0x3e0   : > { %v4803_v16 = vpop.f32.mrf.mxu1 }
 0x3e1   : > { %5455 = vst [vmem:[#allocation18_spill] sm:$0xff] %v4803_v16 }
 0x3e5   : > { %v4805_v7 = vpop.f32.mrf.mxu1 }
 0x3e7   : > { %v4809_v41 = vpop.f32.mrf.mxu1 }
 0x3e9   : > { %v4811_v46 = vpop.f32.mrf.mxu1 }
 0x3eb   : > { %v4815_v27 = vpop.f32.mrf.mxu1 }
 0x3ef   : > { %v4819_v14 = vpop.f32.mrf.mxu1 }
 0x3f1   : > { %v4823_v40 = vpop.f32.mrf.mxu1 }
 0x3f3   : > { %v4825_v26 = vpop.f32.mrf.mxu1 }
 0x3f5   : > { %v4829_v53 = vpop.f32.mrf.mxu1 }
 0x3fb   : > { %v4831_v63 = vpop.f32.mrf.mxu1 }
 0x3fd   : > { %v2402_v21 = vpop.f32.mrf.mxu1 }
 0x3fe   : > { %v4833_v33 = vadd.f32 %v2402_v21, %v2129_v30 }
 0x3ff   : > { %v4837_v17 = vpop.f32.mrf.mxu1 }
 0x401   : > { %v2406_v58 = vpop.f32.mrf.mxu1 }
 0x402   : > { %v4839_v50 = vadd.f32 %v2406_v58, %v2133_v1  ;;  %v2171_v1 = vpop.f32.mrf.mxu0  ;;  %v4855_v58 = vrot.slane %v2449_v35, %v3722_v45 }
 0x403   : > { %v4843_v4 = vpop.f32.mrf.mxu1 }
 0x404   : > { %v2173_v24 = vpop.f32.mrf.mxu0 }
 0x405   : > { %v4845_v38 = vpop.f32.mrf.mxu1 }
 0x407   : > { %v4847_v6 = vpop.f32.mrf.mxu1 }
 0x409   : > { %v4849_v23 = vpop.f32.mrf.mxu1 }
 0x40b   : > { %v2420_v54 = vpop.f32.mrf.mxu1 }
 0x40d   : > { %v2422_v62 = vpop.f32.mrf.mxu1 }
 0x40f   : > { %v2424_v18 = vpop.f32.mrf.mxu1 }
 0x411   : > { %v2426_v34 = vpop.f32.mrf.mxu1 }
 0x413   : > { %v2430_v2 = vpop.f32.mrf.mxu1 }
 0x414   : > { %v2431_v47 = vadd.f32 %v2430_v2, %v2157_v56 }
 0x415   : > { %v2432_v22 = vpop.f32.mrf.mxu1 }
 0x416   : > { %v2433_v31 = vadd.f32 %v2432_v22, %v2159_v8 }
 0x417   : > { %v2434_v39 = vpop.f32.mrf.mxu1 }
 0x418   : > { %v2435_v2 = vadd.f32 %v2434_v39, %v2161_v9  ;;  %v2427_v39 = vadd.f32 %v2426_v34, %v4841_v25  ;;  %v2413_v25 = vadd.f32 %v4845_v38, %v4813_v51 }
 0x419   : > { %v2436_v29 = vpop.f32.mrf.mxu1 }
 0x41a   : > { %v4899_v9 = vadd.f32 %v4855_v58, %v2435_v2  ;;  %v4920_v34 = vadd.f32 %v4858_v36, %v2427_v39  ;;  %v4934_v38 = vadd.f32 %v4858_v36, %v2413_v25 }
 0x41b   : > { %v2440_v59 = vpop.f32.mrf.mxu1 }
 0x41c   : > { %v2441_v30 = vadd.f32 %v2440_v59, %v2167_v13 }
 0x41d   : > { %v2442_v21 = vpop.f32.mrf.mxu1 }
 0x41e   : > { %v2443_v15 = vadd.f32 %v2442_v21, %v2169_v37  ;;  %v4861_v28 = vadd.f32 %v4855_v58, %v2441_v30 }
 0x41f   : > { %v2444_v16 = vpop.f32.mrf.mxu1 }
 0x420   : > { %v4864_v19 = vadd.f32 %v4858_v36, %v2443_v15  ;;  %v2445_v0 = vadd.f32 %v2444_v16, %v2171_v1  ;;  %v2587_v15 = vmul.f32 %v4861_v28, %v4861_v28  ;;  %v4879_v16 = vadd.f32 %v4858_v36, %v2433_v31 }
 0x421   : > { %v2446_v13 = vpop.f32.mrf.mxu1  ;;  %v2423_v1 = vadd.f32 %v2422_v62, %v2149_v43 }
 0x422   : > { %v2447_v59 = vadd.f32 %v2446_v13, %v2173_v24  ;;  %v2537_v45 = vadd.f32 %v4864_v19, %v4861_v28  ;;  %v2588_v35 = vmul.f32 %v4864_v19, %v4864_v19  ;;  %v4871_v37 = vadd.f32 %v4855_v58, %v2445_v0 }
 0x423   : > { %v2437_v24 = vadd.f32 %v2436_v29, %v2163_v60  ;;  %v4886_v0 = vadd.f32 %v4855_v58, %v2431_v47  ;;  %v2584_v21 = vmul.f32 %v4879_v16, %v4879_v16  ;;  %v2421_v47 = vadd.f32 %v2420_v54, %v4827_v5 }
 0x424   : > { %v4874_v30 = vadd.f32 %v4858_v36, %v2447_v59  ;;  %2538 = vadd.xlane.f32.xlu0 %v2537_v45  ;;  %v2633_v22 = vadd.f32 %v2588_v35, %v2587_v15  ;;  %v2589_v45 = vmul.f32 %v4871_v37, %v4871_v37  ;;  %v4904_v62 = vadd.f32 %v4858_v36, %v2423_v1 }
 0x425   : > { %v4891_v31 = vadd.f32 %v4858_v36, %v2437_v24  ;;  %v2531_v29 = vadd.f32 %v4879_v16, %v4886_v0  ;;  %v2583_v43 = vmul.f32 %v4886_v0, %v4886_v0  ;;  %v4912_v54 = vadd.f32 %v4855_v58, %v2421_v47 }
 0x426   : > { %v2540_v8 = vadd.f32 %v4874_v30, %v4871_v37  ;;  %v2590_v56 = vmul.f32 %v4874_v30, %v4874_v30  ;;  %v2425_v35 = vadd.f32 %v2424_v18, %v4835_v11  ;;  %v2585_v15 = vmul.f32 %v4899_v9, %v4899_v9 }
 0x427   : > { %v2534_v13 = vadd.f32 %v4891_v31, %v4899_v9  ;;  %v2627_v59 = vadd.f32 %v2584_v21, %v2583_v43  ;;  %v2586_v5 = vmul.f32 %v4891_v31, %v4891_v31  ;;  %v2411_v11 = vadd.f32 %v4843_v4, %v4807_v57 }
 0x428   : > { %2541 = vadd.xlane.f32.xlu1 %v2540_v8  ;;  %2634 = vadd.xlane.f32.xlu0 %v2633_v22  ;;  %v2636_v60 = vadd.f32 %v2590_v56, %v2589_v45  ;;  %v2525_v8 = vadd.f32 %v4904_v62, %v4912_v54  ;;  %v2580_v22 = vmul.f32 %v4904_v62, %v4904_v62 }
 0x429   : > { %v2630_v24 = vadd.f32 %v2586_v5, %v2585_v15  ;;  %v4929_v18 = vadd.f32 %v4855_v58, %v2425_v35  ;;  %v2579_v51 = vmul.f32 %v4912_v54, %v4912_v54  ;;  %v2417_v56 = vadd.f32 %v4849_v23, %v4821_v3 }
 0x42a   : > { %v2582_v57 = vmul.f32 %v4920_v34, %v4920_v34  ;;  %v4943_v4 = vadd.f32 %v4855_v58, %v2411_v11  ;;  %v2415_v1 = vadd.f32 %v4847_v6, %v4817_v44  ;;  %v2576_v21 = vmul.f32 %v4934_v38, %v4934_v38 }
 0x42b   : > { %v2528_v2 = vadd.f32 %v4920_v34, %v4929_v18  ;;  %v2621_v45 = vadd.f32 %v2580_v22, %v2579_v51  ;;  %v4950_v3 = vadd.f32 %v4858_v36, %v2417_v56  ;;  %v2401_v47 = vadd.f32 %v4831_v63, %v4793_v12 }
 0x42c   : > { %2637 = vadd.xlane.f32.xlu1 %v2636_v60  ;;  %2532 = vadd.xlane.f32.xlu0 %v2531_v29  ;;  %v2581_v60 = vmul.f32 %v4929_v18, %v4929_v18  ;;  %v2519_v29 = vadd.f32 %v4934_v38, %v4943_v4  ;;  %v4959_v44 = vadd.f32 %v4855_v58, %v2415_v1 }
 0x42d   : > { %v2575_v6 = vmul.f32 %v4943_v4, %v4943_v4  ;;  %v4965_v43 = vadd.f32 %v4858_v36, %v4833_v33  ;;  %v4972_v12 = vadd.f32 %v4855_v58, %v2401_v47  ;;  %v2405_v63 = vadd.f32 %v4837_v17, %v4799_v55 }
 0x42e   : > { %v2624_v23 = vadd.f32 %v2582_v57, %v2581_v60  ;;  %v2522_v39 = vadd.f32 %v4950_v3, %v4959_v44  ;;  %v2577_v5 = vmul.f32 %v4959_v44, %v4959_v44  ;;  %v2393_v33 = vadd.f32 %v4823_v40, %v4787_v49 }
 0x42f   : > { %v4982_v35 = vadd.f32 %v4858_v36, %v4839_v50  ;;  %v2513_v25 = vadd.f32 %v4965_v43, %v4972_v12  ;;  %v2391_v55 = vadd.f32 %v4819_v14, %v4785_v42  ;;  %v4991_v17 = vadd.f32 %v4855_v58, %v2405_v63 }
 0x430   : > { %2535 = vadd.xlane.f32.xlu1 %v2534_v13  ;;  %2628 = vadd.xlane.f32.xlu0 %v2627_v59  ;;  %v2615_v13 = vadd.f32 %v2576_v21, %v2575_v6  ;;  %v2578_v59 = vmul.f32 %v4950_v3, %v4950_v3  ;;  %v2571_v49 = vmul.f32 %v4972_v12, %v4972_v12  ;;  %v5456_v21 = vld [vmem:[#allocation12_spill] sm:$0xff] }
 0x431   : > { %v4996_v40 = vadd.f32 %v4858_v36, %v2393_v33  ;;  %v2397_v50 = vadd.f32 %v4829_v53, %v4791_v32  ;;  %v2574_v42 = vmul.f32 %v4982_v35, %v4982_v35  ;;  %v5005_v14 = vadd.f32 %v4855_v58, %v2391_v55 }
 0x432   : > { %v2618_v15 = vadd.f32 %v2578_v59, %v2577_v5  ;;  %v2395_v11 = vadd.f32 %v4825_v26, %v4789_v61  ;;  %v2573_v51 = vmul.f32 %v4991_v17, %v4991_v17  ;;  %v2383_v32 = vadd.f32 %v4809_v41, %v4779_v20  ;;  %v5458_v59 = vld [vmem:[#allocation11_spill] sm:$0xff] }
 0x433   : > { %v5014_v53 = vadd.f32 %v4858_v36, %v2397_v50  ;;  %v2381_v61 = vadd.f32 %v4805_v7, %v4777_v48  ;;  %v2567_v20 = vmul.f32 %v5005_v14, %v5005_v14  ;;  %v2387_v57 = vadd.f32 %v4815_v27, %v4783_v10  ;;  %v5457_v10 = vld [vmem:[#allocation16_spill] sm:$0xff] }
 0x434   : > { %2631 = vadd.xlane.f32.xlu1 %v2630_v24  ;;  %2526 = vadd.xlane.f32.xlu0 %v2525_v8  ;;  %v2572_v24 = vmul.f32 %v4965_v43, %v4965_v43  ;;  %v2516_v8 = vadd.f32 %v4982_v35, %v4991_v17  ;;  %v2612_v56 = vadd.f32 %v2574_v42, %v2573_v51  ;;  %v5463_v42 = vld [vmem:[#allocation17_spill] sm:$0xff] }
 0x435   : > { %v5023_v26 = vadd.f32 %v4855_v58, %v2395_v11  ;;  %v5028_v41 = vadd.f32 %v4858_v36, %v2383_v32  ;;  %v2570_v48 = vmul.f32 %v5014_v53, %v5014_v53  ;;  %v5037_v7 = vadd.f32 %v4855_v58, %v2381_v61 }
 0x436   : > { %v2609_v22 = vadd.f32 %v2572_v24, %v2571_v49  ;;  %v2373_v27 = vadd.f32 %v5457_v10, %v5456_v21  ;;  %v5046_v47 = vadd.f32 %v4858_v36, %v2387_v57 }
 0x437   : > { %v2510_v1 = vadd.f32 %v5014_v53, %v5023_v26  ;;  %v2563_v5 = vmul.f32 %v5037_v7, %v5037_v7 }
 0x438   : > { %2529 = vadd.xlane.f32.xlu1 %v2528_v2  ;;  %2622 = vadd.xlane.f32.xlu0 %v2621_v45  ;;  %v2507_v2 = vadd.f32 %v4996_v40, %v5005_v14  ;;  %v2568_v45 = vmul.f32 %v4996_v40, %v4996_v40  ;;  %v5060_v33 = vadd.f32 %v4858_v36, %v2373_v27 }
 0x439   : > { %v2566_v50 = vmul.f32 %v5046_v47, %v5046_v47 }
 0x43a   : > { %v2603_v60 = vadd.f32 %v2568_v45, %v2567_v20  ;;  %v2560_v45 = vmul.f32 %v5060_v33, %v5060_v33 }
 0x43c   : > { %2625 = vadd.xlane.f32.xlu1 %v2624_v23  ;;  %2520 = vadd.xlane.f32.xlu0 %v2519_v29  ;;  %v2385_v23 = vadd.f32 %v4811_v46, %v4781_v52  ;;  %v2569_v29 = vmul.f32 %v5023_v26, %v5023_v26  ;;  %v5459_v52 = vld [vmem:[#allocation15_spill] sm:$0xff] }
 0x43d   : > { %v2371_v46 = vadd.f32 %v5459_v52, %v5458_v59 }
 0x43e   : > { %v2606_v6 = vadd.f32 %v2570_v48, %v2569_v29  ;;  %v5055_v63 = vadd.f32 %v4855_v58, %v2385_v23  ;;  %v2985_v23 = vld [vmem:[#allocation2] sm:$0x1] }
 0x440   : > { %2523 = vadd.xlane.f32.xlu1 %v2522_v39  ;;  %2616 = vadd.xlane.f32.xlu0 %v2615_v13  ;;  %v2501_v39 = vadd.f32 %v5028_v41, %v5037_v7  ;;  %v2564_v13 = vmul.f32 %v5028_v41, %v5028_v41  ;;  %v2504_v55 = vadd.f32 %v5046_v47, %v5055_v63 }
 0x441   : > { %v2565_v51 = vmul.f32 %v5055_v63, %v5055_v63 }
 0x442   : > { %v2597_v49 = vadd.f32 %v2564_v13, %v2563_v5 }
 0x444   : > { %2619 = vadd.xlane.f32.xlu1 %v2618_v15  ;;  %2514 = vadd.xlane.f32.xlu0 %v2513_v25  ;;  %v5460_v15 = vld [vmem:[#allocation14_spill] sm:$0xff] }
 0x445   : > { %v5461_v25 = vld [vmem:[#allocation18_spill] sm:$0xff] }
 0x446   : > { %v2377_v24 = vadd.f32 %v5461_v25, %v5460_v15 }
 0x448   : > { %2517 = vadd.xlane.f32.xlu1 %v2516_v8  ;;  %2610 = vadd.xlane.f32.xlu0 %v2609_v22  ;;  %v5069_v8 = vadd.f32 %v4855_v58, %v2371_v46  ;;  %v5462_v22 = vld [vmem:[#allocation13_spill] sm:$0xff]  ;;  %v5076_v32 = vadd.f32 %v4858_v36, %v2377_v24 }
 0x449   : > { %v2375_v11 = vadd.f32 %v5463_v42, %v5462_v22 }
 0x44a   : > { %v2559_v20 = vmul.f32 %v5069_v8, %v5069_v8 }
 0x44b   : > { %v5083_v61 = vadd.f32 %v4855_v58, %v2375_v11  ;;  %v3324_v58 = vld [vmem:[%s5416_s15 + $0x4] ss:$8 sps:$4 sm:$0xff]  }
 0x44c   : > { %2613 = vadd.xlane.f32.xlu1 %v2612_v56  ;;  %2508 = vadd.xlane.f32.xlu0 %v2507_v2  ;;  %v2600_v56 = vadd.f32 %v2566_v50, %v2565_v51  ;;  %v2495_v2 = vadd.f32 %v5060_v33, %v5069_v8  ;;  %v2591_v36 = vadd.f32 %v2560_v45, %v2559_v20 }
 0x44d   : > { %v2498_v57 = vadd.f32 %v5076_v32, %v5083_v61  ;;  %2977 = vmatprep.mubr.bf16.mxu0 %v3324_v58 }
 0x450   : > { %2511 = vadd.xlane.f32.xlu1 %v2510_v1  ;;  %2604 = vadd.xlane.f32.xlu0 %v2603_v60  ;;  %v2562_v1 = vmul.f32 %v5076_v32, %v5076_v32  ;;  %v2561_v60 = vmul.f32 %v5083_v61, %v5083_v61 }
 0x452   : > { %v2594_v48 = vadd.f32 %v2562_v1, %v2561_v60 }
 0x454   : > { %2607 = vadd.xlane.f32.xlu1 %v2606_v6  ;;  %2502 = vadd.xlane.f32.xlu0 %v2501_v39 }
 0x458   : > { %2505 = vadd.xlane.f32.xlu1 %v2504_v55  ;;  %2598 = vadd.xlane.f32.xlu0 %v2597_v49 }
 0x45c   : > { %2601 = vadd.xlane.f32.xlu1 %v2600_v56  ;;  %2496 = vadd.xlane.f32.xlu0 %v2495_v2 }
 0x460   : > { %2499 = vadd.xlane.f32.xlu1 %v2498_v57  ;;  %2592 = vadd.xlane.f32.xlu0 %v2591_v36 }
 0x464   : > { %2595 = vadd.xlane.f32.xlu1 %v2594_v48 }
 0x476   : > { %2988 = vperm.xlu0 %3217, %v2985_v23  }
 0x4ad   : > { %v2539_v29 = vpop.xlane.xlu0 %2538 }
 0x4ae   : > { %v5096_v21 = vmul.f32 0.00390625, %v2539_v29 }
 0x4b0   : > { %v2669_v39 = vmul.f32 %v5096_v21, %v5096_v21 }
 0x4b1   : > { %v2542_v10 = vpop.xlane.xlu1 %2541  ;;  %v2635_v27 = vpop.xlane.xlu0 %2634 }
 0x4b2   : > { %v5098_v6 = vmul.f32 0.00390625, %v2542_v10  ;;  %v2653_v13 = vmul.f32 0.00390625, %v2635_v27 }
 0x4b4   : > { %v2685_v59 = vsub.f32 %v2653_v13, %v2669_v39  ;;  %v2670_v15 = vmul.f32 %v5098_v6, %v5098_v6 }
 0x4b5   : > { %v2638_v52 = vpop.xlane.xlu1 %2637  ;;  %v2533_v46 = vpop.xlane.xlu0 %2532 }
 0x4b6   : > { %v2701_v5 = vmax.f32 %v2685_v59, 0.0  ;;  %v2654_v25 = vmul.f32 0.00390625, %v2638_v52  ;;  %v5104_v24 = vmul.f32 0.00390625, %v2533_v46  ;;  %v2493_v52 = vld [vmem:[%s5414_s13] sm:$0x3] }
 0x4b8   : > { %v2749_v55 = vadd.f32 1e-05, %v2701_v5  ;;  %v2686_v49 = vsub.f32 %v2654_v25, %v2670_v15  ;;  %v2667_v22 = vmul.f32 %v5104_v24, %v5104_v24  ;;  %v2494_v15 = vld [vmem:[%s5415_s14] sm:$0x3] }
 0x4b9   : > { %v2536_v50 = vpop.xlane.xlu1 %2535  ;;  %v2629_v42 = vpop.xlane.xlu0 %2628 }
 0x4ba   : > { %3389 = vrsqrt.f32 %v2749_v55  ;;  %v2702_v11 = vmax.f32 %v2686_v49, 0.0  ;;  %v5108_v51 = vmul.f32 0.00390625, %v2536_v50  ;;  %v2651_v56 = vmul.f32 0.00390625, %v2629_v42  ;;  %v5464_v50 = vld [vmem:[#allocation9_spill] sm:$0xff]  ;;  %v5465_v42 = vld [vmem:[#allocation10_spill] sm:$0xff] }
 0x4bc   : > { %v2750_v2 = vadd.f32 1e-05, %v2702_v11  ;;  %v2683_v45 = vsub.f32 %v2651_v56, %v2667_v22  ;;  %v2668_v20 = vmul.f32 %v5108_v51, %v5108_v51  ;;  %v5127_v22 = vrot.slane %v2493_v52, %v5464_v50 }
 0x4bd   : > { %v2632_v57 = vpop.xlane.xlu1 %2631  ;;  %v2527_v36 = vpop.xlane.xlu0 %2526  ;;  %v5130_v11 = vrot.slane %v2493_v52, %v5465_v42 }
 0x4be   : > { %3391 = vrsqrt.f32 %v2750_v2  ;;  %v2699_v1 = vmax.f32 %v2683_v45, 0.0  ;;  %v2652_v60 = vmul.f32 0.00390625, %v2632_v57  ;;  %v5112_v48 = vmul.f32 0.00390625, %v2527_v36 }
 0x4bf   : > { %v2731_v57 = vsub.f32 %v4861_v28, %v5096_v21  ;;  %v2732_v36 = vsub.f32 %v4864_v19, %v5096_v21  ;;  %v2728_v28 = vsub.f32 %v4879_v16, %v5104_v24 }
 0x4c0   : > { %v2747_v58 = vadd.f32 1e-05, %v2699_v1  ;;  %v2684_v23 = vsub.f32 %v2652_v60, %v2668_v20  ;;  %v2665_v13 = vmul.f32 %v5112_v48, %v5112_v48  ;;  %v5139_v1 = vrot.slane %v2494_v15, %v5464_v50 }
 0x4c1   : > { %v2530_v29 = vpop.xlane.xlu1 %2529  ;;  %v2623_v10 = vpop.xlane.xlu0 %2622  ;;  %v5142_v60 = vrot.slane %v2494_v15, %v5465_v42 }
 0x4c2   : > { %v2700_v27 = vmax.f32 %v2684_v23, 0.0  ;;  %v5114_v39 = vmul.f32 0.00390625, %v2530_v29  ;;  %v2649_v59 = vmul.f32 0.00390625, %v2623_v10  ;;  %3393 = vrsqrt.f32 %v2747_v58 }
 0x4c3   : > { %v2733_v58 = vsub.f32 %v4871_v37, %v5098_v6  ;;  %v2734_v23 = vsub.f32 %v4874_v30, %v5098_v6  ;;  %v2727_v29 = vsub.f32 %v4886_v0, %v5104_v24  ;;  %v2729_v0 = vsub.f32 %v4899_v9, %v5108_v51 }
 0x4c4   : > { %v2748_v46 = vadd.f32 1e-05, %v2700_v27  ;;  %v2681_v5 = vsub.f32 %v2649_v59, %v2665_v13  ;;  %v2666_v25 = vmul.f32 %v5114_v39, %v5114_v39  ;;  %v2730_v6 = vsub.f32 %v4891_v31, %v5108_v51 }
 0x4c5   : > { %v2626_v55 = vpop.xlane.xlu1 %2625  ;;  %v2521_v49 = vpop.xlane.xlu0 %2520 }
 0x4c6   : > { %3395 = vrsqrt.f32 %v2748_v46  ;;  %v2697_v56 = vmax.f32 %v2681_v5, 0.0  ;;  %v2650_v2 = vmul.f32 0.00390625, %v2626_v55  ;;  %v5132_v45 = vmul.f32 0.00390625, %v2521_v49 }
 0x4c7   : > { %v3390_v20 = vpop.eup %3389 }
 0x4c8   : > { %v2682_v10 = vsub.f32 %v2650_v2, %v2666_v25  ;;  %v2745_v19 = vadd.f32 1e-05, %v2697_v56  ;;  %v2796_v13 = vmul.f32 %v3390_v20, %v2732_v36  ;;  %v2795_v59 = vmul.f32 %v3390_v20, %v2731_v57 }
 0x4c9   : > { %v2524_v21 = vpop.xlane.xlu1 %2523  ;;  %v2617_v27 = vpop.xlane.xlu0 %2616  ;;  %v2663_v37 = vmul.f32 %v5132_v45, %v5132_v45  ;;  %v2724_v25 = vsub.f32 %v4904_v62, %v5112_v48  ;;  %v2720_v15 = vsub.f32 %v4934_v38, %v5132_v45 }
 0x4ca   : > { %v2698_v52 = vmax.f32 %v2682_v10, 0.0  ;;  %v5152_v46 = vmul.f32 0.00390625, %v2524_v21  ;;  %v2647_v5 = vmul.f32 0.00390625, %v2617_v27  ;;  %v2839_v16 = vmul.f32 %v5130_v11, %v2796_v13 }
 0x4cb   : > { %v3392_v30 = vpop.eup %3391  ;;  %v2838_v24 = vmul.f32 %v5127_v22, %v2795_v59  ;;  %3397 = vrsqrt.f32 %v2745_v19 }
 0x4cc   : > { %v2746_v55 = vadd.f32 1e-05, %v2698_v52  ;;  %v2679_v49 = vsub.f32 %v2647_v5, %v2663_v37  ;;  %v2798_v2 = vmul.f32 %v3392_v30, %v2734_v23  ;;  %v2882_v9 = vadd.f32 %v5142_v60, %v2839_v16 }
 0x4cd   : > { %v2620_v42 = vpop.xlane.xlu1 %2619  ;;  %v2515_v56 = vpop.xlane.xlu0 %2514  ;;  %v2797_v20 = vmul.f32 %v3392_v30, %v2733_v58  ;;  %v2664_v51 = vmul.f32 %v5152_v46, %v5152_v46  ;;  %v2881_v19 = vadd.f32 %v5139_v1, %v2838_v24 }
 0x4ce   : > { %v2695_v31 = vmax.f32 %v2679_v49, 0.0  ;;  %v2648_v57 = vmul.f32 0.00390625, %v2620_v42  ;;  %v5169_v36 = vmul.f32 0.00390625, %v2515_v56  ;;  %3399 = vrsqrt.f32 %v2746_v55 }
 0x4cf   : > { %v2841_v10 = vmul.f32 %v5130_v11, %v2798_v2  ;;  %v2840_v21 = vmul.f32 %v5127_v22, %v2797_v20  ;;  %v3394_v27 = vpop.eup %3393  ;;  %v2914_v16 = vmax.f32 %v2882_v9, 0.0  ;;  %v2913_v56 = vmax.f32 %v2881_v19, 0.0 }
 0x4d0   : > { %v2743_v13 = vadd.f32 1e-05, %v2695_v31  ;;  %v2680_v59 = vsub.f32 %v2648_v57, %v2664_v51  ;;  %v2661_v37 = vmul.f32 %v5169_v36, %v5169_v36  ;;  %v2792_v31 = vmul.f32 %v3394_v27, %v2728_v28 }
 0x4d1   : > { %v2518_v52 = vpop.xlane.xlu1 %2517  ;;  %v2611_v5 = vpop.xlane.xlu0 %2610  ;;  %v2884_v30 = vadd.f32 %v5142_v60, %v2841_v10  ;;  %v2883_v55 = vadd.f32 %v5139_v1, %v2840_v21  ;;  %v2791_v51 = vmul.f32 %v3394_v27, %v2727_v29  ;;  %v2719_v57 = vsub.f32 %v4943_v4, %v5132_v45 }
 0x4d2   : > { %v2696_v24 = vmax.f32 %v2680_v59, 0.0  ;;  %v5182_v49 = vmul.f32 0.00390625, %v2518_v52  ;;  %v2645_v42 = vmul.f32 0.00390625, %v2611_v5  ;;  %3401 = vrsqrt.f32 %v2743_v13 }
 0x4d3   : > { %v3396_v2 = vpop.eup %3395  ;;  %v2916_v20 = vmax.f32 %v2884_v30, 0.0  ;;  %v2915_v23 = vmax.f32 %v2883_v55, 0.0  ;;  %v2835_v27 = vmul.f32 %v5130_v11, %v2792_v31  ;;  %v5469_v4 = vsub.f32 %v4959_v44, %v5152_v46 }
 0x4d4   : > { %v2677_v9 = vsub.f32 %v2645_v42, %v2661_v37  ;;  %v2744_v10 = vadd.f32 1e-05, %v2696_v24  ;;  %v2794_v5 = vmul.f32 %v3396_v2, %v2730_v6  ;;  %v2662_v30 = vmul.f32 %v5182_v49, %v5182_v49 }
 0x4d5   : > { %v2614_v21 = vpop.xlane.xlu1 %2613  ;;  %v2509_v59 = vpop.xlane.xlu0 %2508  ;;  %v2932_v52 = vpack.c.bf16 %v2916_v20, %v2914_v16  ;;  %v2931_v58 = vpack.c.bf16 %v2915_v23, %v2913_v56  ;;  %v2793_v13 = vmul.f32 %v3396_v2, %v2729_v0  ;;  %v2834_v37 = vmul.f32 %v5127_v22, %v2791_v51 }
 0x4d6   : > { %v2693_v19 = vmax.f32 %v2677_v9, 0.0  ;;  %v2646_v28 = vmul.f32 0.00390625, %v2614_v21  ;;  %v5190_v29 = vmul.f32 0.00390625, %v2509_v59  ;;  %v2837_v55 = vmul.f32 %v5130_v11, %v2794_v5 }
 0x4d7   : > { %2945 = vmatprep.subr.bf16.mxu0 %v2932_v52  ;;  %v2722_v6 = vsub.f32 %v4950_v3, %v5152_v46  ;;  %3403 = vrsqrt.f32 %v2744_v10  ;;  %v2878_v20 = vadd.f32 %v5142_v60, %v2835_v27  ;;  %v2836_v0 = vmul.f32 %v5127_v22, %v2793_v13 }
 0x4d8   : > { %v2741_v23 = vadd.f32 1e-05, %v2693_v19  ;;  %v2678_v24 = vsub.f32 %v2646_v28, %v2662_v30  ;;  %2946 = vmatpush1.bf16.xpose.msra.mxu0 %v2931_v58  ;;  %v2880_v31 = vadd.f32 %v5142_v60, %v2837_v55  ;;  %v3398_v2 = vpop.eup %3397  ;;  %v2659_v21 = vmul.f32 %v5190_v29, %v5190_v29 }
 0x4d9   : > { %v2512_v42 = vpop.xlane.xlu1 %2511  ;;  %v2605_v56 = vpop.xlane.xlu0 %2604  ;;  %v2910_v52 = vmax.f32 %v2878_v20, 0.0  ;;  %v2877_v58 = vadd.f32 %v5139_v1, %v2834_v37  ;;  %v2879_v10 = vadd.f32 %v5139_v1, %v2836_v0  ;;  %v2715_v30 = vsub.f32 %v4972_v12, %v5169_v36 }
 0x4da   : > { %v2694_v51 = vmax.f32 %v2678_v24, 0.0  ;;  %v5202_v9 = vmul.f32 0.00390625, %v2512_v42  ;;  %v2643_v59 = vmul.f32 0.00390625, %v2605_v56  ;;  %v2912_v5 = vmax.f32 %v2880_v31, 0.0 }
 0x4db   : > { %v3400_v19 = vpop.eup %3399  ;;  %3405 = vrsqrt.f32 %v2741_v23  ;;  %v2909_v56 = vmax.f32 %v2877_v58, 0.0  ;;  %v2911_v20 = vmax.f32 %v2879_v10, 0.0  ;;  %v2788_v23 = vmul.f32 %v3398_v2, %v2724_v25 }
 0x4dc   : > { %v2742_v28 = vadd.f32 1e-05, %v2694_v51  ;;  %v2675_v27 = vsub.f32 %v2643_v59, %v2659_v21  ;;  %v2660_v55 = vmul.f32 %v5202_v9, %v5202_v9  ;;  %v2930_v42 = vpack.c.bf16 %v2912_v5, %v2910_v52 }
 0x4dd   : > { %v2608_v13 = vpop.xlane.xlu1 %2607  ;;  %v2503_v24 = vpop.xlane.xlu0 %2502  ;;  %v2929_v0 = vpack.c.bf16 %v2911_v20, %v2909_v56  ;;  %v5466_v51 = vsub.f32 %v4920_v34, %v5114_v39  ;;  %v5467_v59 = vsub.f32 %v4912_v54, %v5112_v48  ;;  %v2716_v5 = vsub.f32 %v4965_v43, %v5169_v36 }
 0x4de   : > { %3407 = vrsqrt.f32 %v2742_v28  ;;  %v2691_v31 = vmax.f32 %v2675_v27, 0.0  ;;  %v2644_v37 = vmul.f32 0.00390625, %v2608_v13  ;;  %v5212_v16 = vmul.f32 0.00390625, %v2503_v24  ;;  %2947 = vmatprep.subr.bf16.mxu0 %v2930_v42 }
 0x4df   : > { %v2790_v21 = vmul.f32 %v3400_v19, %v5466_v51  ;;  %v2787_v52 = vmul.f32 %v3398_v2, %v5467_v59  ;;  %v2717_v58 = vsub.f32 %v4991_v17, %v5182_v49  ;;  %v3402_v27 = vpop.eup %3401  ;;  %v2718_v62 = vsub.f32 %v4982_v35, %v5182_v49 }
 0x4e0   : > { %v2739_v10 = vadd.f32 1e-05, %v2691_v31  ;;  %v2676_v28 = vsub.f32 %v2644_v37, %v2660_v55  ;;  %2948 = vmatpush1.bf16.xpose.msra.mxu0 %v2929_v0  ;;  %v2831_v13 = vmul.f32 %v5130_v11, %v2788_v23  ;;  %v5468_v48 = vsub.f32 %v4929_v18, %v5114_v39 }
 0x4e1   : > { %v2506_v25 = vpop.xlane.xlu1 %2505  ;;  %v2599_v34 = vpop.xlane.xlu0 %2598  ;;  %v2833_v54 = vmul.f32 %v5130_v11, %v2790_v21  ;;  %v2657_v55 = vmul.f32 %v5212_v16, %v5212_v16  ;;  %v2830_v37 = vmul.f32 %v5127_v22, %v2787_v52  ;;  %v2711_v23 = vsub.f32 %v5005_v14, %v5190_v29 }
 0x4e2   : > { %v2789_v2 = vmul.f32 %v3400_v19, %v5468_v48  ;;  %v2692_v24 = vmax.f32 %v2676_v28, 0.0  ;;  %v5234_v42 = vmul.f32 0.00390625, %v2506_v25  ;;  %v2641_v56 = vmul.f32 0.00390625, %v2599_v34 }
 0x4e3   : > { %v2874_v20 = vadd.f32 %v5142_v60, %v2831_v13  ;;  %v2876_v31 = vadd.f32 %v5142_v60, %v2833_v54  ;;  %3409 = vrsqrt.f32 %v2739_v10  ;;  %v2873_v25 = vadd.f32 %v5139_v1, %v2830_v37 }
 0x4e4   : > { %v2832_v0 = vmul.f32 %v5127_v22, %v2789_v2  ;;  %v2740_v18 = vadd.f32 1e-05, %v2692_v24  ;;  %v2673_v39 = vsub.f32 %v2641_v56, %v2657_v55  ;;  %v2658_v19 = vmul.f32 %v5234_v42, %v5234_v42  ;;  %v3404_v34 = vpop.eup %3403 }
 0x4e5   : > { %v2602_v51 = vpop.xlane.xlu1 %2601  ;;  %v2497_v21 = vpop.xlane.xlu0 %2496  ;;  %v2906_v59 = vmax.f32 %v2874_v20, 0.0  ;;  %v2908_v28 = vmax.f32 %v2876_v31, 0.0  ;;  %v2712_v10 = vsub.f32 %v4996_v40, %v5190_v29  ;;  %v2784_v24 = vmul.f32 %v3402_v27, %v2720_v15 }
 0x4e6   : > { %3411 = vrsqrt.f32 %v2740_v18  ;;  %v2689_v52 = vmax.f32 %v2673_v39, 0.0  ;;  %v2642_v13 = vmul.f32 0.00390625, %v2602_v51  ;;  %v5247_v54 = vmul.f32 0.00390625, %v2497_v21 }
 0x4e7   : > { %v2928_v48 = vpack.c.bf16 %v2908_v28, %v2906_v59  ;;  %v2875_v2 = vadd.f32 %v5139_v1, %v2832_v0  ;;  %v2713_v55 = vsub.f32 %v5023_v26, %v5202_v9  ;;  %v2905_v31 = vmax.f32 %v2873_v25, 0.0 }
 0x4e8   : > { %v2737_v56 = vadd.f32 1e-05, %v2689_v52  ;;  %v2674_v20 = vsub.f32 %v2642_v13, %v2658_v19  ;;  %v3406_v37 = vpop.eup %3405  ;;  %v2655_v51 = vmul.f32 %v5247_v54, %v5247_v54  ;;  %v2786_v0 = vmul.f32 %v3404_v34, %v2722_v6 }
 0x4e9   : > { %2949 = vmatprep.subr.bf16.mxu0 %v2928_v48  ;;  %v2907_v18 = vmax.f32 %v2875_v2, 0.0  ;;  %v2500_v39 = vpop.xlane.xlu1 %2499  ;;  %v2593_v21 = vpop.xlane.xlu0 %2592  ;;  %v2827_v38 = vmul.f32 %v5130_v11, %v2784_v24  ;;  %v2783_v48 = vmul.f32 %v3402_v27, %v2719_v57  ;;  %v2714_v3 = vsub.f32 %v5014_v53, %v5202_v9 }
 0x4ea   : > { %3413 = vrsqrt.f32 %v2737_v56  ;;  %v2690_v15 = vmax.f32 %v2674_v20, 0.0  ;;  %v5263_v59 = vmul.f32 0.00390625, %v2500_v39  ;;  %v2639_v19 = vmul.f32 0.00390625, %v2593_v21 }
 0x4eb   : > { %v3408_v28 = vpop.eup %3407  ;;  %v2927_v25 = vpack.c.bf16 %v2907_v18, %v2905_v31  ;;  %v2829_v52 = vmul.f32 %v5130_v11, %v2786_v0  ;;  %v2870_v13 = vadd.f32 %v5142_v60, %v2827_v38  ;;  %v2708_v6 = vsub.f32 %v5028_v41, %v5212_v16 }
 0x4ec   : > { %v2738_v2 = vadd.f32 1e-05, %v2690_v15  ;;  %v2671_v24 = vsub.f32 %v2639_v19, %v2655_v51  ;;  %v2656_v56 = vmul.f32 %v5263_v59, %v5263_v59  ;;  %v2785_v45 = vmul.f32 %v3404_v34, %v5469_v4 }
 0x4ed   : > { %2950 = vmatpush1.bf16.xpose.msra.mxu0 %v2927_v25  ;;  %v2596_v20 = vpop.xlane.xlu1 %2595  ;;  %v2872_v31 = vadd.f32 %v5142_v60, %v2829_v52  ;;  %v2902_v18 = vmax.f32 %v2870_v13, 0.0  ;;  %v2826_v27 = vmul.f32 %v5127_v22, %v2783_v48  ;;  %v2780_v51 = vmul.f32 %v3406_v37, %v2716_v5 }
 0x4ee   : > { %3415 = vrsqrt.f32 %v2738_v2  ;;  %v2687_v57 = vmax.f32 %v2671_v24, 0.0  ;;  %v2640_v53 = vmul.f32 0.00390625, %v2596_v20  ;;  %v2828_v39 = vmul.f32 %v5127_v22, %v2785_v45 }
 0x4ef   : > { %v2904_v41 = vmax.f32 %v2872_v31, 0.0  ;;  %v2782_v21 = vmul.f32 %v3408_v28, %v2718_v62  ;;  %v2869_v44 = vadd.f32 %v5139_v1, %v2826_v27  ;;  %v2779_v46 = vmul.f32 %v3406_v37, %v2715_v30 }
 0x4f0   : > { %v2735_v0 = vadd.f32 1e-05, %v2687_v57  ;;  %v2672_v38 = vsub.f32 %v2640_v53, %v2656_v56  ;;  %v3410_v34 = vpop.eup %3409  ;;  %v2871_v19 = vadd.f32 %v5139_v1, %v2828_v39  ;;  %v2823_v25 = vmul.f32 %v5130_v11, %v2780_v51 }
 0x4f1   : > { %v2926_v15 = vpack.c.bf16 %v2904_v41, %v2902_v18  ;;  %v2825_v43 = vmul.f32 %v5130_v11, %v2782_v21  ;;  %v2901_v35 = vmax.f32 %v2869_v44, 0.0  ;;  %v2781_v62 = vmul.f32 %v3408_v28, %v2717_v58 }
 0x4f2   : > { %3417 = vrsqrt.f32 %v2735_v0  ;;  %v2688_v5 = vmax.f32 %v2672_v38, 0.0  ;;  %v2903_v13 = vmax.f32 %v2871_v19, 0.0  ;;  %v2866_v12 = vadd.f32 %v5142_v60, %v2823_v25 }
 0x4f3   : > { %v3412_v52 = vpop.eup %3411  ;;  %2951 = vmatprep.subr.bf16.mxu0 %v2926_v15  ;;  %v2868_v36 = vadd.f32 %v5142_v60, %v2825_v43  ;;  %v2822_v30 = vmul.f32 %v5127_v22, %v2779_v46  ;;  %v2824_v48 = vmul.f32 %v5127_v22, %v2781_v62  ;;  %v2776_v2 = vmul.f32 %v3410_v34, %v2712_v10 }
 0x4f4   : > { %v2736_v37 = vadd.f32 1e-05, %v2688_v5  ;;  %v2778_v24 = vmul.f32 %v3412_v52, %v2714_v3  ;;  %v2925_v56 = vpack.c.bf16 %v2903_v13, %v2901_v35  ;;  %v2898_v17 = vmax.f32 %v2866_v12, 0.0 }
 0x4f5   : > { %v2900_v49 = vmax.f32 %v2868_v36, 0.0  ;;  %v2865_v58 = vadd.f32 %v5139_v1, %v2822_v30  ;;  %v2867_v28 = vadd.f32 %v5139_v1, %v2824_v48  ;;  %v2819_v20 = vmul.f32 %v5130_v11, %v2776_v2 }
 0x4f6   : > { %3419 = vrsqrt.f32 %v2736_v37  ;;  %v2821_v31 = vmul.f32 %v5130_v11, %v2778_v24  ;;  %2952 = vmatpush1.bf16.xpose.msra.mxu0 %v2925_v56  ;;  %v2775_v40 = vmul.f32 %v3410_v34, %v2711_v23  ;;  %v2777_v10 = vmul.f32 %v3412_v52, %v2713_v55 }
 0x4f7   : > { %v3414_v18 = vpop.eup %3413  ;;  %v2924_v4 = vpack.c.bf16 %v2900_v49, %v2898_v17  ;;  %v2899_v3 = vmax.f32 %v2867_v28, 0.0  ;;  %v2862_v45 = vadd.f32 %v5142_v60, %v2819_v20  ;;  %v2709_v27 = vsub.f32 %v5055_v63, %v5234_v42 }
 0x4f8   : > { %v2864_v57 = vadd.f32 %v5142_v60, %v2821_v31  ;;  %v2772_v53 = vmul.f32 %v3414_v18, %v2708_v6  ;;  %v2897_v41 = vmax.f32 %v2865_v58, 0.0  ;;  %v2818_v39 = vmul.f32 %v5127_v22, %v2775_v40 }
 0x4f9   : > { %2953 = vmatprep.subr.bf16.mxu0 %v2924_v4  ;;  %v2820_v14 = vmul.f32 %v5127_v22, %v2777_v10  ;;  %v2710_v29 = vsub.f32 %v5046_v47, %v5234_v42  ;;  %v2894_v26 = vmax.f32 %v2862_v45, 0.0  ;;  %v2707_v6 = vsub.f32 %v5037_v7, %v5212_v16 }
 0x4fa   : > { %v2896_v9 = vmax.f32 %v2864_v57, 0.0  ;;  %v2815_v23 = vmul.f32 %v5130_v11, %v2772_v53  ;;  %v2923_v51 = vpack.c.bf16 %v2899_v3, %v2897_v41  ;;  %v2861_v44 = vadd.f32 %v5139_v1, %v2818_v39 }
 0x4fb   : > { %v3416_v55 = vpop.eup %3415  ;;  %v2863_v63 = vadd.f32 %v5139_v1, %v2820_v14  ;;  %v2771_v46 = vmul.f32 %v3414_v18, %v2707_v6  ;;  %v2703_v47 = vsub.f32 %v5069_v8, %v5247_v54  ;;  %v2704_v42 = vsub.f32 %v5060_v33, %v5247_v54 }
 0x4fc   : > { %v2922_v21 = vpack.c.bf16 %v2896_v9, %v2894_v26  ;;  %v2774_v0 = vmul.f32 %v3416_v55, %v2710_v29  ;;  %v2773_v38 = vmul.f32 %v3416_v55, %v2709_v27  ;;  %v2858_v15 = vadd.f32 %v5142_v60, %v2815_v23 }
 0x4fd   : > { %v2895_v16 = vmax.f32 %v2863_v63, 0.0  ;;  %v2706_v8 = vsub.f32 %v5076_v32, %v5263_v59  ;;  %v2893_v35 = vmax.f32 %v2861_v44, 0.0  ;;  %v2814_v33 = vmul.f32 %v5127_v22, %v2771_v46 }
 0x4fe   : > { %v2817_v34 = vmul.f32 %v5130_v11, %v2774_v0  ;;  %2954 = vmatpush1.bf16.xpose.msra.mxu0 %v2923_v51  ;;  %v2816_v19 = vmul.f32 %v5127_v22, %v2773_v38  ;;  %v2890_v54 = vmax.f32 %v2858_v15, 0.0  ;;  %v2705_v36 = vsub.f32 %v5083_v61, %v5263_v59 }
 0x4ff   : > { %v3418_v7 = vpop.eup %3417  ;;  %2955 = vmatprep.subr.bf16.mxu0 %v2922_v21  ;;  %v2921_v30 = vpack.c.bf16 %v2895_v16, %v2893_v35  ;;  %v2857_v32 = vadd.f32 %v5139_v1, %v2814_v33 }
 0x500   : > { %v2860_v25 = vadd.f32 %v5142_v60, %v2817_v34  ;;  %v2768_v43 = vmul.f32 %v3418_v7, %v2704_v42  ;;  %v2767_v5 = vmul.f32 %v3418_v7, %v2703_v47  ;;  %v2859_v37 = vadd.f32 %v5139_v1, %v2816_v19 }
 0x501   : > { %v2889_v59 = vmax.f32 %v2857_v32, 0.0 }
 0x502   : > { %v2892_v62 = vmax.f32 %v2860_v25, 0.0  ;;  %v2811_v52 = vmul.f32 %v5130_v11, %v2768_v43  ;;  %v2810_v13 = vmul.f32 %v5127_v22, %v2767_v5  ;;  %v2891_v58 = vmax.f32 %v2859_v37, 0.0 }
 0x503   : > { %v3420_v12 = vpop.eup %3419 }
 0x504   : > { %v2920_v48 = vpack.c.bf16 %v2892_v62, %v2890_v54  ;;  %v2770_v2 = vmul.f32 %v3420_v12, %v2706_v8  ;;  %v2769_v24 = vmul.f32 %v3420_v12, %v2705_v36  ;;  %v2853_v56 = vadd.f32 %v5139_v1, %v2810_v13 }
 0x505   : > { %v2854_v49 = vadd.f32 %v5142_v60, %v2811_v52  ;;  %v2919_v4 = vpack.c.bf16 %v2891_v58, %v2889_v59 }
 0x506   : > { %v2813_v17 = vmul.f32 %v5130_v11, %v2770_v2  ;;  %2956 = vmatpush1.bf16.xpose.msra.mxu0 %v2921_v30  ;;  %v2812_v28 = vmul.f32 %v5127_v22, %v2769_v24  ;;  %v2885_v40 = vmax.f32 %v2853_v56, 0.0  ;;  %v3322_v22 = vld [vmem:[%s5416_s15] ss:$8 sps:$4 sm:$0xff]  }
 0x507   : > { %2957 = vmatprep.subr.bf16.mxu0 %v2920_v48  ;;  %v2886_v31 = vmax.f32 %v2854_v49, 0.0 }
 0x508   : > { %v2856_v61 = vadd.f32 %v5142_v60, %v2813_v17  ;;  %v2855_v20 = vadd.f32 %v5139_v1, %v2812_v28  ;;  %v2989_v60 = vpop.permute.xlu0 %2988 }
 0x509   : > { %v2994_v1 = vrot.slane %v2989_v60, %v5464_v50 }
 0x50a   : > { %v2888_v18 = vmax.f32 %v2856_v61, 0.0  ;;  %v2887_v10 = vmax.f32 %v2855_v20, 0.0 }
 0x50c   : > { %v2918_v11 = vpack.c.bf16 %v2888_v18, %v2886_v31  ;;  %v2917_v3 = vpack.c.bf16 %v2887_v10, %v2885_v40 }
 0x50e   : > { %2958 = vmatpush1.bf16.xpose.msra.mxu0 %v2919_v4 }
 0x50f   : > { %2959 = vmatprep.subr.bf16.mxu0 %v2918_v11 }
 0x516   : > { %2960 = vmatpush1.bf16.xpose.msra.mxu0 %v2917_v3 }
 0x51d   : > { %2978 = vmatmul.mubr.bf16.vlgmr.msra.gmra.mxu0 %v3322_v22 }
 0x5dd   : > { %v2979_v45 = vpop.f32.mrf.mxu0 }
 0x5de   : > { %v2995_v57 = vadd.f32 %v2994_v1, %v2979_v45 }
 0x5df   : > { %v2981_v53 = vpop.f32.mrf.mxu0 }
 0x5e0   : > { %2996 = vst [vmem:[%s559_s30] sm:$0x1] %v2995_v57 }
 0x5e1   : > { %v2982_v27 = vpop.f32.mrf.mxu0 }
 0x5e2   : > { %3434 = shalt.err (!%p3431_p3)
}
 0x5e3   : > { %s3435_s24 = scalar_lea.hbm %s5360_s25, 16  ;;  %s3439_s0 = scalar_lea.hbm %s5418_s17, 32 }
 0x5e4   : > { %p3436_p4 = scmp.ne.s32.totalorder %s5360_s25, %s3435_s24  ;;  %p3440_p9 = scmp.lt.s32.totalorder %s5360_s25, %s5418_s17 }
 0x5e5   : > { %p3441_p10 = scmp.lt.s32.totalorder %s3439_s0, %s3435_s24 }
 0x5e6   : > { %p3437_p7 = pnand %p3436_p4, %p3613_p5 }
 0x5e7   : > { %p3442_p11 = por %p3441_p10, %p3440_p9 }
 0x5e8   : > { %p3438_p8 = pneg %p3437_p7 }
 0x5ea   : > { %p3443_p12 = pnand %p3442_p11, %p3438_p8 }
 0x5ec   : > { %3446 = shalt.err (!%p3443_p12)
}
 0x5ed   : > { %3177 = dma.vmem_to_hbm [thread:$0]  (%p3613_p5), %s5362_s23, 16, %s5360_s25, %s2998_s28   ;;  %v2983_v50 = vpop.f32.mrf.mxu0 }
 0x5ee PF: > { %p3183_p13 = scmp.ge.s32.totalorder %s3481_s29, 2  ;;  %s3022_s1 = sand.u32 1, %s3469_s26  }
 0x5ef   : > { %s3023_s19 = scalar_lea.sflag [#allocation4], %s3022_s1 }
 0x5f0   : > { %p3180_p0 = pnand %p3183_p13, %p3617_p6 }
 0x5f2   : > { %p3181_p1 = pneg %p3180_p0 }
 0x5f4   : > { %3464 = dma.done.wait (%p3181_p1), %s3023_s19, 16  }
 0x5f5   : > { %3466 = vsyncadd (%p3181_p1), %s3023_s19, 4294967280  ;;  %s5470_s29 = sld [smem:[#allocation7_spill]]  ;;  %s5473_s26 = smov %s3473_s27 }
 0x5f6   : > { %s5471_s22 = sld [smem:[#allocation6_spill]] }
 0x5f7   : > { %s5472_s28 = sld [smem:[#allocation8_spill]] }
 0x5fb   : > { %p29_p2 = scmp.ge.s32.totalorder %s5470_s29, 4  }
 0x5fc   : > { %s5474_s27 = smov %s5471_s22 }
 0x5fd   :  { %31 = sbr.rel (!%p29_p2) target bundleno = 7 (0x7), region = 126 }
 0x602   :  { %3027 = vsyncpa [#allocation4], 1 }
 0x603   :  { %3029 = vsyncpa [#allocation4 + $0x1], 1 }

</bundles_post_ra>
